<compile_context>
chip_gen: v7x
topology: tpu7x:2x2x1
jax: 0.10.0
libtpu: 0.0.40
codegen_flags: <defaults>
</compile_context>

<pallas_src>
import functools

import jax
import jax.numpy as jnp
from jax import lax
from jax.experimental import pallas as pl
from jax.experimental.pallas import tpu as pltpu

_C1 = 0.01 ** 2
_C2 = 0.03 ** 2
_PREC = lax.Precision.HIGHEST  # see header note on Mosaic precision support


def _gaussian_1d(window_size, sigma):
    half = window_size // 2
    x = jnp.arange(window_size, dtype=jnp.float32)
    g = jnp.exp(-((x - half) ** 2) / (2.0 * sigma ** 2))
    return g / jnp.sum(g)


def _band_matrix(size, g, window_size):
    """B[i, k] = g[k - i + half] for in-range taps, else 0.

    (B @ X) equals a zero-padded 'same' 1-D cross-correlation of X's rows with
    g, matching F.conv2d(..., padding=window_size//2) along that axis."""
    half = window_size // 2
    idx = jnp.arange(size)
    off = idx[None, :] - idx[:, None] + half
    valid = (off >= 0) & (off < window_size)
    return jnp.where(valid, g[jnp.clip(off, 0, window_size - 1)], 0.0).astype(jnp.float32)


def _ssim_kernel(gh_ref, gwt_ref, x1_ref, x2_ref, out_ref, *,
                 p_tile, h, w, num_planes):
    """One grid step = p_tile planes; writes one lane-dense partial-sum row."""
    step = pl.program_id(0)
    p = p_tile

    x1 = x1_ref[...].astype(jnp.float32).reshape(p * h, w)
    x2 = x2_ref[...].astype(jnp.float32).reshape(p * h, w)

    # Fold the p_tile planes and the 5 blur operands into the non-contracting
    # (sublane) dimension so the column pass is a single large MXU matmul.
    a = jnp.concatenate([x1, x2, x1 * x1, x2 * x2, x1 * x2], axis=0)  # (5PH, W)

    # Column (W) pass: zero-padded 'same' Gaussian conv as one banded matmul.
    t = jnp.dot(a, gwt_ref[...], precision=_PREC,
                preferred_element_type=jnp.float32)                   # (5PH, W)

    # Row (H) pass: one fused batched MXU contraction over all 5*p_tile planes
    # (same canonical 'b.k,bk.->b..' form as the flash-attention PV einsum).
    t3 = t.reshape(5 * p, h, w)
    gh_b = jnp.broadcast_to(gh_ref[...], (5 * p, h, h))
    z = jnp.einsum("bkh,bhw->bkw", gh_b, t3, precision=_PREC,
                   preferred_element_type=jnp.float32)                # (5P, H, W)

    # Slices along the leading (untiled) dim are free views.
    mu1, mu2 = z[0:p], z[p:2 * p]
    b11, b22, b12 = z[2 * p:3 * p], z[3 * p:4 * p], z[4 * p:5 * p]

    mu1_sq = mu1 * mu1
    mu2_sq = mu2 * mu2
    mu1_mu2 = mu1 * mu2
    sigma1_sq = b11 - mu1_sq
    sigma2_sq = b22 - mu2_sq
    sigma12 = b12 - mu1_mu2

    num = (2.0 * mu1_mu2 + _C1) * (2.0 * sigma12 + _C2)
    den = (mu1_sq + mu2_sq + _C1) * (sigma1_sq + sigma2_sq + _C2)
    ssim = num * pl.reciprocal(den, approx=True)   # divide -> idle EUP slot

    # Mask planes past num_planes in the (possibly partial) last grid step.
    valid_planes = jnp.minimum(num_planes - step * p, p)
    plane_idx = lax.broadcasted_iota(jnp.int32, ssim.shape, 0)
    ssim = jnp.where(plane_idx < valid_planes, ssim, 0.0)

    # One cross-lane reduction per grid step; lane-dense (1, 128) store.
    out_ref[...] = jnp.broadcast_to(jnp.sum(ssim), (1, 128))


def _round_up(x, m):
    return (x + m - 1) // m * m


def _vmem_estimate(p_tile, h, w, in_itemsize):
    """Padding-aware VMEM working-set estimate (bytes) for one grid step."""
    h8, w8 = _round_up(h, 8), _round_up(w, 8)
    h128, w128 = _round_up(h, 128), _round_up(w, 128)
    plane = h8 * w128
    inputs = 2 * 2 * p_tile * plane * in_itemsize          # x1, x2 double-buffered
    gauss = 2 * 4 * (h8 * h128 + w8 * w128)                # band matrices (2 buffers)
    stack = _round_up(5 * p_tile * h, 8) * w128 * 4        # operand stack / W-pass out
    gh_b = 5 * p_tile * h8 * h128 * 4                      # broadcast row-pass weights
    zbuf = 5 * p_tile * plane * 4                          # row-pass result
    elem = 8 * p_tile * plane * 4                          # elementwise temporaries
    out = 2 * 8 * 128 * 4
    return int(1.25 * (inputs + gauss + 2 * stack + gh_b + zbuf + elem + out))


def _physical_vmem_bytes():
    try:
        return int(pltpu.get_tpu_info().vmem_capacity_bytes)
    except Exception:
        return 64 * 1024 * 1024   # conservative (v7x-sized) fallback


def ssim_loss(img1, img2, window_size=11, sigma=1.5):
    """Pallas implementation of SSIM(window_size=11, size_average=True).forward."""
    assert img1.ndim == 4 and img1.shape == img2.shape
    n, c, h, w = img1.shape
    num_planes = n * c

    g = _gaussian_1d(window_size, sigma)
    gh = _band_matrix(h, g, window_size)            # (H, H): left  (row / H) conv
    gwt = _band_matrix(w, g, window_size).T         # (W, W): X @ G_W^T = column conv

    # Free reshapes of the original NCHW tensors (no host-side cast/pad copies).
    x1 = img1.reshape(num_planes, h, w)
    x2 = img2.reshape(num_planes, h, w)

    # --- VMEM-aware tile selection (padding + double buffering included). ---
    in_itemsize = jnp.dtype(img1.dtype).itemsize
    physical = _physical_vmem_bytes()
    budget = min(20 * 1024 * 1024, physical // 5)   # ~12.8 MiB on v7x, 20 MiB else
    p_tile = 1
    for p in range(1, num_planes + 1):
        if _vmem_estimate(p, h, w, in_itemsize) <= budget:
            p_tile = p
    est = _vmem_estimate(p_tile, h, w, in_itemsize)
    # Generation-aware scoped-VMEM limit: at least 32 MiB (above v5e's 16 MiB
    # default), at most 75% of physical VMEM (headroom on v7x's 64 MiB).
    vmem_limit = int(min(max(32 * 1024 * 1024, 2 * est), (physical * 3) // 4))

    num_steps = pl.cdiv(num_planes, p_tile)

    kernel = functools.partial(
        _ssim_kernel, p_tile=p_tile, h=h, w=w, num_planes=num_planes)

    partials = pl.pallas_call(
        kernel,
        out_shape=jax.ShapeDtypeStruct((num_steps, 128), jnp.float32),
        grid_spec=pltpu.PrefetchScalarGridSpec(
            num_scalar_prefetch=0,
            grid=(num_steps,),
            in_specs=[
                pl.BlockSpec((h, h), lambda i: (0, 0)),            # G_H (resident)
                pl.BlockSpec((w, w), lambda i: (0, 0)),            # G_W^T (resident)
                pl.BlockSpec((p_tile, h, w), lambda i: (i, 0, 0)),
                pl.BlockSpec((p_tile, h, w), lambda i: (i, 0, 0)),
            ],
            out_specs=pl.BlockSpec((1, 128), lambda i: (i, 0)),
        ),
        # Per-step partial sums -> no revisited block -> plane axis is parallel
        # (lets v7x shard grid steps across both TensorCores).
        compiler_params=pltpu.CompilerParams(
            dimension_semantics=("parallel",),
            vmem_limit_bytes=vmem_limit,
        ),
    )(gh, gwt, x1, x2)

    # Tiny JAX epilogue: loss = (1 - mean(ssim_map)) * 0.5
    ssim_sum = jnp.sum(partials[:, 0])
    return 0.5 - 0.5 * ssim_sum / (num_planes * h * w)


def ssim_loss_ref(img1, img2, window_size=11, sigma=1.5):
    """Pure-JAX reference mirroring the PyTorch forward (depthwise conv form)."""
    _, c, _, _ = img1.shape
    half = window_size // 2
    g = _gaussian_1d(window_size, sigma)
    w2d = jnp.outer(g, g)
    kern = jnp.broadcast_to(w2d, (c, 1, window_size, window_size)).astype(jnp.float32)

    def conv(x):
        return lax.conv_general_dilated(
            x.astype(jnp.float32), kern, window_strides=(1, 1),
            padding=[(half, half), (half, half)],
            dimension_numbers=("NCHW", "OIHW", "NCHW"),
            feature_group_count=c, precision=lax.Precision.HIGHEST)

    mu1 = conv(img1)
    mu2 = conv(img2)
    mu1_sq, mu2_sq, mu1_mu2 = mu1 * mu1, mu2 * mu2, mu1 * mu2
    sigma1_sq = conv(img1 * img1) - mu1_sq
    sigma2_sq = conv(img2 * img2) - mu2_sq
    sigma12 = conv(img1 * img2) - mu1_mu2
    ssim_map = ((2.0 * mu1_mu2 + _C1) * (2.0 * sigma12 + _C2)) / (
        (mu1_sq + mu2_sq + _C1) * (sigma1_sq + sigma2_sq + _C2))
    return (1.0 - jnp.mean(ssim_map)) * 0.5


if __name__ == "__main__":
    key = jax.random.PRNGKey(0)
    k1, k2 = jax.random.split(key)
    # Small NCHW inputs consistent with the module's 4-D image interface.
    img1 = jax.random.uniform(k1, (2, 4, 16, 16), dtype=jnp.float32)
    img2 = jax.random.uniform(k2, (2, 4, 16, 16), dtype=jnp.float32)

    loss = ssim_loss(img1, img2)
    jax.block_until_ready(loss)

    ref = ssim_loss_ref(img1, img2)
    assert jnp.allclose(loss, ref, rtol=1e-3, atol=1e-3), (loss, ref)

    print("KERNEL_OK")
</pallas_src>

<mosaic_0001>
module attributes {stable_mosaic.version = 11 : i64} {
  func.func @_ssim_kernel(%arg0: i32, %arg1: memref<16x16xf32, #tpu.memory_space<vmem>>, %arg2: memref<16x16xf32, #tpu.memory_space<vmem>>, %arg3: memref<8x16x16xf32, #tpu.memory_space<vmem>>, %arg4: memref<8x16x16xf32, #tpu.memory_space<vmem>>, %arg5: memref<1x128xf32, #tpu.memory_space<vmem>>) attributes {dimension_semantics = [#tpu.dimension_semantics<parallel>], iteration_bounds = array<i64: 1>, scalar_prefetch = 0 : i64, scratch_operands = 0 : i64, tpu.core_type = #tpu.core_type<tc>, window_params = [{pipeline_mode = #tpu.pipeline_mode<synchronous>, transform_indices = @transform_0, window_bounds = array<i64: 16, 16>}, {pipeline_mode = #tpu.pipeline_mode<synchronous>, transform_indices = @transform_1, window_bounds = array<i64: 16, 16>}, {transform_indices = @transform_2, window_bounds = array<i64: 8, 16, 16>}, {transform_indices = @transform_3, window_bounds = array<i64: 8, 16, 16>}, {transform_indices = @transform_4, window_bounds = array<i64: 1, 128>}]} {
    %c0 = arith.constant 0 : index
    %c0_0 = arith.constant 0 : index
    %c0_1 = arith.constant 0 : index
    %0 = vector.load %arg3[%c0, %c0_0, %c0_1] : memref<8x16x16xf32, #tpu.memory_space<vmem>>, vector<8x16x16xf32>
    %1 = vector.shape_cast %0 : vector<8x16x16xf32> to vector<128x16xf32>
    %c0_2 = arith.constant 0 : index
    %c0_3 = arith.constant 0 : index
    %c0_4 = arith.constant 0 : index
    %2 = vector.load %arg4[%c0_2, %c0_3, %c0_4] : memref<8x16x16xf32, #tpu.memory_space<vmem>>, vector<8x16x16xf32>
    %3 = vector.shape_cast %2 : vector<8x16x16xf32> to vector<128x16xf32>
    %4 = arith.mulf %1, %1 : vector<128x16xf32>
    %5 = arith.mulf %3, %3 : vector<128x16xf32>
    %6 = arith.mulf %1, %3 : vector<128x16xf32>
    %7 = tpu.concatenate %1, %3, %4, %5, %6 in 0 : vector<128x16xf32>, vector<128x16xf32>, vector<128x16xf32>, vector<128x16xf32>, vector<128x16xf32> -> vector<640x16xf32>
    %c0_5 = arith.constant 0 : index
    %c0_6 = arith.constant 0 : index
    %8 = vector.load %arg2[%c0_5, %c0_6] : memref<16x16xf32, #tpu.memory_space<vmem>>, vector<16x16xf32>
    %cst = arith.constant dense<0.000000e+00> : vector<640x16xf32>
    %9 = tpu.matmul %7, %8, %cst {dimension_numbers = #tpu.dot_dimension_numbers<[1], [0], [0], [1], [0, 0, 1, 1], [], []>, precision = #tpu.contract_precision<fp32>} : vector<640x16xf32>, vector<16x16xf32>, vector<640x16xf32> -> vector<640x16xf32>
    %10 = vector.shape_cast %9 : vector<640x16xf32> to vector<40x16x16xf32>
    %c0_7 = arith.constant 0 : index
    %c0_8 = arith.constant 0 : index
    %11 = vector.load %arg1[%c0_7, %c0_8] : memref<16x16xf32, #tpu.memory_space<vmem>>, vector<16x16xf32>
    %12 = vector.shape_cast %11 : vector<16x16xf32> to vector<1x16x16xf32>
    %13 = vector.broadcast %12 : vector<1x16x16xf32> to vector<40x16x16xf32>
    "tpu.trace_start"() <{level = 10 : i32, message = "bkh,bhw->bkw"}> : () -> ()
    %cst_9 = arith.constant dense<0.000000e+00> : vector<40x16x16xf32>
    %14 = tpu.matmul %13, %10, %cst_9 {dimension_numbers = #tpu.dot_dimension_numbers<[2], [1], [1], [2], [0, 0, 0, 1, 1, 2], [0], [0]>, precision = #tpu.contract_precision<fp32>} : vector<40x16x16xf32>, vector<40x16x16xf32>, vector<40x16x16xf32> -> vector<40x16x16xf32>
    "tpu.trace_stop"() : () -> ()
    %15 = vector.extract_strided_slice %14 {offsets = [0, 0, 0], sizes = [8, 16, 16], strides = [1, 1, 1]} : vector<40x16x16xf32> to vector<8x16x16xf32>
    %16 = vector.extract_strided_slice %14 {offsets = [8, 0, 0], sizes = [8, 16, 16], strides = [1, 1, 1]} : vector<40x16x16xf32> to vector<8x16x16xf32>
    %17 = vector.extract_strided_slice %14 {offsets = [16, 0, 0], sizes = [8, 16, 16], strides = [1, 1, 1]} : vector<40x16x16xf32> to vector<8x16x16xf32>
    %18 = vector.extract_strided_slice %14 {offsets = [24, 0, 0], sizes = [8, 16, 16], strides = [1, 1, 1]} : vector<40x16x16xf32> to vector<8x16x16xf32>
    %19 = vector.extract_strided_slice %14 {offsets = [32, 0, 0], sizes = [8, 16, 16], strides = [1, 1, 1]} : vector<40x16x16xf32> to vector<8x16x16xf32>
    %20 = arith.mulf %15, %15 : vector<8x16x16xf32>
    %21 = arith.mulf %16, %16 : vector<8x16x16xf32>
    %22 = arith.mulf %15, %16 : vector<8x16x16xf32>
    %23 = arith.subf %17, %20 : vector<8x16x16xf32>
    %24 = arith.subf %18, %21 : vector<8x16x16xf32>
    %25 = arith.subf %19, %22 : vector<8x16x16xf32>
    %cst_10 = arith.constant 2.000000e+00 : f32
    %26 = vector.broadcast %cst_10 : f32 to vector<8x16x16xf32>
    %27 = arith.mulf %26, %22 : vector<8x16x16xf32>
    %cst_11 = arith.constant 9.99999974E-5 : f32
    %28 = vector.broadcast %cst_11 : f32 to vector<8x16x16xf32>
    %29 = arith.addf %27, %28 : vector<8x16x16xf32>
    %cst_12 = arith.constant 2.000000e+00 : f32
    %30 = vector.broadcast %cst_12 : f32 to vector<8x16x16xf32>
    %31 = arith.mulf %30, %25 : vector<8x16x16xf32>
    %cst_13 = arith.constant 8.99999984E-4 : f32
    %32 = vector.broadcast %cst_13 : f32 to vector<8x16x16xf32>
    %33 = arith.addf %31, %32 : vector<8x16x16xf32>
    %34 = arith.mulf %29, %33 : vector<8x16x16xf32>
    %35 = arith.addf %20, %21 : vector<8x16x16xf32>
    %cst_14 = arith.constant 9.99999974E-5 : f32
    %36 = vector.broadcast %cst_14 : f32 to vector<8x16x16xf32>
    %37 = arith.addf %35, %36 : vector<8x16x16xf32>
    %38 = arith.addf %23, %24 : vector<8x16x16xf32>
    %cst_15 = arith.constant 8.99999984E-4 : f32
    %39 = vector.broadcast %cst_15 : f32 to vector<8x16x16xf32>
    %40 = arith.addf %38, %39 : vector<8x16x16xf32>
    %41 = arith.mulf %37, %40 : vector<8x16x16xf32>
    %42 = tpu.reciprocal %41 {approx = true} : vector<8x16x16xf32> -> vector<8x16x16xf32>
    %43 = arith.mulf %34, %42 : vector<8x16x16xf32>
    %c8_i32 = arith.constant 8 : i32
    %44 = arith.muli %arg0, %c8_i32 : i32
    %c8_i32_16 = arith.constant 8 : i32
    %45 = arith.subi %c8_i32_16, %44 : i32
    %c8_i32_17 = arith.constant 8 : i32
    %46 = arith.minsi %45, %c8_i32_17 : i32
    %47 = tpu.iota {dimensions = array<i32: 0>} : vector<8x16x16xi32>
    %48 = vector.broadcast %46 : i32 to vector<8x16x16xi32>
    %49 = arith.cmpi slt, %47, %48 : vector<8x16x16xi32>
    %cst_18 = arith.constant 0.000000e+00 : f32
    %50 = vector.broadcast %cst_18 : f32 to vector<8x16x16xf32>
    %51 = arith.select %49, %43, %50 : vector<8x16x16xi1>, vector<8x16x16xf32>
    %52 = vector.shape_cast %51 : vector<8x16x16xf32> to vector<1x8x16x16xf32>
    %cst_19 = arith.constant dense<0.000000e+00> : vector<1xf32>
    %53 = vector.multi_reduction <add>, %52, %cst_19 [1, 2, 3] : vector<1x8x16x16xf32> to vector<1xf32>
    %54 = vector.shape_cast %53 : vector<1xf32> to vector<1x1x1x1xf32>
    %55 = vector.extract %54[0, 0, 0, 0] : f32 from vector<1x1x1x1xf32>
    %56 = vector.broadcast %55 : f32 to vector<1x128xf32>
    %c0_20 = arith.constant 0 : index
    %c0_21 = arith.constant 0 : index
    %57 = vector.load %arg5[%c0_20, %c0_21] : memref<1x128xf32, #tpu.memory_space<vmem>>, vector<1x128xf32>
    tpu.vector_store %arg5[%c0_20, %c0_21], %56 {strides = array<i32>} : memref<1x128xf32, #tpu.memory_space<vmem>>, vector<1x128xf32>,
    return
  }
  func.func @transform_0(%arg0: i32) -> (i32, i32) {
    %c0_i32 = arith.constant 0 : i32
    %c0_i32_0 = arith.constant 0 : i32
    %c0_i32_1 = arith.constant 0 : i32
    return %c0_i32, %c0_i32_0 : i32, i32
  }
  func.func @transform_1(%arg0: i32) -> (i32, i32) {
    %c0_i32 = arith.constant 0 : i32
    %c0_i32_0 = arith.constant 0 : i32
    %c0_i32_1 = arith.constant 0 : i32
    return %c0_i32, %c0_i32_0 : i32, i32
  }
  func.func @transform_2(%arg0: i32) -> (i32, i32, i32) {
    %c0_i32 = arith.constant 0 : i32
    %c0_i32_0 = arith.constant 0 : i32
    %c0_i32_1 = arith.constant 0 : i32
    return %arg0, %c0_i32, %c0_i32_0 : i32, i32, i32
  }
  func.func @transform_3(%arg0: i32) -> (i32, i32, i32) {
    %c0_i32 = arith.constant 0 : i32
    %c0_i32_0 = arith.constant 0 : i32
    %c0_i32_1 = arith.constant 0 : i32
    return %arg0, %c0_i32, %c0_i32_0 : i32, i32, i32
  }
  func.func @transform_4(%arg0: i32) -> (i32, i32) {
    %c0_i32 = arith.constant 0 : i32
    %c0_i32_0 = arith.constant 0 : i32
    return %arg0, %c0_i32 : i32, i32
  }
}

</mosaic_0001>

<bundles_post_ra>
// kernel: tpu_custom_call.1
= control target key start
LH: loop header
LB: loop body
LE: loop exit
PB: predicated region body
PF: predicated region fallthrough
CT: control target
= control target key end

     0   :  { %9 = vsyncpa [#allocation3], 0  ;;  %s33937_s0 = inlined_call_operand.hbm [shape: f32[16,16], index: 0, kind: input, shape index: {}]   ;;  %s33938_s1 = inlined_call_operand.hbm [shape: f32[16,16], index: 1, kind: input, shape index: {}]   ;;  %s33939_s2 = inlined_call_operand.hbm [shape: f32[8,16,16], index: 2, kind: input, shape index: {}]   ;;  %s33940_s3 = inlined_call_operand.hbm [shape: f32[8,16,16], index: 3, kind: input, shape index: {}]   ;;  %s33941_s4 = inlined_call_operand.hbm [shape: f32[1,128], index: 4, kind: output, shape index: {}]  }
   0x1   :  { %10 = vsyncpa [#allocation6], 0 }
   0x2   :  { %11 = vsyncpa [#allocation9], 0 }
   0x3   :  { %12 = vsyncpa [#allocation4], 0  ;;  %s30537_s15 = smov [#allocation5]   ;;  %s30538_s17 = smov [#allocation2]  }
   0x4   :  { %s30_s16 = sshll.u32 %s30537_s15, 4  ;;  %s18_s18 = sshll.u32 %s30538_s17, 4  ;;  %s31_s16 = int_to_ptr.vmem [resolvable:$true] %s30_s16  ;;  %s30569_s18 = int_to_ptr.vmem [resolvable:$true] %s18_s18 }
   0x5   :  { %s30419_s21 = scalar_lea.hbm %s33938_s1, 256 }
   0x6   :  { %p30420_p0 = scmp.ne.s32.totalorder %s33938_s1, %s30419_s21  ;;  %p30423_p1 = scmp.lt.u32.totalorder %s30419_s21, %s33938_s1 }
   0x8   :  { %p30425_p2 = pnand %p30423_p1, %p30420_p0 }
   0xa   :  { %30428 = shalt.err (!%p30425_p2)
}
   0xb   :  { %s30429_s26 = scalar_lea.vmem %s31_s16, 256  ;;  %p30434_p4 = scmp.lt.s32.totalorder %s31_s16, %s31_s16 }
   0xc   :  { %p30430_p3 = scmp.ne.s32.totalorder %s31_s16, %s30429_s26  ;;  %p30435_p5 = scmp.lt.s32.totalorder %s30429_s26, %s30429_s26 }
   0xe   :  { %p30436_p6 = por %p30435_p5, %p30434_p4 }
  0x10   :  { %p30437_p7 = pnand %p30436_p6, %p30430_p3 }
  0x12   :  { %30440 = shalt.err (!%p30437_p7)
}
  0x13   :  { %s30539_s27 = smov 128   ;;  %s30540_s28 = smov 8  }
  0x14   :  { %36 = dma.hbm_to_vmem [thread:$0]  %s33938_s1, 256, %s31_s16, [#allocation6], %s30539_s27, %s30539_s27, %s30540_s28  }
  0x15   :  { %s30441_s7 = scalar_lea.hbm %s33937_s0, 256 }
  0x16   :  { %p30442_p8 = scmp.ne.s32.totalorder %s33937_s0, %s30441_s7  ;;  %p30445_p9 = scmp.lt.u32.totalorder %s30441_s7, %s33937_s0 }
  0x18   :  { %p30447_p10 = pnand %p30445_p9, %p30442_p8 }
  0x1a   :  { %30450 = shalt.err (!%p30447_p10)
}
  0x1b   :  { %s30451_s12 = scalar_lea.vmem %s30569_s18, 256  ;;  %p30456_p12 = scmp.lt.s32.totalorder %s30569_s18, %s30569_s18 }
  0x1c   :  { %p30452_p11 = scmp.ne.s32.totalorder %s30569_s18, %s30451_s12  ;;  %p30457_p13 = scmp.lt.s32.totalorder %s30451_s12, %s30451_s12 }
  0x1e   :  { %p30458_p0 = por %p30457_p13, %p30456_p12 }
  0x20   :  { %p30459_p1 = pnand %p30458_p0, %p30452_p11 }
  0x22   :  { %30462 = shalt.err (!%p30459_p1)
}
  0x23   :  { %24 = dma.hbm_to_vmem [thread:$0]  %s33937_s0, 256, %s30569_s18, [#allocation3], %s30539_s27, %s30539_s27, %s30540_s28  }
  0x24   :  { %s30541_s14 = smov [#allocation7]   ;;  %s30542_s16 = smov [#allocation8]  }
  0x25   :  { %s42_s15 = sshll.u32 %s30541_s14, 4  ;;  %s54_s17 = sshll.u32 %s30542_s16, 4  ;;  %s43_s15 = int_to_ptr.vmem [resolvable:$true] %s42_s15  ;;  %s30606_s17 = int_to_ptr.vmem [resolvable:$true] %s54_s17 }
  0x26   :  { %s30463_s21 = scalar_lea.hbm %s33939_s2, 2048 }
  0x27   :  { %p30464_p2 = scmp.ne.s32.totalorder %s33939_s2, %s30463_s21  ;;  %p30467_p3 = scmp.lt.u32.totalorder %s30463_s21, %s33939_s2 }
  0x29   :  { %p30469_p4 = pnand %p30467_p3, %p30464_p2 }
  0x2b   :  { %30472 = shalt.err (!%p30469_p4)
}
  0x2c   :  { %s30473_s0 = scalar_lea.vmem %s43_s15, 2048  ;;  %p30478_p6 = scmp.lt.s32.totalorder %s43_s15, %s43_s15 }
  0x2d   :  { %p30474_p5 = scmp.ne.s32.totalorder %s43_s15, %s30473_s0  ;;  %p30479_p7 = scmp.lt.s32.totalorder %s30473_s0, %s30473_s0 }
  0x2f   :  { %p30480_p8 = por %p30479_p7, %p30478_p6 }
  0x31   :  { %p30481_p9 = pnand %p30480_p8, %p30474_p5 }
  0x33   :  { %30484 = shalt.err (!%p30481_p9)
}
  0x34   :  { %48 = dma.hbm_to_vmem [thread:$0]  %s33939_s2, 2048, %s43_s15, [#allocation6], %s30539_s27, %s30539_s27, %s30540_s28  }
  0x35   :  { %s30485_s5 = scalar_lea.hbm %s33940_s3, 2048 }
  0x36   :  { %p30486_p10 = scmp.ne.s32.totalorder %s33940_s3, %s30485_s5  ;;  %p30489_p11 = scmp.lt.u32.totalorder %s30485_s5, %s33940_s3 }
  0x38   :  { %p30491_p12 = pnand %p30489_p11, %p30486_p10 }
  0x3a   :  { %30494 = shalt.err (!%p30491_p12)
}
  0x3b   :  { %s30495_s10 = scalar_lea.vmem %s30606_s17, 2048  ;;  %p30500_p0 = scmp.lt.s32.totalorder %s30606_s17, %s30606_s17 }
  0x3c   :  { %p30496_p13 = scmp.ne.s32.totalorder %s30606_s17, %s30495_s10  ;;  %p30501_p1 = scmp.lt.s32.totalorder %s30495_s10, %s30495_s10 }
  0x3e   :  { %p30502_p2 = por %p30501_p1, %p30500_p0 }
  0x40   :  { %p30503_p3 = pnand %p30502_p2, %p30496_p13 }
  0x42   :  { %30506 = shalt.err (!%p30503_p3)
}
  0x43   :  { %60 = dma.hbm_to_vmem [thread:$0]  %s33940_s3, 2048, %s30606_s17, [#allocation9], %s30539_s27, %s30539_s27, %s30540_s28  }
  0x44   :  { %30529 = dma.done.wait [#allocation3], 256  }
  0x45   :  { %30530 = vsyncadd [#allocation3], 4294967040 }
  0x46   :  { %30531 = dma.done.wait [#allocation6], 2304  }
  0x47   :  { %30532 = vsyncadd [#allocation6], 4294964992 }
  0x48   :  { %30533 = dma.done.wait [#allocation9], 2048  }
  0x49   :  { %30534 = vsyncadd [#allocation9], 4294965248  ;;  %vm155_vm0 = vcmask 130048   ;;  %v153_v0 = vld [vmem:[#allocation5] sm:$0xff]  ;;  %v154_v1 = vld [vmem:[#allocation5 + $0x8] sm:$0xff]  ;;  %s30543_s3 = smov [#allocation10]  }
  0x4a   :  { %v30643_v2 = vld [vmem:[#allocation7] sm:$0xff]  ;;  %v397_v3 = vand.u32 4294901760, %v153_v0  ;;  %v400_v4 = vand.u32 4294901760, %v154_v1  ;;  %v30647_v6 = vld [vmem:[#allocation7 + $0x8] sm:$0xff]  ;;  %v30649_v7 = vld [vmem:[#allocation7 + $0x10] sm:$0xff]  ;;  %s24705_s27 = sshll.u32 %s30543_s3, 4  ;;  %s24706_s27 = int_to_ptr.vmem [resolvable:$true] %s24705_s27 }
  0x4b   :  { %v157_v5 = vsel %vm155_vm0, %v30643_v2, 0  ;;  %v160_v9 = vsel %vm155_vm0, %v30647_v6, 0  ;;  %v163_v10 = vsel %vm155_vm0, %v30649_v7, 0  ;;  %v30657_v11 = vld [vmem:[#allocation7 + $0x18] sm:$0xff]  ;;  %v30659_v12 = vld [vmem:[#allocation7 + $0x20] sm:$0xff]  ;;  %v30661_v13 = vld [vmem:[#allocation7 + $0x28] sm:$0xff]  ;;  %p30512_p5 = scmp.lt.s32.totalorder %s24706_s27, %s24706_s27 }
  0x4c   :  { %v30651_v8 = vand.u32 4294901760, %v157_v5  ;;  %v30663_v14 = vpack.c.bf16 %v400_v4, %v397_v3  ;;  %v30665_v15 = vand.u32 4294901760, %v160_v9  ;;  %v30667_v16 = vand.u32 4294901760, %v163_v10  ;;  %v30726_v42 = vld [vmem:[#allocation7 + $0x30] sm:$0xff]  ;;  %v30728_v43 = vld [vmem:[#allocation7 + $0x38] sm:$0xff]  ;;  %v30733_v48 = vld [vmem:[#allocation7 + $0x40] sm:$0xff] }
  0x4d   :  { %v166_v17 = vsel %vm155_vm0, %v30657_v11, 0  ;;  %v30676_v20 = vsub.f32 %v153_v0, %v397_v3  ;;  %v30678_v21 = vsub.f32 %v154_v1, %v400_v4  ;;  %v169_v24 = vsel %vm155_vm0, %v30659_v12, 0  ;;  %v30735_v49 = vld [vmem:[#allocation7 + $0x48] sm:$0xff]  ;;  %v30739_v54 = vld [vmem:[#allocation7 + $0x50] sm:$0xff]  ;;  %v30741_v55 = vld [vmem:[#allocation7 + $0x58] sm:$0xff]  ;;  %s30507_s12 = scalar_lea.vmem %s24706_s27, 16 }
  0x4e   :  { %34413 = vst [vmem:[#allocation15_spill] sm:$0xff] %v30651_v8  ;;  %34414 = vst [vmem:[#allocation16_spill] sm:$0xff] %v30663_v14  ;;  %v30672_v18 = vsub.f32 %v157_v5, %v30651_v8  ;;  %v30674_v19 = vand.u32 4294901760, %v166_v17  ;;  %28593 = vmatprep.subr.bf16.mxu0 %v30663_v14  ;;  %v30682_v22 = vsub.f32 %v160_v9, %v30665_v15  ;;  %v172_v25 = vsel %vm155_vm0, %v30661_v13, 0  ;;  %v30765_v5 = vld [vmem:[#allocation7 + $0x60] sm:$0xff]  ;;  %v30767_v9 = vld [vmem:[#allocation7 + $0x68] sm:$0xff]  ;;  %p30508_p4 = scmp.ne.s32.totalorder %s24706_s27, %s30507_s12 }
  0x4f   :  { %34415 = vst [vmem:[#allocation17_spill] sm:$0xff] %v30665_v15  ;;  %34416 = vst [vmem:[#allocation18_spill] sm:$0xff] %v30667_v16  ;;  %v30685_v23 = vsub.f32 %v163_v10, %v30667_v16  ;;  %28595 = vmatpush3.bf16.msra.mxu0 %v30663_v14  ;;  %v33954_v28 = vand.u32 4294901760, %v30676_v20  ;;  %v33953_v29 = vand.u32 4294901760, %v30678_v21  ;;  %v30700_v32 = vand.u32 4294901760, %v169_v24  ;;  %s30511_s1 = scalar_lea.vmem %s24706_s27, 32 }
  0x50   :  { %34417 = vst [vmem:[#allocation19_spill] sm:$0xff] %v30672_v18  ;;  %34418 = vst [vmem:[#allocation20_spill] sm:$0xff] %v30674_v19  ;;  %v33951_v26 = vand.u32 4294901760, %v30672_v18  ;;  %v30694_v27 = vsub.f32 %v166_v17, %v30674_v19  ;;  %v33948_v30 = vand.u32 4294901760, %v30682_v22  ;;  %v30702_v33 = vand.u32 4294901760, %v172_v25  ;;  %p30513_p6 = scmp.lt.s32.totalorder %s30511_s1, %s30507_s12 }
  0x51   :  { %34419 = vst [vmem:[#allocation21_spill] sm:$0xff] %v30682_v22  ;;  %34420 = vst [vmem:[#allocation22_spill] sm:$0xff] %v30685_v23  ;;  %v33947_v31 = vand.u32 4294901760, %v30685_v23  ;;  %v1267_v36 = vsub.f32 %v30676_v20, %v33954_v28  ;;  %v1274_v37 = vsub.f32 %v30678_v21, %v33953_v29  ;;  %v30721_v40 = vsub.f32 %v169_v24, %v30700_v32 }
  0x52   :  { %34421 = vst [vmem:[#allocation23_spill] sm:$0xff] %v30694_v27  ;;  %34422 = vst [vmem:[#allocation24_spill] sm:$0xff] %v30700_v32  ;;  %v466_v34 = vsub.f32 %v30672_v18, %v33951_v26  ;;  %v33946_v35 = vand.u32 4294901760, %v30694_v27  ;;  %v476_v38 = vsub.f32 %v30682_v22, %v33948_v30  ;;  %v30724_v41 = vsub.f32 %v172_v25, %v30702_v33  ;;  %v30847_v26 = vld [vmem:[#allocation8 + $0x10] sm:$0xff]  ;;  %p30514_p7 = por %p30513_p6, %p30512_p5 }
  0x53   :  { %34423 = vst [vmem:[#allocation25_spill] sm:$0xff] %v30702_v33  ;;  %v486_v39 = vsub.f32 %v30685_v23, %v33947_v31  ;;  %34424 = vst [vmem:[#allocation26_spill] sm:$0xff] %v30721_v40  ;;  %v1268_v46 = vand.u32 4294901760, %v1267_v36  ;;  %v1275_v47 = vand.u32 4294901760, %v1274_v37  ;;  %v33945_v52 = vand.u32 4294901760, %v30721_v40 }
  0x54   :  { %34425 = vst [vmem:[#allocation27_spill] sm:$0xff] %v30724_v41  ;;  %v467_v44 = vand.u32 4294901760, %v466_v34  ;;  %v496_v45 = vsub.f32 %v30694_v27, %v33946_v35  ;;  %v477_v50 = vand.u32 4294901760, %v476_v38  ;;  %v33943_v53 = vand.u32 4294901760, %v30724_v41  ;;  %v30825_v35 = vld [vmem:[#allocation8] sm:$0xff]  ;;  %p30515_p8 = pnand %p30514_p7, %p30508_p4 }
  0x55   :  { %v487_v51 = vand.u32 4294901760, %v486_v39  ;;  %v28596_v57 = vpack.c.bf16 %v1275_v47, %v1268_v46  ;;  %v175_v58 = vsel %vm155_vm0, %v30726_v42, 0  ;;  %v178_v59 = vsel %vm155_vm0, %v30728_v43, 0 }
  0x56   :  { %26172 = vmatprep.mubr.f32.mxu0 %v467_v44  ;;  %v497_v56 = vand.u32 4294901760, %v496_v45  ;;  %v506_v60 = vsub.f32 %v30721_v40, %v33945_v52  ;;  %v516_v61 = vsub.f32 %v30724_v41, %v33943_v53  ;;  %v30753_v62 = vand.u32 4294901760, %v175_v58 }
  0x57   :  { %26173 = vmatmul.mubr.f32.vlgmr.msra.gmra.mrb[0].mxu0 %v477_v50  ;;  %v30755_v63 = vand.u32 4294901760, %v178_v59  ;;  %28597 = vmatprep.subr.bf16.mxu0 %v28596_v57  ;;  %v181_v0 = vsel %vm155_vm0, %v30733_v48, 0  ;;  %v184_v1 = vsel %vm155_vm0, %v30735_v49, 0  ;;  %v187_v3 = vsel %vm155_vm0, %v30739_v54, 0 }
  0x58   :  { %34426 = vst [vmem:[#allocation28_spill] sm:$0xff] %v30753_v62  ;;  %26175 = vmatprep.mubr.f32.mxu0 %v487_v51  ;;  %v190_v4 = vsel %vm155_vm0, %v30741_v55, 0  ;;  %28599 = vmatpush3.bf16.msra.mxu0 %v28596_v57  ;;  %v507_v10 = vand.u32 4294901760, %v506_v60  ;;  %v517_v17 = vand.u32 4294901760, %v516_v61  ;;  %v30770_v24 = vsub.f32 %v175_v58, %v30753_v62 }
  0x59   :  { %34427 = vst [vmem:[#allocation29_spill] sm:$0xff] %v30755_v63  ;;  %v30773_v25 = vsub.f32 %v178_v59, %v30755_v63  ;;  %v30775_v34 = vand.u32 4294901760, %v181_v0  ;;  %v30777_v36 = vand.u32 4294901760, %v184_v1  ;;  %v30779_v37 = vand.u32 4294901760, %v187_v3 }
  0x5a   :  { %34428 = vst [vmem:[#allocation30_spill] sm:$0xff] %v30770_v24  ;;  %v30781_v38 = vand.u32 4294901760, %v190_v4  ;;  %v33942_v39 = vand.u32 4294901760, %v30770_v24  ;;  %v193_v45 = vsel %vm155_vm0, %v30765_v5, 0  ;;  %v196_v46 = vsel %vm155_vm0, %v30767_v9, 0 }
  0x5b   :  { %34429 = vst [vmem:[#allocation31_spill] sm:$0xff] %v30773_v25  ;;  %34430 = vst [vmem:[#allocation32_spill] sm:$0xff] %v30775_v34  ;;  %26176 = vmatmul.mubr.f32.gmra.mrb[2].mxu0 %v497_v56  ;;  %v33944_v44 = vand.u32 4294901760, %v30773_v25  ;;  %v30790_v47 = vsub.f32 %v181_v0, %v30775_v34  ;;  %v30793_v50 = vsub.f32 %v184_v1, %v30777_v36  ;;  %v30807_v59 = vand.u32 4294901760, %v193_v45 }
  0x5c   :  { %34431 = vst [vmem:[#allocation33_spill] sm:$0xff] %v30777_v36  ;;  %34432 = vst [vmem:[#allocation34_spill] sm:$0xff] %v30779_v37  ;;  %26178 = vmatprep.mubr.f32.mxu0 %v507_v10  ;;  %v30796_v51 = vsub.f32 %v187_v3, %v30779_v37  ;;  %v30799_v56 = vsub.f32 %v190_v4, %v30781_v38  ;;  %v526_v57 = vsub.f32 %v30770_v24, %v33942_v39  ;;  %v30815_v4 = vld [vmem:[#allocation7 + $0x70] sm:$0xff]  ;;  %v30817_v10 = vld [vmem:[#allocation7 + $0x78] sm:$0xff] }
  0x5d   :  { %34433 = vst [vmem:[#allocation35_spill] sm:$0xff] %v30781_v38  ;;  %34434 = vst [vmem:[#allocation36_spill] sm:$0xff] %v30790_v47  ;;  %v536_v58 = vsub.f32 %v30773_v25, %v33944_v44  ;;  %v30809_v60 = vand.u32 4294901760, %v196_v46  ;;  %v33949_v61 = vand.u32 4294901760, %v30790_v47  ;;  %v33950_v0 = vand.u32 4294901760, %v30793_v50 }
  0x5e   :  { %34435 = vst [vmem:[#allocation37_spill] sm:$0xff] %v30793_v50  ;;  %34436 = vst [vmem:[#allocation38_spill] sm:$0xff] %v30796_v51  ;;  %v33952_v1 = vand.u32 4294901760, %v30796_v51  ;;  %v33955_v3 = vand.u32 4294901760, %v30799_v56  ;;  %v527_v39 = vand.u32 4294901760, %v526_v57  ;;  %v30820_v44 = vsub.f32 %v193_v45, %v30807_v59 }
  0x5f   :  { %34437 = vst [vmem:[#allocation39_spill] sm:$0xff] %v30799_v56  ;;  %34438 = vst [vmem:[#allocation40_spill] sm:$0xff] %v30807_v59  ;;  %26179 = vmatmul.mubr.f32.gmra.mrb[4].mxu0 %v517_v17  ;;  %v537_v53 = vand.u32 4294901760, %v536_v58  ;;  %v30823_v52 = vsub.f32 %v196_v46, %v30809_v60  ;;  %v546_v31 = vsub.f32 %v30790_v47, %v33949_v61  ;;  %v30839_v46 = vld [vmem:[#allocation8 + $0x8] sm:$0xff]  ;;  %v199_v61 = vsel %vm155_vm0, %v30815_v4, 0 }
  0x60   :  { %34439 = vst [vmem:[#allocation41_spill] sm:$0xff] %v30809_v60  ;;  %34440 = vst [vmem:[#allocation42_spill] sm:$0xff] %v30820_v44  ;;  %v556_v30 = vsub.f32 %v30793_v50, %v33950_v0  ;;  %v566_v17 = vsub.f32 %v30796_v51, %v33952_v1  ;;  %v576_v45 = vsub.f32 %v30799_v56, %v33955_v3  ;;  %26181 = vmatprep.mubr.f32.mxu0 %v527_v39  ;;  %v30849_v1 = vld [vmem:[#allocation8 + $0x18] sm:$0xff] }
  0x61   :  { %34441 = vst [vmem:[#allocation43_spill] sm:$0xff] %v30823_v52  ;;  %v33962_v57 = vand.u32 4294901760, %v30820_v44  ;;  %v202_v0 = vsel %vm155_vm0, %v30817_v10, 0  ;;  %v547_v29 = vand.u32 4294901760, %v546_v31  ;;  %v30854_v56 = vand.u32 4294901760, %v199_v61  ;;  %v30953_v60 = vld [vmem:[#allocation8 + $0x58] sm:$0xff] }
  0x62   :  { %v557_v28 = vand.u32 4294901760, %v556_v30  ;;  %v567_v3 = vand.u32 4294901760, %v566_v17  ;;  %v30856_v58 = vand.u32 4294901760, %v202_v0  ;;  %v205_v51 = vsel %vm155_vm0, %v30825_v35, 0  ;;  %v30868_v17 = vld [vmem:[#allocation8 + $0x28] sm:$0xff] }
  0x63   :  { %26182 = vmatmul.mubr.f32.gmra.mrb[6].mxu0 %v537_v53  ;;  %v586_v39 = vsub.f32 %v30820_v44, %v33962_v57  ;;  %34442 = vst [vmem:[#allocation44_spill] sm:$0xff] %v30854_v56  ;;  %v208_v50 = vsel %vm155_vm0, %v30839_v46, 0  ;;  %v211_v30 = vsel %vm155_vm0, %v30847_v26, 0  ;;  %v214_v31 = vsel %vm155_vm0, %v30849_v1, 0  ;;  %v30866_v53 = vld [vmem:[#allocation8 + $0x20] sm:$0xff] }
  0x64   :  { %34443 = vst [vmem:[#allocation45_spill] sm:$0xff] %v30856_v58  ;;  %26184 = vmatprep.mubr.f32.mxu0 %v547_v29  ;;  %v577_v57 = vand.u32 4294901760, %v576_v45  ;;  %v34444_v44 = vand.u32 4294901760, %v30823_v52  ;;  %v30874_v47 = vsub.f32 %v199_v61, %v30854_v56  ;;  %v30877_v25 = vsub.f32 %v202_v0, %v30856_v58 }
  0x65   :  { %v30879_v24 = vand.u32 4294901760, %v205_v51  ;;  %v30881_v41 = vand.u32 4294901760, %v208_v50  ;;  %v30883_v40 = vand.u32 4294901760, %v211_v30  ;;  %v30885_v27 = vand.u32 4294901760, %v214_v31 }
  0x66   :  { %v596_v29 = vsub.f32 %v30823_v52, %v34444_v44  ;;  %34445 = vst [vmem:[#allocation46_spill] sm:$0xff] %v30874_v47  ;;  %34446 = vst [vmem:[#allocation47_spill] sm:$0xff] %v30877_v25  ;;  %v33991_v45 = vand.u32 4294901760, %v30874_v47  ;;  %v217_v44 = vsel %vm155_vm0, %v30866_v53, 0  ;;  %v220_v61 = vsel %vm155_vm0, %v30868_v17, 0 }
  0x67   :  { %34447 = vst [vmem:[#allocation48_spill] sm:$0xff] %v30879_v24  ;;  %34448 = vst [vmem:[#allocation49_spill] sm:$0xff] %v30881_v41  ;;  %26185 = vmatmul.mubr.f32.gmra.mrb[8].mxu0 %v557_v28  ;;  %v587_v0 = vand.u32 4294901760, %v586_v39  ;;  %v30894_v52 = vsub.f32 %v205_v51, %v30879_v24  ;;  %v30897_v22 = vsub.f32 %v208_v50, %v30881_v41  ;;  %v30905_v18 = vand.u32 4294901760, %v217_v44 }
  0x68   :  { %34449 = vst [vmem:[#allocation50_spill] sm:$0xff] %v30883_v40  ;;  %34450 = vst [vmem:[#allocation51_spill] sm:$0xff] %v30885_v27  ;;  %26187 = vmatprep.mubr.f32.mxu0 %v567_v3  ;;  %v30900_v28 = vsub.f32 %v211_v30, %v30883_v40  ;;  %v606_v23 = vsub.f32 %v30874_v47, %v33991_v45  ;;  %v30907_v58 = vand.u32 4294901760, %v220_v61  ;;  %v34456_v3 = vand.u32 4294901760, %v30877_v25  ;;  %v30917_v30 = vld [vmem:[#allocation8 + $0x30] sm:$0xff]  ;;  %v30919_v40 = vld [vmem:[#allocation8 + $0x38] sm:$0xff] }
  0x69   :  { %34451 = vst [vmem:[#allocation52_spill] sm:$0xff] %v30894_v52  ;;  %34452 = vst [vmem:[#allocation53_spill] sm:$0xff] %v30897_v22  ;;  %v33998_v51 = vand.u32 4294901760, %v30894_v52  ;;  %v30915_v41 = vsub.f32 %v214_v31, %v30885_v27  ;;  %v597_v45 = vand.u32 4294901760, %v596_v29  ;;  %v30923_v24 = vsub.f32 %v217_v44, %v30905_v18  ;;  %v30935_v29 = vld [vmem:[#allocation8 + $0x40] sm:$0xff]  ;;  %v30937_v47 = vld [vmem:[#allocation8 + $0x48] sm:$0xff] }
  0x6a   :  { %34453 = vst [vmem:[#allocation54_spill] sm:$0xff] %v30900_v28  ;;  %34454 = vst [vmem:[#allocation55_spill] sm:$0xff] %v30905_v18  ;;  %v616_v39 = vsub.f32 %v30877_v25, %v34456_v3  ;;  %v607_v3 = vand.u32 4294901760, %v606_v23  ;;  %v30929_v31 = vsub.f32 %v220_v61, %v30907_v58  ;;  %v223_v25 = vsel %vm155_vm0, %v30917_v30, 0  ;;  %v30939_v44 = vld [vmem:[#allocation8 + $0x50] sm:$0xff] }
  0x6b   :  { %34455 = vst [vmem:[#allocation56_spill] sm:$0xff] %v30907_v58  ;;  %34457 = vst [vmem:[#allocation57_spill] sm:$0xff] %v30915_v41  ;;  %26188 = vmatmul.mubr.f32.gmra.mrb[10].mxu0 %v577_v57  ;;  %v626_v50 = vsub.f32 %v30894_v52, %v33998_v51  ;;  %v226_v57 = vsel %vm155_vm0, %v30919_v40, 0  ;;  %v34461_v52 = vand.u32 4294901760, %v30900_v28  ;;  %v30949_v27 = vand.u32 4294901760, %v223_v25 }
  0x6c   :  { %34458 = vst [vmem:[#allocation58_spill] sm:$0xff] %v30923_v24  ;;  %26190 = vmatprep.mubr.f32.mxu0 %v587_v0  ;;  %34459 = vst [vmem:[#allocation59_spill] sm:$0xff] %v30929_v31  ;;  %v617_v23 = vand.u32 4294901760, %v616_v39  ;;  %v34460_v0 = vand.u32 4294901760, %v30897_v22  ;;  %v30951_v56 = vand.u32 4294901760, %v226_v57  ;;  %v235_v61 = vsel %vm155_vm0, %v30939_v44, 0 }
  0x6d   :  { %v646_v58 = vsub.f32 %v30900_v28, %v34461_v52  ;;  %34462 = vst [vmem:[#allocation60_spill] sm:$0xff] %v30949_v27  ;;  %v627_v39 = vand.u32 4294901760, %v626_v50  ;;  %v30963_v18 = vsub.f32 %v223_v25, %v30949_v27  ;;  %v30974_v59 = vand.u32 4294901760, %v235_v61 }
  0x6e   :  { %v636_v51 = vsub.f32 %v30897_v22, %v34460_v0  ;;  %34463 = vst [vmem:[#allocation61_spill] sm:$0xff] %v30951_v56  ;;  %v229_v0 = vsel %vm155_vm0, %v30935_v29, 0  ;;  %v30966_v28 = vsub.f32 %v226_v57, %v30951_v56  ;;  %v30968_v22 = vld [vmem:[#allocation8 + $0x60] sm:$0xff]  ;;  %v238_v38 = vsel %vm155_vm0, %v30953_v60, 0 }
  0x6f   :  { %26191 = vmatmul.mubr.f32.gmra.mrb[12].mxu0 %v597_v45  ;;  %v232_v45 = vsel %vm155_vm0, %v30937_v47, 0  ;;  %34464 = vst [vmem:[#allocation62_spill] sm:$0xff] %v30963_v18  ;;  %v30970_v50 = vand.u32 4294901760, %v229_v0  ;;  %34468 = vst [vmem:[#allocation66_spill] sm:$0xff] %v30974_v59  ;;  %v647_v52 = vand.u32 4294901760, %v646_v58  ;;  %v34469_v25 = vand.u32 4294901760, %v30915_v41 }
  0x70   :  { %26193 = vmatprep.mubr.f32.mxu0 %v607_v3  ;;  %34465 = vst [vmem:[#allocation63_spill] sm:$0xff] %v30966_v28  ;;  %v30972_v3 = vand.u32 4294901760, %v232_v45  ;;  %v637_v37 = vand.u32 4294901760, %v636_v51  ;;  %v34470_v57 = vand.u32 4294901760, %v30923_v24  ;;  %v241_v63 = vsel %vm155_vm0, %v30968_v22, 0 }
  0x71   :  { %34466 = vst [vmem:[#allocation64_spill] sm:$0xff] %v30970_v50  ;;  %v656_v27 = vsub.f32 %v30915_v41, %v34469_v25  ;;  %v30986_v34 = vsub.f32 %v229_v0, %v30970_v50  ;;  %v30993_v51 = vand.u32 4294901760, %v238_v38  ;;  %v31002_v36 = vsub.f32 %v235_v61, %v30974_v59  ;;  %v31004_v0 = vld [vmem:[#allocation8 + $0x70] sm:$0xff] }
  0x72   :  { %34467 = vst [vmem:[#allocation65_spill] sm:$0xff] %v30972_v3  ;;  %v666_v56 = vsub.f32 %v30923_v24, %v34470_v57  ;;  %v30999_v57 = vsub.f32 %v232_v45, %v30972_v3  ;;  %v31007_v50 = vand.u32 4294901760, %v241_v63  ;;  %v105_v61 = vmul.f32 %v30643_v2, %v30643_v2 }
  0x73   :  { %26194 = vmatmul.mubr.f32.gmra.mrb[14].mxu0 %v617_v23  ;;  %34471 = vst [vmem:[#allocation67_spill] sm:$0xff] %v30986_v34  ;;  %v30990_v23 = vld [vmem:[#allocation8 + $0x68] sm:$0xff]  ;;  %34472 = vst [vmem:[#allocation68_spill] sm:$0xff] %v30993_v51  ;;  %v657_v24 = vand.u32 4294901760, %v656_v27  ;;  %v34478_v27 = vand.u32 4294901760, %v30966_v28  ;;  %v31022_v41 = vsub.f32 %v238_v38, %v30993_v51  ;;  %v34481_v3 = vand.u32 4294901760, %v30986_v34 }
  0x74   :  { %26196 = vmatprep.mubr.f32.mxu0 %v627_v39  ;;  %v34473_v39 = vand.u32 4294901760, %v30929_v31  ;;  %34474 = vst [vmem:[#allocation69_spill] sm:$0xff] %v30999_v57  ;;  %34475 = vst [vmem:[#allocation70_spill] sm:$0xff] %v31002_v36  ;;  %v244_v58 = vsel %vm155_vm0, %v30990_v23, 0  ;;  %v667_v62 = vand.u32 4294901760, %v666_v56 }
  0x75   :  { %34476 = vst [vmem:[#allocation71_spill] sm:$0xff] %v31007_v50  ;;  %34479 = vst [vmem:[#allocation72_spill] sm:$0xff] %v31022_v41  ;;  %v706_v33 = vsub.f32 %v30986_v34, %v34481_v3  ;;  %v253_v3 = vsel %vm155_vm0, %v105_v61, 0 }
  0x76   :  { %v676_v25 = vsub.f32 %v30929_v31, %v34473_v39  ;;  %v34477_v39 = vand.u32 4294901760, %v30963_v18  ;;  %v31014_v31 = vld [vmem:[#allocation8 + $0x78] sm:$0xff] }
  0x77   :  { %26197 = vmatmul.mubr.f32.gmra.mrb[16].mxu0 %v637_v37  ;;  %v696_v37 = vsub.f32 %v30966_v28, %v34478_v27  ;;  %v31034_v27 = vsub.f32 %v241_v63, %v31007_v50  ;;  %v250_v28 = vsel %vm155_vm0, %v31014_v31, 0  ;;  %v34484_v63 = vand.u32 4294901760, %v30999_v57 }
  0x78   :  { %26199 = vmatprep.mubr.f32.mxu0 %v647_v52  ;;  %v686_v45 = vsub.f32 %v30963_v18, %v34477_v39  ;;  %v247_v52 = vsel %vm155_vm0, %v31004_v0, 0  ;;  %v677_v56 = vand.u32 4294901760, %v676_v25  ;;  %v31028_v18 = vand.u32 4294901760, %v244_v58 }
  0x79   :  { %34482 = vst [vmem:[#allocation74_spill] sm:$0xff] %v31034_v27  ;;  %v31036_v38 = vand.u32 4294901760, %v247_v52  ;;  %v106_v39 = vmul.f32 %v30647_v6, %v30647_v6  ;;  %v697_v59 = vand.u32 4294901760, %v696_v37  ;;  %v716_v34 = vsub.f32 %v30999_v57, %v34484_v63 }
  0x7a   :  { %34480 = vst [vmem:[#allocation73_spill] sm:$0xff] %v31028_v18  ;;  %v687_v25 = vand.u32 4294901760, %v686_v45  ;;  %v31050_v50 = vsub.f32 %v244_v58, %v31028_v18  ;;  %v108_v45 = vmul.f32 %v30657_v11, %v30657_v11  ;;  %v707_v32 = vand.u32 4294901760, %v706_v33 }
  0x7b   :  { %26200 = vmatmul.mubr.f32.gmra.mrb[18].mxu0 %v657_v24  ;;  %34483 = vst [vmem:[#allocation75_spill] sm:$0xff] %v31036_v38  ;;  %v107_v24 = vmul.f32 %v30649_v7, %v30649_v7  ;;  %v34487_v37 = vand.u32 4294901760, %v31002_v36  ;;  %v31061_v19 = vsub.f32 %v247_v52, %v31036_v38  ;;  %v31063_v63 = vand.u32 4294901760, %v253_v3 }
  0x7c   :  { %26202 = vmatprep.mubr.f32.mxu0 %v667_v62  ;;  %34485 = vst [vmem:[#allocation76_spill] sm:$0xff] %v31050_v50  ;;  %v31052_v62 = vand.u32 4294901760, %v250_v28  ;;  %v256_v58 = vsel %vm155_vm0, %v106_v39, 0  ;;  %v34490_v33 = vand.u32 4294901760, %v31022_v41  ;;  %v262_v52 = vsel %vm155_vm0, %v108_v45, 0 }
  0x7d   :  { %v726_v51 = vsub.f32 %v31002_v36, %v34487_v37  ;;  %34488 = vst [vmem:[#allocation78_spill] sm:$0xff] %v31061_v19  ;;  %34489 = vst [vmem:[#allocation79_spill] sm:$0xff] %v31063_v63  ;;  %v259_v57 = vsel %vm155_vm0, %v107_v24, 0  ;;  %v717_v39 = vand.u32 4294901760, %v716_v34  ;;  %v31079_v24 = vand.u32 4294901760, %v256_v58 }
  0x7e   :  { %34486 = vst [vmem:[#allocation77_spill] sm:$0xff] %v31052_v62  ;;  %v736_v18 = vsub.f32 %v31022_v41, %v34490_v33  ;;  %v31074_v61 = vsub.f32 %v250_v28, %v31052_v62  ;;  %v31081_v36 = vand.u32 4294901760, %v259_v57  ;;  %v34494_v37 = vand.u32 4294901760, %v31034_v27 }
  0x7f   :  { %26203 = vmatmul.mubr.f32.gmra.mrb[20].mxu0 %v677_v56  ;;  %v109_v56 = vmul.f32 %v30659_v12, %v30659_v12  ;;  %34492 = vst [vmem:[#allocation81_spill] sm:$0xff] %v31079_v24  ;;  %v727_v33 = vand.u32 4294901760, %v726_v51  ;;  %v31089_v45 = vsub.f32 %v253_v3, %v31063_v63  ;;  %v111_v34 = vmul.f32 %v30726_v42, %v30726_v42 }
  0x80   :  { %26205 = vmatprep.mubr.f32.mxu0 %v687_v25  ;;  %34491 = vst [vmem:[#allocation80_spill] sm:$0xff] %v31074_v61  ;;  %v110_v25 = vmul.f32 %v30661_v13, %v30661_v13  ;;  %34493 = vst [vmem:[#allocation82_spill] sm:$0xff] %v31081_v36  ;;  %v746_v28 = vsub.f32 %v31034_v27, %v34494_v37  ;;  %v737_v62 = vand.u32 4294901760, %v736_v18  ;;  %v34497_v14 = vand.u32 4294901760, %v31050_v50 }
  0x81   :  { %v265_v38 = vsel %vm155_vm0, %v109_v56, 0  ;;  %34495 = vst [vmem:[#allocation83_spill] sm:$0xff] %v31089_v45  ;;  %v31103_v3 = vsub.f32 %v256_v58, %v31079_v24  ;;  %v31106_v18 = vsub.f32 %v259_v57, %v31081_v36  ;;  %v271_v41 = vsel %vm155_vm0, %v111_v34, 0 }
  0x82   :  { %v31099_v56 = vand.u32 4294901760, %v265_v38  ;;  %v268_v37 = vsel %vm155_vm0, %v110_v25, 0  ;;  %v112_v27 = vmul.f32 %v30728_v43, %v30728_v43  ;;  %v34501_v51 = vand.u32 4294901760, %v31061_v19 }
  0x83   :  { %26206 = vmatmul.mubr.f32.gmra.mrb[22].mxu0 %v697_v59  ;;  %v31091_v59 = vand.u32 4294901760, %v262_v52  ;;  %34499 = vst [vmem:[#allocation86_spill] sm:$0xff] %v31103_v3  ;;  %34500 = vst [vmem:[#allocation87_spill] sm:$0xff] %v31106_v18  ;;  %v31118_v58 = vand.u32 4294901760, %v268_v37  ;;  %v113_v57 = vmul.f32 %v30733_v48, %v30733_v48 }
  0x84   :  { %26208 = vmatprep.mubr.f32.mxu0 %v707_v32  ;;  %v756_v32 = vsub.f32 %v31050_v50, %v34497_v14  ;;  %34498 = vst [vmem:[#allocation85_spill] sm:$0xff] %v31099_v56  ;;  %v747_v14 = vand.u32 4294901760, %v746_v28  ;;  %v766_v50 = vsub.f32 %v31061_v19, %v34501_v51  ;;  %v31123_v36 = vsub.f32 %v265_v38, %v31099_v56 }
  0x85   :  { %34496 = vst [vmem:[#allocation84_spill] sm:$0xff] %v31091_v59  ;;  %34503 = vst [vmem:[#allocation89_spill] sm:$0xff] %v31118_v58  ;;  %v34506_v28 = vand.u32 4294901760, %v31074_v61  ;;  %v274_v19 = vsel %vm155_vm0, %v112_v27, 0  ;;  %v114_v56 = vmul.f32 %v30735_v49, %v30735_v49  ;;  %v31142_v25 = vsub.f32 %v268_v37, %v31118_v58 }
  0x86   :  { %v757_v34 = vand.u32 4294901760, %v756_v32  ;;  %34504 = vst [vmem:[#allocation90_spill] sm:$0xff] %v31123_v36  ;;  %v34507_v32 = vand.u32 4294901760, %v31089_v45  ;;  %v34512_v37 = vand.u32 4294901760, %v31106_v18 }
  0x87   :  { %26209 = vmatmul.mubr.f32.gmra.mrb[24].mxu0 %v717_v39  ;;  %v31116_v39 = vsub.f32 %v262_v52, %v31091_v59  ;;  %v776_v51 = vsub.f32 %v31074_v61, %v34506_v28  ;;  %v767_v59 = vand.u32 4294901760, %v766_v50  ;;  %34508 = vst [vmem:[#allocation92_spill] sm:$0xff] %v31142_v25  ;;  %v277_v52 = vsel %vm155_vm0, %v113_v57, 0 }
  0x88   :  { %26211 = vmatprep.mubr.f32.mxu0 %v727_v33  ;;  %v31125_v33 = vand.u32 4294901760, %v271_v41  ;;  %v786_v38 = vsub.f32 %v31089_v45, %v34507_v32  ;;  %v116_v32 = vmul.f32 %v30741_v55, %v30741_v55  ;;  %v34511_v61 = vand.u32 4294901760, %v31103_v3 }
  0x89   :  { %34502 = vst [vmem:[#allocation88_spill] sm:$0xff] %v31116_v39  ;;  %v777_v45 = vand.u32 4294901760, %v776_v51  ;;  %v806_v57 = vsub.f32 %v31106_v18, %v34512_v37  ;;  %v31159_v58 = vand.u32 4294901760, %v277_v52  ;;  %v34514_v55 = vand.u32 4294901760, %v31116_v39 }
  0x8a   :  { %34505 = vst [vmem:[#allocation91_spill] sm:$0xff] %v31125_v33  ;;  %v31147_v50 = vsub.f32 %v271_v41, %v31125_v33  ;;  %v796_v28 = vsub.f32 %v31103_v3, %v34511_v61  ;;  %v787_v27 = vand.u32 4294901760, %v786_v38  ;;  %v280_v41 = vsel %vm155_vm0, %v114_v56, 0 }
  0x8b   :  { %26212 = vmatmul.mubr.f32.gmra.mrb[26].mxu0 %v737_v62  ;;  %v115_v62 = vmul.f32 %v30739_v54, %v30739_v54  ;;  %34513 = vst [vmem:[#allocation95_spill] sm:$0xff] %v31159_v58  ;;  %v117_v61 = vmul.f32 %v30765_v5, %v30765_v5  ;;  %v34515_v3 = vand.u32 4294901760, %v31123_v36  ;;  %v286_v56 = vsel %vm155_vm0, %v116_v32, 0 }
  0x8c   :  { %26214 = vmatprep.mubr.f32.mxu0 %v747_v14  ;;  %34509 = vst [vmem:[#allocation93_spill] sm:$0xff] %v31147_v50  ;;  %v31149_v14 = vand.u32 4294901760, %v274_v19  ;;  %v31177_v18 = vand.u32 4294901760, %v280_v41  ;;  %v118_v51 = vmul.f32 %v30767_v9, %v30767_v9  ;;  %v34521_v32 = vand.u32 4294901760, %v31142_v25 }
  0x8d   :  { %v283_v33 = vsel %vm155_vm0, %v115_v62, 0  ;;  %v797_v62 = vand.u32 4294901760, %v796_v28  ;;  %v34522_v9 = vand.u32 4294901760, %v31147_v50 }
  0x8e   :  { %34510 = vst [vmem:[#allocation94_spill] sm:$0xff] %v31149_v14  ;;  %v31174_v37 = vsub.f32 %v274_v19, %v31149_v14  ;;  %34517 = vst [vmem:[#allocation97_spill] sm:$0xff] %v31177_v18  ;;  %v119_v19 = vmul.f32 %v30815_v4, %v30815_v4  ;;  %v836_v14 = vsub.f32 %v31142_v25, %v34521_v32 }
  0x8f   :  { %26215 = vmatmul.mubr.f32.gmra.mrb[28].mxu0 %v757_v34  ;;  %v816_v34 = vsub.f32 %v31116_v39, %v34514_v55  ;;  %v31179_v55 = vand.u32 4294901760, %v283_v33  ;;  %v807_v39 = vand.u32 4294901760, %v806_v57  ;;  %v31199_v57 = vsub.f32 %v280_v41, %v31177_v18 }
  0x90   :  { %26217 = vmatprep.mubr.f32.mxu0 %v767_v59  ;;  %v826_v59 = vsub.f32 %v31123_v36, %v34515_v3  ;;  %34516 = vst [vmem:[#allocation96_spill] sm:$0xff] %v31174_v37  ;;  %v31184_v3 = vsub.f32 %v277_v52, %v31159_v58  ;;  %v31188_v36 = vand.u32 4294901760, %v286_v56  ;;  %v122_v18 = vmul.f32 %v30839_v46, %v30839_v46 }
  0x91   :  { %34518 = vst [vmem:[#allocation98_spill] sm:$0xff] %v31179_v55  ;;  %v817_v38 = vand.u32 4294901760, %v816_v34  ;;  %34523 = vst [vmem:[#allocation101_spill] sm:$0xff] %v31199_v57  ;;  %v31202_v34 = vsub.f32 %v283_v33, %v31179_v55  ;;  %v837_v33 = vand.u32 4294901760, %v836_v14 }
  0x92   :  { %34519 = vst [vmem:[#allocation99_spill] sm:$0xff] %v31184_v3  ;;  %34520 = vst [vmem:[#allocation100_spill] sm:$0xff] %v31188_v36  ;;  %v827_v28 = vand.u32 4294901760, %v826_v59  ;;  %v120_v59 = vmul.f32 %v30817_v10, %v30817_v10  ;;  %v31214_v41 = vsub.f32 %v286_v56, %v31188_v36  ;;  %v34530_v14 = vand.u32 4294901760, %v31184_v3 }
  0x93   :  { %26218 = vmatmul.mubr.f32.gmra.mrb[30].mxu0 %v777_v45  ;;  %v289_v45 = vsel %vm155_vm0, %v117_v61, 0  ;;  %34524 = vst [vmem:[#allocation102_spill] sm:$0xff] %v31202_v34  ;;  %v292_v61 = vsel %vm155_vm0, %v118_v51, 0  ;;  %v34527_v51 = vand.u32 4294901760, %v31174_v37 }
  0x94   :  { %26220 = vmatprep.mubr.f32.mxu0 %v787_v27  ;;  %v846_v27 = vsub.f32 %v31147_v50, %v34522_v9  ;;  %v31208_v25 = vand.u32 4294901760, %v289_v45  ;;  %v295_v9 = vsel %vm155_vm0, %v119_v19, 0  ;;  %34526 = vst [vmem:[#allocation104_spill] sm:$0xff] %v31214_v41  ;;  %v31219_v55 = vand.u32 4294901760, %v292_v61 }
  0x95   :  { %v856_v50 = vsub.f32 %v31174_v37, %v34527_v51  ;;  %v31222_v32 = vand.u32 4294901760, %v295_v9  ;;  %v298_v19 = vsel %vm155_vm0, %v120_v59, 0  ;;  %v866_v56 = vsub.f32 %v31184_v3, %v34530_v14 }
  0x96   :  { %34525 = vst [vmem:[#allocation103_spill] sm:$0xff] %v31208_v25  ;;  %v847_v52 = vand.u32 4294901760, %v846_v27  ;;  %34528 = vst [vmem:[#allocation105_spill] sm:$0xff] %v31219_v55  ;;  %v31232_v51 = vsub.f32 %v289_v45, %v31208_v25  ;;  %v123_v59 = vmul.f32 %v30847_v26, %v30847_v26  ;;  %v31239_v36 = vsub.f32 %v292_v61, %v31219_v55 }
  0x97   :  { %26221 = vmatmul.mubr.f32.gmra.mrb[32].mxu0 %v797_v62  ;;  %v121_v62 = vmul.f32 %v30825_v35, %v30825_v35  ;;  %34529 = vst [vmem:[#allocation106_spill] sm:$0xff] %v31222_v32  ;;  %v857_v37 = vand.u32 4294901760, %v856_v50  ;;  %v124_v14 = vmul.f32 %v30849_v1, %v30849_v1  ;;  %v34534_v45 = vand.u32 4294901760, %v31199_v57 }
  0x98   :  { %26223 = vmatprep.mubr.f32.mxu0 %v807_v39  ;;  %34531 = vst [vmem:[#allocation107_spill] sm:$0xff] %v31232_v51  ;;  %34532 = vst [vmem:[#allocation108_spill] sm:$0xff] %v31239_v36  ;;  %v304_v50 = vsel %vm155_vm0, %v122_v18, 0  ;;  %v867_v61 = vand.u32 4294901760, %v866_v56  ;;  %v34537_v3 = vand.u32 4294901760, %v31202_v34  ;;  %v34545_v25 = vand.u32 4294901760, %v31239_v36 }
  0x99   :  { %v876_v27 = vsub.f32 %v31199_v57, %v34534_v45  ;;  %v34538_v45 = vand.u32 4294901760, %v31214_v41  ;;  %v307_v57 = vsel %vm155_vm0, %v123_v59, 0 }
  0x9a   :  { %v886_v55 = vsub.f32 %v31202_v34, %v34537_v3  ;;  %v310_v3 = vsel %vm155_vm0, %v124_v14, 0 }
  0x9b   :  { %26224 = vmatmul.mubr.f32.gmra.mrb[34].mxu0 %v817_v38  ;;  %v301_v38 = vsel %vm155_vm0, %v121_v62, 0  ;;  %v31249_v62 = vsub.f32 %v295_v9, %v31222_v32  ;;  %v896_v9 = vsub.f32 %v31214_v41, %v34538_v45  ;;  %v877_v56 = vand.u32 4294901760, %v876_v27 }
  0x9c   :  { %26226 = vmatprep.mubr.f32.mxu0 %v827_v28  ;;  %v31241_v28 = vand.u32 4294901760, %v298_v19  ;;  %v31251_v39 = vand.u32 4294901760, %v301_v38  ;;  %v126_v45 = vmul.f32 %v30868_v17, %v30868_v17  ;;  %v887_v59 = vand.u32 4294901760, %v886_v55 }
  0x9d   :  { %34535 = vst [vmem:[#allocation110_spill] sm:$0xff] %v31249_v62  ;;  %v34542_v32 = vand.u32 4294901760, %v31232_v51  ;;  %v31280_v41 = vand.u32 4294901760, %v307_v57  ;;  %v127_v27 = vmul.f32 %v30917_v30, %v30917_v30 }
  0x9e   :  { %34533 = vst [vmem:[#allocation109_spill] sm:$0xff] %v31241_v28  ;;  %34536 = vst [vmem:[#allocation111_spill] sm:$0xff] %v31251_v39  ;;  %v31266_v18 = vsub.f32 %v298_v19, %v31241_v28  ;;  %v31273_v34 = vsub.f32 %v301_v38, %v31251_v39  ;;  %v897_v38 = vand.u32 4294901760, %v896_v9  ;;  %v916_v39 = vsub.f32 %v31239_v36, %v34545_v25 }
  0x9f   :  { %26227 = vmatmul.mubr.f32.gmra.mrb[36].mxu0 %v837_v33  ;;  %v125_v33 = vmul.f32 %v30866_v53, %v30866_v53  ;;  %v906_v19 = vsub.f32 %v31232_v51, %v34542_v32  ;;  %34543 = vst [vmem:[#allocation115_spill] sm:$0xff] %v31280_v41  ;;  %v34547_v32 = vand.u32 4294901760, %v31249_v62  ;;  %v316_v9 = vsel %vm155_vm0, %v126_v45, 0 }
  0xa0   :  { %26229 = vmatprep.mubr.f32.mxu0 %v847_v52  ;;  %34539 = vst [vmem:[#allocation112_spill] sm:$0xff] %v31266_v18  ;;  %v31268_v52 = vand.u32 4294901760, %v304_v50  ;;  %34541 = vst [vmem:[#allocation114_spill] sm:$0xff] %v31273_v34  ;;  %v31302_v25 = vsub.f32 %v307_v57, %v31280_v41  ;;  %v319_v55 = vsel %vm155_vm0, %v127_v27, 0  ;;  %v917_v51 = vand.u32 4294901760, %v916_v39 }
  0xa1   :  { %v313_v14 = vsel %vm155_vm0, %v125_v33, 0  ;;  %v926_v33 = vsub.f32 %v31249_v62, %v34547_v32  ;;  %v907_v58 = vand.u32 4294901760, %v906_v19  ;;  %v129_v32 = vmul.f32 %v30935_v29, %v30935_v29 }
  0xa2   :  { %34540 = vst [vmem:[#allocation113_spill] sm:$0xff] %v31268_v52  ;;  %v31298_v28 = vand.u32 4294901760, %v313_v14  ;;  %34549 = vst [vmem:[#allocation119_spill] sm:$0xff] %v31302_v25  ;;  %v31313_v45 = vand.u32 4294901760, %v316_v9  ;;  %v34552_v57 = vand.u32 4294901760, %v31266_v18  ;;  %v34553_v36 = vand.u32 4294901760, %v31273_v34 }
  0xa3   :  { %26230 = vmatmul.mubr.f32.gmra.mrb[38].mxu0 %v857_v37  ;;  %v31283_v37 = vand.u32 4294901760, %v310_v3 }
  0xa4   :  { %26232 = vmatprep.mubr.f32.mxu0 %v867_v61  ;;  %v31292_v61 = vsub.f32 %v304_v50, %v31268_v52  ;;  %34548 = vst [vmem:[#allocation118_spill] sm:$0xff] %v31298_v28  ;;  %v128_v50 = vmul.f32 %v30919_v40, %v30919_v40  ;;  %34551 = vst [vmem:[#allocation121_spill] sm:$0xff] %v31313_v45  ;;  %v936_v19 = vsub.f32 %v31266_v18, %v34552_v57 }
  0xa5   :  { %34544 = vst [vmem:[#allocation116_spill] sm:$0xff] %v31283_v37  ;;  %v31322_v27 = vsub.f32 %v313_v14, %v31298_v28  ;;  %v325_v57 = vsel %vm155_vm0, %v129_v32, 0  ;;  %v31338_v39 = vsub.f32 %v316_v9, %v31313_v45  ;;  %v34559_v32 = vand.u32 4294901760, %v31302_v25 }
  0xa6   :  { %34546 = vst [vmem:[#allocation117_spill] sm:$0xff] %v31292_v61  ;;  %v322_v62 = vsel %vm155_vm0, %v128_v50, 0  ;;  %v34556_v14 = vand.u32 4294901760, %v31292_v61  ;;  %v132_v50 = vmul.f32 %v30953_v60, %v30953_v60  ;;  %v31351_v9 = vand.u32 4294901760, %v325_v57 }
  0xa7   :  { %26233 = vmatmul.mubr.f32.gmra.mrb[40].mxu0 %v877_v56  ;;  %v31307_v56 = vsub.f32 %v310_v3, %v31283_v37  ;;  %v946_v3 = vsub.f32 %v31273_v34, %v34553_v36  ;;  %34554 = vst [vmem:[#allocation122_spill] sm:$0xff] %v31322_v27  ;;  %v31325_v37 = vand.u32 4294901760, %v319_v55  ;;  %v131_v36 = vmul.f32 %v30939_v44, %v30939_v44 }
  0xa8   :  { %26235 = vmatprep.mubr.f32.mxu0 %v887_v59  ;;  %v927_v59 = vand.u32 4294901760, %v926_v33  ;;  %34557 = vst [vmem:[#allocation124_spill] sm:$0xff] %v31338_v39  ;;  %v937_v34 = vand.u32 4294901760, %v936_v19  ;;  %v31343_v28 = vand.u32 4294901760, %v322_v62  ;;  %v966_v41 = vsub.f32 %v31302_v25, %v34559_v32  ;;  %34561 = vst [vmem:[#allocation127_spill] sm:$0xff] %v31351_v9 }
  0xa9   :  { %34550 = vst [vmem:[#allocation120_spill] sm:$0xff] %v31307_v56  ;;  %34555 = vst [vmem:[#allocation123_spill] sm:$0xff] %v31325_v37  ;;  %v947_v18 = vand.u32 4294901760, %v946_v3  ;;  %v331_v3 = vsel %vm155_vm0, %v131_v36, 0  ;;  %v334_v32 = vsel %vm155_vm0, %v132_v50, 0 }
  0xaa   :  { %34558 = vst [vmem:[#allocation125_spill] sm:$0xff] %v31343_v28  ;;  %v967_v45 = vand.u32 4294901760, %v966_v41 }
  0xab   :  { %26236 = vmatmul.mubr.f32.gmra.mrb[42].mxu0 %v897_v38  ;;  %v130_v38 = vmul.f32 %v30937_v47, %v30937_v47 }
  0xac   :  { %26238 = vmatprep.mubr.f32.mxu0 %v907_v58  ;;  %v956_v58 = vsub.f32 %v31292_v61, %v34556_v14  ;;  %v31349_v14 = vsub.f32 %v319_v55, %v31325_v37  ;;  %v134_v55 = vmul.f32 %v30990_v23, %v30990_v23  ;;  %v34568_v37 = vand.u32 4294901760, %v31338_v39 }
  0xad   :  { %v328_v61 = vsel %vm155_vm0, %v130_v38, 0  ;;  %v34563_v38 = vand.u32 4294901760, %v31322_v27 }
  0xae   :  { %34560 = vst [vmem:[#allocation126_spill] sm:$0xff] %v31349_v14  ;;  %v957_v33 = vand.u32 4294901760, %v956_v58  ;;  %v31370_v36 = vand.u32 4294901760, %v328_v61  ;;  %v135_v58 = vmul.f32 %v31004_v0, %v31004_v0  ;;  %v340_v41 = vsel %vm155_vm0, %v134_v55, 0 }
  0xaf   :  { %26239 = vmatmul.mubr.f32.gmra.mrb[44].mxu0 %v917_v51  ;;  %v34562_v51 = vand.u32 4294901760, %v31307_v56  ;;  %v986_v25 = vsub.f32 %v31322_v27, %v34563_v38  ;;  %v137_v38 = vmul.f32 %v30825_v35, %v30643_v2  ;;  %v31382_v27 = vand.u32 4294901760, %v334_v32 }
  0xb0   :  { %26241 = vmatprep.mubr.f32.mxu0 %v927_v59  ;;  %v133_v59 = vmul.f32 %v30968_v22, %v30968_v22  ;;  %34564 = vst [vmem:[#allocation128_spill] sm:$0xff] %v31370_v36  ;;  %v31393_v2 = vsub.f32 %v328_v61, %v31370_v36  ;;  %v343_v35 = vsel %vm155_vm0, %v135_v58, 0 }
  0xb1   :  { %v976_v19 = vsub.f32 %v31307_v56, %v34562_v51  ;;  %v31368_v51 = vsub.f32 %v322_v62, %v31343_v28  ;;  %v31376_v56 = vsub.f32 %v325_v57, %v31351_v9  ;;  %34567 = vst [vmem:[#allocation131_spill] sm:$0xff] %v31382_v27  ;;  %v136_v57 = vmul.f32 %v31014_v31, %v31014_v31 }
  0xb2   :  { %v337_v62 = vsel %vm155_vm0, %v133_v59, 0  ;;  %v987_v50 = vand.u32 4294901760, %v986_v25  ;;  %34569 = vst [vmem:[#allocation132_spill] sm:$0xff] %v31393_v2  ;;  %v31406_v25 = vsub.f32 %v334_v32, %v31382_v27  ;;  %v31410_v9 = vand.u32 4294901760, %v343_v35 }
  0xb3   :  { %26242 = vmatmul.mubr.f32.gmra.mrb[46].mxu0 %v937_v34  ;;  %34565 = vst [vmem:[#allocation129_spill] sm:$0xff] %v31376_v56  ;;  %v31378_v34 = vand.u32 4294901760, %v331_v3  ;;  %v977_v28 = vand.u32 4294901760, %v976_v19  ;;  %v34570_v19 = vand.u32 4294901760, %v31349_v14  ;;  %v34575_v58 = vand.u32 4294901760, %v31368_v51 }
  0xb4   :  { %26244 = vmatprep.mubr.f32.mxu0 %v947_v18  ;;  %v996_v18 = vsub.f32 %v31338_v39, %v34568_v37  ;;  %v31403_v39 = vand.u32 4294901760, %v337_v62  ;;  %34572 = vst [vmem:[#allocation134_spill] sm:$0xff] %v31406_v25  ;;  %34574 = vst [vmem:[#allocation136_spill] sm:$0xff] %v31410_v9  ;;  %v349_v37 = vsel %vm155_vm0, %v137_v38, 0  ;;  %v138_v32 = vmul.f32 %v30839_v46, %v30647_v6 }
  0xb5   :  { %34566 = vst [vmem:[#allocation130_spill] sm:$0xff] %v31378_v34  ;;  %v1006_v59 = vsub.f32 %v31349_v14, %v34570_v19  ;;  %v31401_v55 = vsub.f32 %v331_v3, %v31378_v34  ;;  %v1016_v19 = vsub.f32 %v31368_v51, %v34575_v58  ;;  %v139_v6 = vmul.f32 %v30847_v26, %v30649_v7 }
  0xb6   :  { %34571 = vst [vmem:[#allocation133_spill] sm:$0xff] %v31403_v39  ;;  %v997_v61 = vand.u32 4294901760, %v996_v18  ;;  %v34576_v18 = vand.u32 4294901760, %v31376_v56  ;;  %v31436_v46 = vsub.f32 %v343_v35, %v31410_v9  ;;  %v352_v58 = vsel %vm155_vm0, %v138_v32, 0 }
  0xb7   :  { %26245 = vmatmul.mubr.f32.gmra.mrb[48].mxu0 %v957_v33  ;;  %v31408_v33 = vand.u32 4294901760, %v340_v41  ;;  %v1007_v14 = vand.u32 4294901760, %v1006_v59  ;;  %v1017_v59 = vand.u32 4294901760, %v1016_v19  ;;  %v34581_v7 = vand.u32 4294901760, %v31401_v55 }
  0xb8   :  { %26247 = vmatprep.mubr.f32.mxu0 %v967_v45  ;;  %v346_v45 = vsel %vm155_vm0, %v136_v57, 0  ;;  %v1026_v27 = vsub.f32 %v31376_v56, %v34576_v18  ;;  %34578 = vst [vmem:[#allocation138_spill] sm:$0xff] %v31436_v46  ;;  %v34582_v19 = vand.u32 4294901760, %v31406_v25 }
  0xb9   :  { %34573 = vst [vmem:[#allocation135_spill] sm:$0xff] %v31408_v33  ;;  %v31429_v3 = vsub.f32 %v340_v41, %v31408_v33  ;;  %v31431_v38 = vand.u32 4294901760, %v346_v45  ;;  %v140_v41 = vmul.f32 %v30849_v1, %v30657_v11  ;;  %v1046_v26 = vsub.f32 %v31401_v55, %v34581_v7 }
  0xba   :  { %v1027_v57 = vand.u32 4294901760, %v1026_v27  ;;  %v355_v11 = vsel %vm155_vm0, %v139_v6, 0  ;;  %v142_v7 = vmul.f32 %v30868_v17, %v30661_v13  ;;  %v34586_v17 = vand.u32 4294901760, %v31436_v46 }
  0xbb   :  { %26248 = vmatmul.mubr.f32.gmra.mrb[50].mxu0 %v977_v28  ;;  %v31425_v28 = vsub.f32 %v337_v62, %v31403_v39  ;;  %34577 = vst [vmem:[#allocation137_spill] sm:$0xff] %v31431_v38  ;;  %v34580_v62 = vand.u32 4294901760, %v31393_v2  ;;  %v34177_v32 = vand.u32 4294901760, %v31429_v3 }
  0xbc   :  { %26250 = vmatprep.mubr.f32.mxu0 %v987_v50  ;;  %v31438_v50 = vand.u32 4294901760, %v349_v37 }
  0xbd   :  { %v1036_v18 = vsub.f32 %v31393_v2, %v34580_v62  ;;  %v34178_v35 = vand.u32 4294901760, %v31425_v28  ;;  %v1056_v62 = vsub.f32 %v31406_v25, %v34582_v19  ;;  %v31457_v2 = vsub.f32 %v346_v45, %v31431_v38 }
  0xbe   :  { %34579 = vst [vmem:[#allocation139_spill] sm:$0xff] %v31438_v50  ;;  %v31462_v27 = vsub.f32 %v349_v37, %v31438_v50  ;;  %v143_v45 = vmul.f32 %v30917_v30, %v30726_v42  ;;  %v1047_v19 = vand.u32 4294901760, %v1046_v26  ;;  %v31474_v37 = vand.u32 4294901760, %v355_v11 }
  0xbf   :  { %26251 = vmatmul.mubr.f32.gmra.mrb[52].mxu0 %v997_v61  ;;  %v141_v61 = vmul.f32 %v30866_v53, %v30659_v12  ;;  %v1037_v12 = vand.u32 4294901760, %v1036_v18  ;;  %v358_v53 = vsel %vm155_vm0, %v140_v41, 0  ;;  %v1066_v6 = vsub.f32 %v31425_v28, %v34178_v35 }
  0xc0   :  { %26253 = vmatprep.mubr.f32.mxu0 %v1007_v14  ;;  %34583 = vst [vmem:[#allocation140_spill] sm:$0xff] %v31462_v27  ;;  %v31464_v14 = vand.u32 4294901760, %v352_v58  ;;  %34585 = vst [vmem:[#allocation142_spill] sm:$0xff] %v31474_v37  ;;  %v1076_v18 = vsub.f32 %v31429_v3, %v34177_v32  ;;  %v34181_v13 = vand.u32 4294901760, %v31457_v2  ;;  %v1086_v42 = vsub.f32 %v31436_v46, %v34586_v17 }
  0xc1   :  { %v361_v1 = vsel %vm155_vm0, %v141_v61, 0  ;;  %v31488_v41 = vand.u32 4294901760, %v358_v53  ;;  %v364_v61 = vsel %vm155_vm0, %v142_v7, 0  ;;  %v144_v32 = vmul.f32 %v30919_v40, %v30728_v43 }
  0xc2   :  { %34584 = vst [vmem:[#allocation141_spill] sm:$0xff] %v31464_v14  ;;  %v31490_v26 = vand.u32 4294901760, %v361_v1  ;;  %v1067_v35 = vand.u32 4294901760, %v1066_v6  ;;  %v31497_v17 = vsub.f32 %v355_v11, %v31474_v37  ;;  %v1077_v30 = vand.u32 4294901760, %v1076_v18 }
  0xc3   :  { %26254 = vmatmul.mubr.f32.gmra.mrb[54].mxu0 %v1017_v59  ;;  %v1057_v59 = vand.u32 4294901760, %v1056_v62  ;;  %34587 = vst [vmem:[#allocation143_spill] sm:$0xff] %v31488_v41  ;;  %v367_v62 = vsel %vm155_vm0, %v143_v45, 0  ;;  %v1087_v46 = vand.u32 4294901760, %v1086_v42  ;;  %v31505_v7 = vsub.f32 %v358_v53, %v31488_v41 }
  0xc4   :  { %26256 = vmatprep.mubr.f32.mxu0 %v1027_v57  ;;  %v31486_v57 = vsub.f32 %v352_v58, %v31464_v14  ;;  %34588 = vst [vmem:[#allocation144_spill] sm:$0xff] %v31490_v26  ;;  %v145_v58 = vmul.f32 %v30935_v29, %v30733_v48  ;;  %v31507_v45 = vand.u32 4294901760, %v364_v61  ;;  %v31509_v40 = vand.u32 4294901760, %v367_v62 }
  0xc5   :  { %34589 = vst [vmem:[#allocation145_spill] sm:$0xff] %v31505_v7  ;;  %v34592_v43 = vand.u32 4294901760, %v31462_v27  ;;  %v31516_v29 = vsub.f32 %v361_v1, %v31490_v26  ;;  %v34183_v53 = vand.u32 4294901760, %v31497_v17  ;;  %v146_v18 = vmul.f32 %v30937_v47, %v30735_v49 }
  0xc6   :  { %34590 = vst [vmem:[#allocation146_spill] sm:$0xff] %v31507_v45  ;;  %34591 = vst [vmem:[#allocation147_spill] sm:$0xff] %v31509_v40  ;;  %v34182_v48 = vand.u32 4294901760, %v31486_v57  ;;  %v373_v6 = vsel %vm155_vm0, %v145_v58, 0  ;;  %v147_v42 = vmul.f32 %v30939_v44, %v30739_v54  ;;  %v34184_v1 = vand.u32 4294901760, %v31505_v7 }
  0xc7   :  { %26257 = vmatmul.mubr.f32.gmra.mrb[56].mxu0 %v1037_v12  ;;  %v1096_v12 = vsub.f32 %v31457_v2, %v34181_v13  ;;  %v1106_v11 = vsub.f32 %v31462_v27, %v34592_v43  ;;  %34593 = vst [vmem:[#allocation148_spill] sm:$0xff] %v31516_v29  ;;  %v31531_v43 = vsub.f32 %v364_v61, %v31507_v45  ;;  %v31543_v44 = vand.u32 4294901760, %v373_v6  ;;  %v30417_v13 = vld [vmem:[#allocation7 + $0x58] sm:$0xff] }
  0xc8   :  { %26259 = vmatprep.mubr.f32.mxu0 %v1047_v19  ;;  %v370_v19 = vsel %vm155_vm0, %v144_v32, 0  ;;  %v1116_v47 = vsub.f32 %v31486_v57, %v34182_v48  ;;  %v376_v58 = vsel %vm155_vm0, %v146_v18, 0  ;;  %v149_v48 = vmul.f32 %v30968_v22, %v30765_v5 }
  0xc9   :  { %v31536_v32 = vand.u32 4294901760, %v370_v19  ;;  %v1097_v49 = vand.u32 4294901760, %v1096_v12  ;;  %34596 = vst [vmem:[#allocation151_spill] sm:$0xff] %v31543_v44  ;;  %v1107_v61 = vand.u32 4294901760, %v1106_v11  ;;  %v379_v12 = vsel %vm155_vm0, %v147_v42, 0 }
  0xca   :  { %v1136_v54 = vsub.f32 %v31505_v7, %v34184_v1  ;;  %v1117_v18 = vand.u32 4294901760, %v1116_v47  ;;  %v31565_v42 = vsub.f32 %v373_v6, %v31543_v44  ;;  %v31567_v22 = vand.u32 4294901760, %v376_v58 }
  0xcb   :  { %26260 = vmatmul.mubr.f32.gmra.mrb[58].mxu0 %v1057_v59  ;;  %v31525_v59 = vpack.c.bf16 %v30678_v21, %v30676_v20  ;;  %34595 = vst [vmem:[#allocation150_spill] sm:$0xff] %v31536_v32  ;;  %v31569_v1 = vand.u32 4294901760, %v379_v12  ;;  %v151_v47 = vmul.f32 %v31004_v0, %v30815_v4  ;;  %v34601_v6 = vand.u32 4294901760, %v31531_v43 }
  0xcc   :  { %26262 = vmatprep.mubr.f32.mxu0 %v1067_v35  ;;  %v31534_v35 = vsub.f32 %v367_v62, %v31509_v40  ;;  %v1126_v62 = vsub.f32 %v31497_v17, %v34183_v53  ;;  %v31559_v53 = vsub.f32 %v370_v19, %v31536_v32  ;;  %34599 = vst [vmem:[#allocation153_spill] sm:$0xff] %v31567_v22 }
  0xcd   :  { %28601 = vmatprep.subr.bf16.mxu0 %v31525_v59  ;;  %34600 = vst [vmem:[#allocation154_spill] sm:$0xff] %v31569_v1  ;;  %v31590_v4 = vsub.f32 %v379_v12, %v31569_v1 }
  0xce   :  { %34594 = vst [vmem:[#allocation149_spill] sm:$0xff] %v31534_v35  ;;  %34597 = vst [vmem:[#allocation152_spill] sm:$0xff] %v31559_v53  ;;  %v1127_v5 = vand.u32 4294901760, %v1126_v62  ;;  %v34192_v7 = vand.u32 4294901760, %v31559_v53 }
  0xcf   :  { %26263 = vmatmul.mubr.f32.gmra.mrb[60].mxu0 %v1077_v30  ;;  %v148_v30 = vmul.f32 %v30417_v13, %v30953_v60  ;;  %v34598_v60 = vand.u32 4294901760, %v31516_v29 }
  0xd0   :  { %26265 = vmatprep.mubr.f32.mxu0 %v1087_v46  ;;  %v30418_v46 = vld [vmem:[#allocation7 + $0x68] sm:$0xff] }
  0xd1   :  { %v1146_v13 = vsub.f32 %v31516_v29, %v34598_v60  ;;  %v382_v11 = vsel %vm155_vm0, %v148_v30, 0  ;;  %v150_v19 = vmul.f32 %v30418_v46, %v30990_v23  ;;  %v1137_v60 = vand.u32 4294901760, %v1136_v54 }
  0xd2   :  { %v1156_v29 = vsub.f32 %v31531_v43, %v34601_v6  ;;  %v34191_v23 = vand.u32 4294901760, %v31565_v42  ;;  %v31587_v46 = vand.u32 4294901760, %v382_v11  ;;  %v152_v6 = vmul.f32 %v31014_v31, %v30817_v10 }
  0xd3   :  { %26266 = vmatmul.mubr.f32.gmra.mrb[62].mxu0 %v1097_v49  ;;  %v385_v49 = vsel %vm155_vm0, %v149_v48, 0  ;;  %v1147_v30 = vand.u32 4294901760, %v1146_v13  ;;  %v31585_v48 = vsub.f32 %v376_v58, %v31567_v22  ;;  %v388_v54 = vsel %vm155_vm0, %v150_v19, 0 }
  0xd4   :  { %26268 = vmatprep.mubr.f32.mxu0 %v1107_v61  ;;  %v34602_v61 = vand.u32 4294901760, %v31534_v35  ;;  %34604 = vst [vmem:[#allocation156_spill] sm:$0xff] %v31587_v46  ;;  %v31592_v0 = vand.u32 4294901760, %v385_v49  ;;  %v1157_v13 = vand.u32 4294901760, %v1156_v29  ;;  %v1176_v58 = vsub.f32 %v31559_v53, %v34192_v7 }
  0xd5   :  { %34603 = vst [vmem:[#allocation155_spill] sm:$0xff] %v31585_v48  ;;  %v1186_v12 = vsub.f32 %v31565_v42, %v34191_v23  ;;  %v31606_v19 = vsub.f32 %v382_v11, %v31587_v46  ;;  %v34194_v10 = vand.u32 4294901760, %v31590_v4 }
  0xd6   :  { %v1166_v62 = vsub.f32 %v31534_v35, %v34602_v61  ;;  %34605 = vst [vmem:[#allocation157_spill] sm:$0xff] %v31592_v0  ;;  %v31608_v35 = vand.u32 4294901760, %v388_v54  ;;  %v31612_v31 = vsub.f32 %v385_v49, %v31592_v0 }
  0xd7   :  { %26269 = vmatmul.mubr.f32.gmra.mrb[64].mxu0 %v1117_v18  ;;  %v391_v18 = vsel %vm155_vm0, %v151_v47, 0  ;;  %34606 = vst [vmem:[#allocation158_spill] sm:$0xff] %v31606_v19  ;;  %v394_v47 = vsel %vm155_vm0, %v152_v6, 0  ;;  %v34195_v11 = vand.u32 4294901760, %v31606_v19  ;;  %v1187_v49 = vand.u32 4294901760, %v1186_v12 }
  0xd8   :  { %26271 = vmatprep.mubr.f32.mxu0 %v1127_v5  ;;  %v1167_v61 = vand.u32 4294901760, %v1166_v62  ;;  %v34193_v5 = vand.u32 4294901760, %v31585_v48  ;;  %34607 = vst [vmem:[#allocation159_spill] sm:$0xff] %v31608_v35  ;;  %34608 = vst [vmem:[#allocation160_spill] sm:$0xff] %v31612_v31  ;;  %v31614_v29 = vand.u32 4294901760, %v391_v18  ;;  %v31622_v23 = vsub.f32 %v388_v54, %v31608_v35 }
  0xd9   :  { %v1206_v7 = vsub.f32 %v31590_v4, %v34194_v10  ;;  %v34201_v6 = vand.u32 4294901760, %v31612_v31  ;;  %v1216_v54 = vsub.f32 %v31606_v19, %v34195_v11 }
  0xda   :  { %34609 = vst [vmem:[#allocation161_spill] sm:$0xff] %v31614_v29  ;;  %v1196_v62 = vsub.f32 %v31585_v48, %v34193_v5  ;;  %v34200_v5 = vand.u32 4294901760, %v31622_v23 }
  0xdb   :  { %26272 = vmatmul.mubr.f32.gmra.mrb[66].mxu0 %v1137_v60  ;;  %v1177_v60 = vand.u32 4294901760, %v1176_v58  ;;  %v1207_v12 = vand.u32 4294901760, %v1206_v7  ;;  %v1226_v10 = vsub.f32 %v31612_v31, %v34201_v6  ;;  %v34627_v6 = vld [vmem:[#allocation48_spill] sm:$0xff] }
  0xdc   :  { %26274 = vmatprep.mubr.f32.mxu0 %v1147_v30  ;;  %v31624_v30 = vand.u32 4294901760, %v394_v47  ;;  %v1197_v58 = vand.u32 4294901760, %v1196_v62  ;;  %v1236_v62 = vsub.f32 %v31622_v23, %v34200_v5  ;;  %v34626_v5 = vld [vmem:[#allocation45_spill] sm:$0xff] }
  0xdd   :  { %v1227_v19 = vand.u32 4294901760, %v1226_v10  ;;  %v34613_v10 = vld [vmem:[#allocation16_spill] sm:$0xff] }
  0xde   :  { %34610 = vst [vmem:[#allocation162_spill] sm:$0xff] %v31624_v30 }
  0xdf   :  { %26275 = vmatmul.mubr.f32.gmra.mrb[68].mxu0 %v1157_v13  ;;  %v31631_v13 = vsub.f32 %v391_v18, %v31614_v29 }
  0xe0   :  { %26277 = vmatprep.mubr.f32.mxu0 %v1167_v61  ;;  %v31638_v61 = vsub.f32 %v394_v47, %v31624_v30  ;;  %v1237_v47 = vand.u32 4294901760, %v1236_v62  ;;  %v34617_v62 = vld [vmem:[#allocation28_spill] sm:$0xff] }
  0xe1   :  { %34611 = vst [vmem:[#allocation163_spill] sm:$0xff] %v31631_v13  ;;  %v34199_v18 = vand.u32 4294901760, %v31631_v13 }
  0xe2   :  { %34612 = vst [vmem:[#allocation164_spill] sm:$0xff] %v31638_v61  ;;  %v34198_v11 = vand.u32 4294901760, %v31638_v61 }
  0xe3   :  { %26278 = vmatmul.mubr.f32.gmra.mrb[70].mxu0 %v1177_v60  ;;  %v1217_v60 = vand.u32 4294901760, %v1216_v54  ;;  %v1246_v7 = vsub.f32 %v31631_v13, %v34199_v18  ;;  %v34625_v18 = vld [vmem:[#allocation44_spill] sm:$0xff] }
  0xe4   :  { %26280 = vmatprep.mubr.f32.mxu0 %v1187_v49  ;;  %v1256_v49 = vsub.f32 %v31638_v61, %v34198_v11  ;;  %v34624_v11 = vld [vmem:[#allocation41_spill] sm:$0xff] }
  0xe6   :  { %v1257_v54 = vand.u32 4294901760, %v1256_v49  ;;  %v34620_v49 = vld [vmem:[#allocation33_spill] sm:$0xff] }
  0xe7   :  { %26281 = vmatmul.mubr.f32.gmra.mrb[72].mxu0 %v1197_v58  ;;  %v1247_v58 = vand.u32 4294901760, %v1246_v7  ;;  %v34618_v7 = vld [vmem:[#allocation29_spill] sm:$0xff] }
  0xe8   :  { %26283 = vmatprep.mubr.f32.mxu0 %v1207_v12  ;;  %v34614_v12 = vld [vmem:[#allocation20_spill] sm:$0xff] }
  0xeb   :  { %26284 = vmatmul.mubr.f32.gmra.mrb[74].mxu0 %v1217_v60  ;;  %v34615_v60 = vld [vmem:[#allocation24_spill] sm:$0xff] }
  0xec   :  { %26286 = vmatprep.mubr.f32.mxu0 %v1227_v19  ;;  %v34616_v19 = vld [vmem:[#allocation25_spill] sm:$0xff] }
  0xef   :  { %26287 = vmatmul.mubr.f32.gmra.mrb[76].mxu0 %v1237_v47  ;;  %v34619_v47 = vld [vmem:[#allocation32_spill] sm:$0xff] }
  0xf0   :  { %26289 = vmatprep.mubr.f32.mxu0 %v1247_v58  ;;  %v34621_v58 = vld [vmem:[#allocation34_spill] sm:$0xff] }
  0xf3   :  { %26290 = vmatmul.mubr.f32.gmra.mrb[78].mxu0 %v1257_v54  ;;  %v34622_v54 = vld [vmem:[#allocation35_spill] sm:$0xff] }
  0xf4   :  { %26296 = vmatprep.mubr.f32.mxu0 %v30651_v8  ;;  %v34710_v8 = vld [vmem:[#allocation102_spill] sm:$0xff] }
  0xf7   :  { %26297 = vmatmul.mubr.f32.vlgmr.msra.gmra.mrb[0].mxu0 %v30665_v15  ;;  %v34709_v15 = vld [vmem:[#allocation101_spill] sm:$0xff] }
  0xf8   :  { %26299 = vmatprep.mubr.f32.mxu0 %v30667_v16  ;;  %28603 = vmatpush3.bf16.msra.mxu0 %v31525_v59  ;;  %v34623_v59 = vld [vmem:[#allocation40_spill] sm:$0xff]  ;;  %v34708_v16 = vld [vmem:[#allocation99_spill] sm:$0xff] }
  0xf9   :  { %28605 = vmatprep.subr.bf16.mxu0 %v34613_v10 }
  0xfb   :  { %26300 = vmatmul.mubr.f32.gmra.mrb[2].mxu0 %v34614_v12  ;;  %v34707_v12 = vld [vmem:[#allocation96_spill] sm:$0xff] }
  0xfc   :  { %26302 = vmatprep.mubr.f32.mxu0 %v34615_v60  ;;  %v34706_v60 = vld [vmem:[#allocation93_spill] sm:$0xff] }
  0xff   :  { %26303 = vmatmul.mubr.f32.gmra.mrb[4].mxu0 %v34616_v19  ;;  %v34705_v19 = vld [vmem:[#allocation92_spill] sm:$0xff] }
 0x100   :  { %26305 = vmatprep.mubr.f32.mxu0 %v34617_v62  ;;  %v34628_v62 = vld [vmem:[#allocation49_spill] sm:$0xff] }
 0x103   :  { %26306 = vmatmul.mubr.f32.gmra.mrb[6].mxu0 %v34618_v7  ;;  %v34629_v7 = vld [vmem:[#allocation50_spill] sm:$0xff] }
 0x104   :  { %26308 = vmatprep.mubr.f32.mxu0 %v34619_v47  ;;  %v34630_v47 = vld [vmem:[#allocation51_spill] sm:$0xff] }
 0x107   :  { %26309 = vmatmul.mubr.f32.gmra.mrb[8].mxu0 %v34620_v49  ;;  %v34631_v49 = vld [vmem:[#allocation55_spill] sm:$0xff] }
 0x108   :  { %26311 = vmatprep.mubr.f32.mxu0 %v34621_v58  ;;  %v34632_v58 = vld [vmem:[#allocation56_spill] sm:$0xff] }
 0x10b   :  { %26312 = vmatmul.mubr.f32.gmra.mrb[10].mxu0 %v34622_v54  ;;  %v34633_v54 = vld [vmem:[#allocation60_spill] sm:$0xff] }
 0x10c   :  { %26314 = vmatprep.mubr.f32.mxu0 %v34623_v59  ;;  %v34634_v59 = vld [vmem:[#allocation61_spill] sm:$0xff] }
 0x10f   :  { %26315 = vmatmul.mubr.f32.gmra.mrb[12].mxu0 %v34624_v11  ;;  %v34635_v11 = vld [vmem:[#allocation64_spill] sm:$0xff] }
 0x110   :  { %26317 = vmatprep.mubr.f32.mxu0 %v34625_v18  ;;  %v34636_v18 = vld [vmem:[#allocation65_spill] sm:$0xff] }
 0x113   :  { %26318 = vmatmul.mubr.f32.gmra.mrb[14].mxu0 %v34626_v5  ;;  %v34637_v5 = vld [vmem:[#allocation66_spill] sm:$0xff] }
 0x114   :  { %26320 = vmatprep.mubr.f32.mxu0 %v34627_v6  ;;  %v34638_v6 = vld [vmem:[#allocation68_spill] sm:$0xff] }
 0x117   :  { %26321 = vmatmul.mubr.f32.gmra.mrb[16].mxu0 %v34628_v62  ;;  %v34639_v62 = vld [vmem:[#allocation71_spill] sm:$0xff] }
 0x118   :  { %26323 = vmatprep.mubr.f32.mxu0 %v34629_v7  ;;  %v34640_v7 = vld [vmem:[#allocation73_spill] sm:$0xff] }
 0x11b   :  { %26324 = vmatmul.mubr.f32.gmra.mrb[18].mxu0 %v34630_v47  ;;  %v34641_v47 = vld [vmem:[#allocation75_spill] sm:$0xff] }
 0x11c   :  { %26326 = vmatprep.mubr.f32.mxu0 %v34631_v49  ;;  %v34642_v49 = vld [vmem:[#allocation77_spill] sm:$0xff] }
 0x11f   :  { %26327 = vmatmul.mubr.f32.gmra.mrb[20].mxu0 %v34632_v58  ;;  %v34704_v58 = vld [vmem:[#allocation90_spill] sm:$0xff] }
 0x120   :  { %26329 = vmatprep.mubr.f32.mxu0 %v34633_v54  ;;  %v34703_v54 = vld [vmem:[#allocation88_spill] sm:$0xff] }
 0x123   :  { %26330 = vmatmul.mubr.f32.gmra.mrb[22].mxu0 %v34634_v59  ;;  %v34643_v59 = vld [vmem:[#allocation82_spill] sm:$0xff] }
 0x124   :  { %26332 = vmatprep.mubr.f32.mxu0 %v34635_v11  ;;  %v34644_v11 = vld [vmem:[#allocation84_spill] sm:$0xff] }
 0x127   :  { %26333 = vmatmul.mubr.f32.gmra.mrb[24].mxu0 %v34636_v18  ;;  %v34645_v18 = vld [vmem:[#allocation85_spill] sm:$0xff] }
 0x128   :  { %26335 = vmatprep.mubr.f32.mxu0 %v34637_v5  ;;  %v34646_v5 = vld [vmem:[#allocation89_spill] sm:$0xff] }
 0x12b   :  { %26336 = vmatmul.mubr.f32.gmra.mrb[26].mxu0 %v34638_v6  ;;  %v34647_v6 = vld [vmem:[#allocation91_spill] sm:$0xff] }
 0x12c   :  { %26338 = vmatprep.mubr.f32.mxu0 %v34639_v62  ;;  %v34648_v62 = vld [vmem:[#allocation94_spill] sm:$0xff] }
 0x12f   :  { %26339 = vmatmul.mubr.f32.gmra.mrb[28].mxu0 %v34640_v7  ;;  %v34649_v7 = vld [vmem:[#allocation95_spill] sm:$0xff] }
 0x130   :  { %26341 = vmatprep.mubr.f32.mxu0 %v34641_v47  ;;  %v34650_v47 = vld [vmem:[#allocation97_spill] sm:$0xff] }
 0x133   :  { %26342 = vmatmul.mubr.f32.gmra.mrb[30].mxu0 %v34642_v49  ;;  %v34651_v49 = vld [vmem:[#allocation98_spill] sm:$0xff] }
 0x134   :  { %26344 = vmatprep.mubr.f32.mxu0 %v31063_v63  ;;  %v34652_v63 = vld [vmem:[#allocation100_spill] sm:$0xff] }
 0x137   :  { %26345 = vmatmul.mubr.f32.gmra.mrb[32].mxu0 %v31079_v24  ;;  %v34653_v24 = vld [vmem:[#allocation103_spill] sm:$0xff] }
 0x138   :  { %26347 = vmatprep.mubr.f32.mxu0 %v34643_v59  ;;  %v34654_v59 = vld [vmem:[#allocation105_spill] sm:$0xff] }
 0x13b   :  { %26348 = vmatmul.mubr.f32.gmra.mrb[34].mxu0 %v34644_v11  ;;  %v34655_v11 = vld [vmem:[#allocation106_spill] sm:$0xff] }
 0x13c   :  { %26350 = vmatprep.mubr.f32.mxu0 %v34645_v18  ;;  %v34656_v18 = vld [vmem:[#allocation109_spill] sm:$0xff] }
 0x13f   :  { %26351 = vmatmul.mubr.f32.gmra.mrb[36].mxu0 %v34646_v5  ;;  %v34657_v5 = vld [vmem:[#allocation111_spill] sm:$0xff] }
 0x140   :  { %26353 = vmatprep.mubr.f32.mxu0 %v34647_v6  ;;  %v34702_v6 = vld [vmem:[#allocation87_spill] sm:$0xff] }
 0x143   :  { %26354 = vmatmul.mubr.f32.gmra.mrb[38].mxu0 %v34648_v62  ;;  %v34658_v62 = vld [vmem:[#allocation115_spill] sm:$0xff] }
 0x144   :  { %26356 = vmatprep.mubr.f32.mxu0 %v34649_v7  ;;  %v34659_v7 = vld [vmem:[#allocation116_spill] sm:$0xff] }
 0x147   :  { %26357 = vmatmul.mubr.f32.gmra.mrb[40].mxu0 %v34650_v47  ;;  %v34660_v47 = vld [vmem:[#allocation118_spill] sm:$0xff] }
 0x148   :  { %26359 = vmatprep.mubr.f32.mxu0 %v34651_v49  ;;  %v34661_v49 = vld [vmem:[#allocation121_spill] sm:$0xff] }
 0x14b   :  { %26360 = vmatmul.mubr.f32.gmra.mrb[42].mxu0 %v34652_v63  ;;  %v34662_v63 = vld [vmem:[#allocation123_spill] sm:$0xff] }
 0x14c   :  { %26362 = vmatprep.mubr.f32.mxu0 %v34653_v24  ;;  %v34663_v24 = vld [vmem:[#allocation125_spill] sm:$0xff] }
 0x14f   :  { %26363 = vmatmul.mubr.f32.gmra.mrb[44].mxu0 %v34654_v59  ;;  %v34664_v59 = vld [vmem:[#allocation127_spill] sm:$0xff] }
 0x150   :  { %26365 = vmatprep.mubr.f32.mxu0 %v34655_v11  ;;  %v34701_v11 = vld [vmem:[#allocation86_spill] sm:$0xff] }
 0x153   :  { %26366 = vmatmul.mubr.f32.gmra.mrb[46].mxu0 %v34656_v18  ;;  %v34700_v18 = vld [vmem:[#allocation83_spill] sm:$0xff] }
 0x154   :  { %26368 = vmatprep.mubr.f32.mxu0 %v34657_v5  ;;  %v34665_v5 = vld [vmem:[#allocation131_spill] sm:$0xff] }
 0x157   :  { %26369 = vmatmul.mubr.f32.gmra.mrb[48].mxu0 %v31268_v52  ;;  %v34699_v52 = vld [vmem:[#allocation80_spill] sm:$0xff] }
 0x158   :  { %26371 = vmatprep.mubr.f32.mxu0 %v34658_v62  ;;  %v34694_v62 = vld [vmem:[#allocation70_spill] sm:$0xff] }
 0x15b   :  { %26372 = vmatmul.mubr.f32.gmra.mrb[50].mxu0 %v34659_v7  ;;  %v34693_v7 = vld [vmem:[#allocation69_spill] sm:$0xff] }
 0x15c   :  { %26374 = vmatprep.mubr.f32.mxu0 %v34660_v47  ;;  %v34692_v47 = vld [vmem:[#allocation67_spill] sm:$0xff] }
 0x15f   :  { %26375 = vmatmul.mubr.f32.gmra.mrb[52].mxu0 %v34661_v49  ;;  %v34691_v49 = vld [vmem:[#allocation63_spill] sm:$0xff] }
 0x160   :  { %26377 = vmatprep.mubr.f32.mxu0 %v34662_v63  ;;  %v34690_v63 = vld [vmem:[#allocation62_spill] sm:$0xff] }
 0x163   :  { %26378 = vmatmul.mubr.f32.gmra.mrb[54].mxu0 %v34663_v24  ;;  %v34689_v24 = vld [vmem:[#allocation59_spill] sm:$0xff] }
 0x164   :  { %26380 = vmatprep.mubr.f32.mxu0 %v34664_v59  ;;  %v34688_v59 = vld [vmem:[#allocation58_spill] sm:$0xff] }
 0x167   :  { %26381 = vmatmul.mubr.f32.gmra.mrb[56].mxu0 %v31370_v36 }
 0x168   :  { %26383 = vmatprep.mubr.f32.mxu0 %v31378_v34  ;;  %v34687_v34 = vand.u32 4294901760, %v30678_v21  ;;  %v34696_v21 = vld [vmem:[#allocation74_spill] sm:$0xff] }
 0x16b   :  { %26384 = vmatmul.mubr.f32.gmra.mrb[58].mxu0 %v34665_v5  ;;  %v34686_v5 = vand.u32 4294901760, %v30676_v20  ;;  %v34695_v20 = vld [vmem:[#allocation72_spill] sm:$0xff] }
 0x16c   :  { %26386 = vmatprep.mubr.f32.mxu0 %v31403_v39  ;;  %v34685_v39 = vld [vmem:[#allocation57_spill] sm:$0xff] }
 0x16d   :  { %v31761_v36 = vpack.c.bf16 %v34687_v34, %v34686_v5  ;;  %v34697_v34 = vld [vmem:[#allocation76_spill] sm:$0xff]  ;;  %v34698_v5 = vld [vmem:[#allocation78_spill] sm:$0xff] }
 0x16f   :  { %26387 = vmatmul.mubr.f32.gmra.mrb[60].mxu0 %v31408_v33  ;;  %v34684_v33 = vld [vmem:[#allocation54_spill] sm:$0xff] }
 0x170   :  { %26389 = vmatprep.mubr.f32.mxu0 %v31410_v9  ;;  %v34683_v9 = vld [vmem:[#allocation53_spill] sm:$0xff] }
 0x173   :  { %26390 = vmatmul.mubr.f32.gmra.mrb[62].mxu0 %v31431_v38  ;;  %v34682_v38 = vld [vmem:[#allocation52_spill] sm:$0xff] }
 0x174   :  { %26392 = vmatprep.mubr.f32.mxu0 %v31438_v50  ;;  %v34681_v50 = vld [vmem:[#allocation47_spill] sm:$0xff] }
 0x177   :  { %26393 = vmatmul.mubr.f32.gmra.mrb[64].mxu0 %v31464_v14  ;;  %v34680_v14 = vld [vmem:[#allocation46_spill] sm:$0xff] }
 0x178   :  { %26395 = vmatprep.mubr.f32.mxu0 %v31474_v37  ;;  %v34679_v37 = vld [vmem:[#allocation43_spill] sm:$0xff] }
 0x17b   :  { %26396 = vmatmul.mubr.f32.gmra.mrb[66].mxu0 %v31488_v41  ;;  %v34678_v41 = vld [vmem:[#allocation42_spill] sm:$0xff] }
 0x17c   :  { %26398 = vmatprep.mubr.f32.mxu0 %v31490_v26  ;;  %v34677_v26 = vld [vmem:[#allocation39_spill] sm:$0xff] }
 0x17f   :  { %26399 = vmatmul.mubr.f32.gmra.mrb[68].mxu0 %v31507_v45  ;;  %v34666_v45 = vld [vmem:[#allocation19_spill] sm:$0xff] }
 0x180   :  { %26401 = vmatprep.mubr.f32.mxu0 %v31509_v40  ;;  %v34667_v40 = vld [vmem:[#allocation21_spill] sm:$0xff] }
 0x183   :  { %26402 = vmatmul.mubr.f32.gmra.mrb[70].mxu0 %v31536_v32  ;;  %v34668_v32 = vld [vmem:[#allocation22_spill] sm:$0xff] }
 0x184   :  { %26404 = vmatprep.mubr.f32.mxu0 %v31543_v44  ;;  %v34676_v44 = vld [vmem:[#allocation38_spill] sm:$0xff] }
 0x187   :  { %26405 = vmatmul.mubr.f32.gmra.mrb[72].mxu0 %v31567_v22  ;;  %v34669_v22 = vld [vmem:[#allocation23_spill] sm:$0xff] }
 0x188   :  { %26407 = vmatprep.mubr.f32.mxu0 %v31569_v1  ;;  %v34670_v1 = vld [vmem:[#allocation26_spill] sm:$0xff] }
 0x18b   :  { %26408 = vmatmul.mubr.f32.gmra.mrb[74].mxu0 %v31587_v46  ;;  %v34671_v46 = vld [vmem:[#allocation27_spill] sm:$0xff] }
 0x18c   :  { %26410 = vmatprep.mubr.f32.mxu0 %v31592_v0  ;;  %v34672_v0 = vld [vmem:[#allocation30_spill] sm:$0xff] }
 0x18f   :  { %26411 = vmatmul.mubr.f32.gmra.mrb[76].mxu0 %v31608_v35  ;;  %v34673_v35 = vld [vmem:[#allocation31_spill] sm:$0xff] }
 0x190   :  { %26413 = vmatprep.mubr.f32.mxu0 %v31614_v29  ;;  %v34674_v29 = vld [vmem:[#allocation36_spill] sm:$0xff] }
 0x193   :  { %26414 = vmatmul.mubr.f32.gmra.mrb[78].mxu0 %v31624_v30  ;;  %v34675_v30 = vld [vmem:[#allocation37_spill] sm:$0xff] }
 0x194   :  { %26420 = vmatprep.mubr.f32.mxu0 %v34666_v45 }
 0x197   :  { %26421 = vmatmul.mubr.f32.vlgmr.msra.gmra.mrb[0].mxu0 %v34667_v40 }
 0x198   :  { %26423 = vmatprep.mubr.f32.mxu0 %v34668_v32  ;;  %28607 = vmatpush3.bf16.msra.mxu0 %v34613_v10 }
 0x199   :  { %28609 = vmatprep.subr.bf16.mxu0 %v31761_v36 }
 0x19b   :  { %26424 = vmatmul.mubr.f32.gmra.mrb[2].mxu0 %v34669_v22 }
 0x19c   :  { %26426 = vmatprep.mubr.f32.mxu0 %v34670_v1 }
 0x19f   :  { %26427 = vmatmul.mubr.f32.gmra.mrb[4].mxu0 %v34671_v46 }
 0x1a0   :  { %26429 = vmatprep.mubr.f32.mxu0 %v34672_v0 }
 0x1a3   :  { %26430 = vmatmul.mubr.f32.gmra.mrb[6].mxu0 %v34673_v35 }
 0x1a4   :  { %26432 = vmatprep.mubr.f32.mxu0 %v34674_v29 }
 0x1a7   :  { %26433 = vmatmul.mubr.f32.gmra.mrb[8].mxu0 %v34675_v30 }
 0x1a8   :  { %26435 = vmatprep.mubr.f32.mxu0 %v34676_v44 }
 0x1ab   :  { %26436 = vmatmul.mubr.f32.gmra.mrb[10].mxu0 %v34677_v26 }
 0x1ac   :  { %26438 = vmatprep.mubr.f32.mxu0 %v34678_v41 }
 0x1af   :  { %26439 = vmatmul.mubr.f32.gmra.mrb[12].mxu0 %v34679_v37 }
 0x1b0   :  { %26441 = vmatprep.mubr.f32.mxu0 %v34680_v14 }
 0x1b3   :  { %26442 = vmatmul.mubr.f32.gmra.mrb[14].mxu0 %v34681_v50 }
 0x1b4   :  { %26444 = vmatprep.mubr.f32.mxu0 %v34682_v38 }
 0x1b7   :  { %26445 = vmatmul.mubr.f32.gmra.mrb[16].mxu0 %v34683_v9 }
 0x1b8   :  { %26447 = vmatprep.mubr.f32.mxu0 %v34684_v33 }
 0x1bb   :  { %26448 = vmatmul.mubr.f32.gmra.mrb[18].mxu0 %v34685_v39 }
 0x1bc   :  { %26450 = vmatprep.mubr.f32.mxu0 %v34688_v59 }
 0x1bf   :  { %26451 = vmatmul.mubr.f32.gmra.mrb[20].mxu0 %v34689_v24 }
 0x1c0   :  { %26453 = vmatprep.mubr.f32.mxu0 %v34690_v63 }
 0x1c3   :  { %26454 = vmatmul.mubr.f32.gmra.mrb[22].mxu0 %v34691_v49 }
 0x1c4   :  { %26456 = vmatprep.mubr.f32.mxu0 %v34692_v47 }
 0x1c7   :  { %26457 = vmatmul.mubr.f32.gmra.mrb[24].mxu0 %v34693_v7 }
 0x1c8   :  { %26459 = vmatprep.mubr.f32.mxu0 %v34694_v62 }
 0x1cb   :  { %26460 = vmatmul.mubr.f32.gmra.mrb[26].mxu0 %v34695_v20 }
 0x1cc   :  { %26462 = vmatprep.mubr.f32.mxu0 %v34696_v21 }
 0x1cf   :  { %26463 = vmatmul.mubr.f32.gmra.mrb[28].mxu0 %v34697_v34 }
 0x1d0   :  { %26465 = vmatprep.mubr.f32.mxu0 %v34698_v5 }
 0x1d3   :  { %26466 = vmatmul.mubr.f32.gmra.mrb[30].mxu0 %v34699_v52 }
 0x1d4   :  { %26468 = vmatprep.mubr.f32.mxu0 %v34700_v18  ;;  %v34711_v18 = vld [vmem:[#allocation104_spill] sm:$0xff] }
 0x1d7   :  { %26469 = vmatmul.mubr.f32.gmra.mrb[32].mxu0 %v34701_v11  ;;  %v34712_v11 = vld [vmem:[#allocation107_spill] sm:$0xff] }
 0x1d8   :  { %26471 = vmatprep.mubr.f32.mxu0 %v34702_v6  ;;  %v34713_v6 = vld [vmem:[#allocation108_spill] sm:$0xff] }
 0x1db   :  { %26472 = vmatmul.mubr.f32.gmra.mrb[34].mxu0 %v34703_v54  ;;  %v34714_v54 = vld [vmem:[#allocation110_spill] sm:$0xff] }
 0x1dc   :  { %26474 = vmatprep.mubr.f32.mxu0 %v34704_v58  ;;  %v34715_v58 = vld [vmem:[#allocation112_spill] sm:$0xff] }
 0x1df   :  { %26475 = vmatmul.mubr.f32.gmra.mrb[36].mxu0 %v34705_v19  ;;  %v34716_v19 = vld [vmem:[#allocation114_spill] sm:$0xff] }
 0x1e0   :  { %26477 = vmatprep.mubr.f32.mxu0 %v34706_v60  ;;  %v34717_v60 = vld [vmem:[#allocation117_spill] sm:$0xff] }
 0x1e3   :  { %26478 = vmatmul.mubr.f32.gmra.mrb[38].mxu0 %v34707_v12  ;;  %v34718_v12 = vld [vmem:[#allocation119_spill] sm:$0xff] }
 0x1e4   :  { %26480 = vmatprep.mubr.f32.mxu0 %v34708_v16  ;;  %v34719_v16 = vld [vmem:[#allocation120_spill] sm:$0xff] }
 0x1e7   :  { %26481 = vmatmul.mubr.f32.gmra.mrb[40].mxu0 %v34709_v15  ;;  %v34720_v15 = vld [vmem:[#allocation122_spill] sm:$0xff] }
 0x1e8   :  { %26483 = vmatprep.mubr.f32.mxu0 %v34710_v8  ;;  %v34721_v8 = vld [vmem:[#allocation124_spill] sm:$0xff] }
 0x1eb   :  { %26484 = vmatmul.mubr.f32.gmra.mrb[42].mxu0 %v34711_v18  ;;  %v34722_v18 = vld [vmem:[#allocation126_spill] sm:$0xff] }
 0x1ec   :  { %26486 = vmatprep.mubr.f32.mxu0 %v34712_v11 }
 0x1ef   :  { %26487 = vmatmul.mubr.f32.gmra.mrb[44].mxu0 %v34713_v6 }
 0x1f0   :  { %26489 = vmatprep.mubr.f32.mxu0 %v34714_v54  ;;  %v34723_v54 = vld [vmem:[#allocation132_spill] sm:$0xff] }
 0x1f3   :  { %26490 = vmatmul.mubr.f32.gmra.mrb[46].mxu0 %v34715_v58 }
 0x1f4   :  { %26492 = vmatprep.mubr.f32.mxu0 %v34716_v19 }
 0x1f7   :  { %26493 = vmatmul.mubr.f32.gmra.mrb[48].mxu0 %v34717_v60 }
 0x1f8   :  { %26495 = vmatprep.mubr.f32.mxu0 %v34718_v12 }
 0x1fb   :  { %26496 = vmatmul.mubr.f32.gmra.mrb[50].mxu0 %v34719_v16  ;;  %v34724_v16 = vld [vmem:[#allocation138_spill] sm:$0xff] }
 0x1fc   :  { %26498 = vmatprep.mubr.f32.mxu0 %v34720_v15 }
 0x1ff   :  { %26499 = vmatmul.mubr.f32.gmra.mrb[52].mxu0 %v34721_v8 }
 0x200   :  { %26501 = vmatprep.mubr.f32.mxu0 %v34722_v18 }
 0x203   :  { %26502 = vmatmul.mubr.f32.gmra.mrb[54].mxu0 %v31368_v51 }
 0x204   :  { %26504 = vmatprep.mubr.f32.mxu0 %v31376_v56  ;;  %v34725_v56 = vld [vmem:[#allocation145_spill] sm:$0xff] }
 0x207   :  { %26505 = vmatmul.mubr.f32.gmra.mrb[56].mxu0 %v34723_v54  ;;  %v34726_v54 = vld [vmem:[#allocation148_spill] sm:$0xff] }
 0x208   :  { %26507 = vmatprep.mubr.f32.mxu0 %v31401_v55 }
 0x20b   :  { %26508 = vmatmul.mubr.f32.gmra.mrb[58].mxu0 %v31406_v25  ;;  %v34727_v25 = vld [vmem:[#allocation149_spill] sm:$0xff] }
 0x20c   :  { %26510 = vmatprep.mubr.f32.mxu0 %v31425_v28 }
 0x20f   :  { %26511 = vmatmul.mubr.f32.gmra.mrb[60].mxu0 %v31429_v3 }
 0x210   :  { %26513 = vmatprep.mubr.f32.mxu0 %v34724_v16 }
 0x213   :  { %26514 = vmatmul.mubr.f32.gmra.mrb[62].mxu0 %v31457_v2 }
 0x214   :  { %26516 = vmatprep.mubr.f32.mxu0 %v31462_v27  ;;  %v34728_v27 = vld [vmem:[#allocation158_spill] sm:$0xff] }
 0x217   :  { %26517 = vmatmul.mubr.f32.gmra.mrb[64].mxu0 %v31486_v57 }
 0x218   :  { %26519 = vmatprep.mubr.f32.mxu0 %v31497_v17 }
 0x21b   :  { %26520 = vmatmul.mubr.f32.gmra.mrb[66].mxu0 %v34725_v56 }
 0x21c   :  { %26522 = vmatprep.mubr.f32.mxu0 %v34726_v54 }
 0x21f   :  { %26523 = vmatmul.mubr.f32.gmra.mrb[68].mxu0 %v31531_v43 }
 0x220   :  { %26525 = vmatprep.mubr.f32.mxu0 %v34727_v25  ;;  %v34729_v25 = vand.u32 4294901760, %v34666_v45  ;;  %v34736_v45 = vand.u32 4294901760, %v34673_v35  ;;  %v34743_v35 = vand.u32 4294901760, %v34680_v14  ;;  %v34750_v14 = vand.u32 4294901760, %v34689_v24 }
 0x221   :  { %v34757_v24 = vand.u32 4294901760, %v34696_v21 }
 0x223   :  { %26526 = vmatmul.mubr.f32.gmra.mrb[70].mxu0 %v31559_v53  ;;  %v34730_v53 = vand.u32 4294901760, %v34667_v40  ;;  %v34737_v40 = vand.u32 4294901760, %v34674_v29  ;;  %v34760_v29 = vand.u32 4294901760, %v34699_v52  ;;  %v34773_v52 = vld [vmem:[#allocation93_spill] sm:$0xff] }
 0x224   :  { %26528 = vmatprep.mubr.f32.mxu0 %v31565_v42 }
 0x227   :  { %26529 = vmatmul.mubr.f32.gmra.mrb[72].mxu0 %v31585_v48  ;;  %v34731_v48 = vand.u32 4294901760, %v34668_v32  ;;  %v34741_v32 = vand.u32 4294901760, %v34678_v41  ;;  %v34748_v41 = vand.u32 4294901760, %v34685_v39  ;;  %v34755_v39 = vand.u32 4294901760, %v34694_v62 }
 0x228   :  { %26531 = vmatprep.mubr.f32.mxu0 %v31590_v4 }
 0x22b   :  { %26532 = vmatmul.mubr.f32.gmra.mrb[74].mxu0 %v34728_v27 }
 0x22c   :  { %26534 = vmatprep.mubr.f32.mxu0 %v31612_v31  ;;  %v34732_v31 = vand.u32 4294901760, %v34669_v22  ;;  %v34742_v22 = vand.u32 4294901760, %v34679_v37  ;;  %v34749_v37 = vand.u32 4294901760, %v34688_v59 }
 0x22f   :  { %26535 = vmatmul.mubr.f32.gmra.mrb[76].mxu0 %v31622_v23 }
 0x230   :  { %26537 = vmatprep.mubr.f32.mxu0 %v31631_v13  ;;  %v34733_v13 = vand.u32 4294901760, %v34670_v1  ;;  %v34740_v1 = vand.u32 4294901760, %v34677_v26  ;;  %v34747_v26 = vand.u32 4294901760, %v34684_v33  ;;  %v34754_v33 = vand.u32 4294901760, %v34693_v7  ;;  %v34765_v7 = vld [vmem:[#allocation87_spill] sm:$0xff] }
 0x233   :  { %26538 = vmatmul.mubr.f32.gmra.mrb[78].mxu0 %v31638_v61  ;;  %v34734_v61 = vand.u32 4294901760, %v34671_v46  ;;  %v34745_v46 = vand.u32 4294901760, %v34682_v38  ;;  %v34752_v38 = vand.u32 4294901760, %v34691_v49  ;;  %v34767_v49 = vld [vmem:[#allocation88_spill] sm:$0xff] }
 0x234   :  { %26544 = vmatprep.mubr.f32.mxu0 %v34729_v25  ;;  %v34735_v25 = vand.u32 4294901760, %v34672_v0  ;;  %v34756_v0 = vand.u32 4294901760, %v34695_v20  ;;  %v34768_v59 = vand.u32 4294901760, %v34767_v49  ;;  %v34769_v20 = vld [vmem:[#allocation90_spill] sm:$0xff] }
 0x235   :  { %v34770_v21 = vand.u32 4294901760, %v34769_v20  ;;  %v34828_v20 = vand.u32 4294901760, %v31622_v23  ;;  %v34838_v23 = vld [vmem:[#allocation25_spill] sm:$0xff] }
 0x237   :  { %26545 = vmatmul.mubr.f32.vlgmr.msra.gmra.mrb[0].mxu0 %v34730_v53  ;;  %v34739_v53 = vand.u32 4294901760, %v34676_v44  ;;  %v34746_v44 = vand.u32 4294901760, %v34683_v9  ;;  %v34753_v9 = vand.u32 4294901760, %v34692_v47  ;;  %v34766_v47 = vand.u32 4294901760, %v34765_v7  ;;  %v34819_v7 = vld [vmem:[#allocation152_spill] sm:$0xff] }
 0x238   :  { %26547 = vmatprep.mubr.f32.mxu0 %v34731_v48  ;;  %28611 = vmatpush3.bf16.msra.mxu0 %v31761_v36  ;;  %v34738_v36 = vand.u32 4294901760, %v34675_v30  ;;  %v34744_v48 = vand.u32 4294901760, %v34681_v50  ;;  %v34751_v50 = vand.u32 4294901760, %v34690_v63  ;;  %v34758_v63 = vand.u32 4294901760, %v34697_v34  ;;  %v34761_v30 = vld [vmem:[#allocation83_spill] sm:$0xff]  ;;  %v34771_v34 = vld [vmem:[#allocation92_spill] sm:$0xff] }
 0x239   :  { %28613 = vmatprep.subr.bf16.mxu0 %v34613_v10 }
 0x23b   :  { %26548 = vmatmul.mubr.f32.gmra.mrb[2].mxu0 %v34732_v31  ;;  %v34759_v31 = vand.u32 4294901760, %v34698_v5  ;;  %v34772_v5 = vand.u32 4294901760, %v34771_v34 }
 0x23c   :  { %26550 = vmatprep.mubr.f32.mxu0 %v34733_v13  ;;  %v34762_v13 = vand.u32 4294901760, %v34761_v30  ;;  %v34810_v30 = vld [vmem:[#allocation140_spill] sm:$0xff] }
 0x23f   :  { %26551 = vmatmul.mubr.f32.gmra.mrb[4].mxu0 %v34734_v61  ;;  %v34763_v61 = vld [vmem:[#allocation86_spill] sm:$0xff] }
 0x240   :  { %26553 = vmatprep.mubr.f32.mxu0 %v34735_v25  ;;  %v34764_v62 = vand.u32 4294901760, %v34763_v61  ;;  %v34774_v25 = vand.u32 4294901760, %v34773_v52  ;;  %v34813_v61 = vand.u32 4294901760, %v31497_v17  ;;  %v34822_v17 = vld [vmem:[#allocation155_spill] sm:$0xff] }
 0x241   :  { %v34823_v49 = vand.u32 4294901760, %v34822_v17  ;;  %v34833_v52 = vld [vmem:[#allocation15_spill] sm:$0xff]  ;;  %v34886_v17 = vld [vmem:[#allocation121_spill] sm:$0xff] }
 0x243   :  { %26554 = vmatmul.mubr.f32.gmra.mrb[6].mxu0 %v34736_v45  ;;  %v34775_v45 = vld [vmem:[#allocation96_spill] sm:$0xff] }
 0x244   :  { %26556 = vmatprep.mubr.f32.mxu0 %v34737_v40  ;;  %v34776_v40 = vand.u32 4294901760, %v34775_v45  ;;  %v34837_v45 = vld [vmem:[#allocation24_spill] sm:$0xff] }
 0x247   :  { %26557 = vmatmul.mubr.f32.gmra.mrb[8].mxu0 %v34738_v36  ;;  %v34777_v36 = vld [vmem:[#allocation99_spill] sm:$0xff] }
 0x248   :  { %26559 = vmatprep.mubr.f32.mxu0 %v34739_v53  ;;  %v34778_v53 = vand.u32 4294901760, %v34777_v36  ;;  %v34840_v36 = vld [vmem:[#allocation29_spill] sm:$0xff] }
 0x24b   :  { %26560 = vmatmul.mubr.f32.gmra.mrb[10].mxu0 %v34740_v1  ;;  %v34779_v1 = vld [vmem:[#allocation101_spill] sm:$0xff] }
 0x24c   :  { %26562 = vmatprep.mubr.f32.mxu0 %v34741_v32  ;;  %v34780_v32 = vand.u32 4294901760, %v34779_v1  ;;  %v34842_v1 = vld [vmem:[#allocation33_spill] sm:$0xff] }
 0x24f   :  { %26563 = vmatmul.mubr.f32.gmra.mrb[12].mxu0 %v34742_v22  ;;  %v34781_v22 = vld [vmem:[#allocation102_spill] sm:$0xff] }
 0x250   :  { %26565 = vmatprep.mubr.f32.mxu0 %v34743_v35  ;;  %v34782_v35 = vand.u32 4294901760, %v34781_v22  ;;  %v34844_v22 = vld [vmem:[#allocation35_spill] sm:$0xff] }
 0x253   :  { %26566 = vmatmul.mubr.f32.gmra.mrb[14].mxu0 %v34744_v48  ;;  %v34783_v48 = vld [vmem:[#allocation104_spill] sm:$0xff] }
 0x254   :  { %26568 = vmatprep.mubr.f32.mxu0 %v34745_v46  ;;  %v34784_v46 = vand.u32 4294901760, %v34783_v48  ;;  %v34847_v48 = vld [vmem:[#allocation44_spill] sm:$0xff] }
 0x257   :  { %26569 = vmatmul.mubr.f32.gmra.mrb[16].mxu0 %v34746_v44  ;;  %v34785_v44 = vand.u32 4294901760, %v34712_v11  ;;  %v34793_v11 = vld [vmem:[#allocation120_spill] sm:$0xff] }
 0x258   :  { %26571 = vmatprep.mubr.f32.mxu0 %v34747_v26  ;;  %v34786_v26 = vand.u32 4294901760, %v34713_v6  ;;  %v34795_v6 = vand.u32 4294901760, %v34720_v15  ;;  %v34804_v15 = vld [vmem:[#allocation134_spill] sm:$0xff] }
 0x25b   :  { %26572 = vmatmul.mubr.f32.gmra.mrb[18].mxu0 %v34748_v41  ;;  %v34787_v41 = vld [vmem:[#allocation110_spill] sm:$0xff] }
 0x25c   :  { %26574 = vmatprep.mubr.f32.mxu0 %v34749_v37  ;;  %v34788_v37 = vand.u32 4294901760, %v34787_v41  ;;  %v34851_v41 = vld [vmem:[#allocation50_spill] sm:$0xff] }
 0x25f   :  { %26575 = vmatmul.mubr.f32.gmra.mrb[20].mxu0 %v34750_v14  ;;  %v34789_v14 = vand.u32 4294901760, %v34715_v58  ;;  %v34797_v58 = vand.u32 4294901760, %v34722_v18  ;;  %v34807_v18 = vand.u32 4294901760, %v31429_v3  ;;  %v34815_v3 = vand.u32 4294901760, %v34726_v54 }
 0x260   :  { %26577 = vmatprep.mubr.f32.mxu0 %v34751_v50  ;;  %v34790_v50 = vand.u32 4294901760, %v34716_v19  ;;  %v34798_v19 = vand.u32 4294901760, %v31368_v51  ;;  %v34808_v51 = vand.u32 4294901760, %v34724_v16  ;;  %v34816_v16 = vand.u32 4294901760, %v31531_v43  ;;  %v34826_v43 = vld [vmem:[#allocation160_spill] sm:$0xff] }
 0x261   :  { %v34825_v54 = vand.u32 4294901760, %v34728_v27  ;;  %v34836_v27 = vld [vmem:[#allocation20_spill] sm:$0xff] }
 0x263   :  { %26578 = vmatmul.mubr.f32.gmra.mrb[22].mxu0 %v34752_v38  ;;  %v34791_v38 = vand.u32 4294901760, %v34717_v60  ;;  %v34799_v60 = vld [vmem:[#allocation129_spill] sm:$0xff] }
 0x264   :  { %26580 = vmatprep.mubr.f32.mxu0 %v34753_v9  ;;  %v34792_v9 = vand.u32 4294901760, %v34718_v12  ;;  %v34801_v12 = vld [vmem:[#allocation132_spill] sm:$0xff] }
 0x267   :  { %26581 = vmatmul.mubr.f32.gmra.mrb[24].mxu0 %v34754_v33  ;;  %v34794_v33 = vand.u32 4294901760, %v34793_v11  ;;  %v34857_v11 = vld [vmem:[#allocation64_spill] sm:$0xff] }
 0x268   :  { %26583 = vmatprep.mubr.f32.mxu0 %v34755_v39  ;;  %v34796_v39 = vand.u32 4294901760, %v34721_v8  ;;  %v34806_v8 = vand.u32 4294901760, %v31425_v28  ;;  %v34814_v28 = vand.u32 4294901760, %v34725_v56  ;;  %v34824_v56 = vand.u32 4294901760, %v31590_v4  ;;  %v34835_v4 = vld [vmem:[#allocation18_spill] sm:$0xff] }
 0x26b   :  { %26584 = vmatmul.mubr.f32.gmra.mrb[26].mxu0 %v34756_v0  ;;  %v34800_v0 = vand.u32 4294901760, %v34799_v60  ;;  %v34863_v60 = vld [vmem:[#allocation75_spill] sm:$0xff] }
 0x26c   :  { %26586 = vmatprep.mubr.f32.mxu0 %v34757_v24  ;;  %v34802_v24 = vand.u32 4294901760, %v34801_v12  ;;  %v34865_v12 = vld [vmem:[#allocation79_spill] sm:$0xff] }
 0x26f   :  { %26587 = vmatmul.mubr.f32.gmra.mrb[28].mxu0 %v34758_v63  ;;  %v34803_v63 = vand.u32 4294901760, %v31401_v55  ;;  %v34812_v55 = vand.u32 4294901760, %v31486_v57  ;;  %v34821_v57 = vand.u32 4294901760, %v31565_v42  ;;  %v34831_v42 = vld [vmem:[#allocation164_spill] sm:$0xff] }
 0x270   :  { %26589 = vmatprep.mubr.f32.mxu0 %v34759_v31  ;;  %v34805_v31 = vand.u32 4294901760, %v34804_v15  ;;  %v34868_v15 = vld [vmem:[#allocation84_spill] sm:$0xff] }
 0x273   :  { %26590 = vmatmul.mubr.f32.gmra.mrb[30].mxu0 %v34760_v29  ;;  %v34809_v29 = vand.u32 4294901760, %v31457_v2  ;;  %v34817_v2 = vld [vmem:[#allocation149_spill] sm:$0xff] }
 0x274   :  { %26592 = vmatprep.mubr.f32.mxu0 %v34762_v13  ;;  %v34811_v13 = vand.u32 4294901760, %v34810_v30  ;;  %v34874_v30 = vld [vmem:[#allocation97_spill] sm:$0xff] }
 0x277   :  { %26593 = vmatmul.mubr.f32.gmra.mrb[32].mxu0 %v34764_v62  ;;  %v34818_v62 = vand.u32 4294901760, %v34817_v2  ;;  %v34881_v2 = vld [vmem:[#allocation111_spill] sm:$0xff] }
 0x278   :  { %26595 = vmatprep.mubr.f32.mxu0 %v34766_v47  ;;  %v34820_v47 = vand.u32 4294901760, %v34819_v7  ;;  %v34883_v7 = vld [vmem:[#allocation115_spill] sm:$0xff] }
 0x27b   :  { %26596 = vmatmul.mubr.f32.gmra.mrb[34].mxu0 %v34768_v59  ;;  %v34827_v59 = vand.u32 4294901760, %v34826_v43  ;;  %v34890_v43 = vld [vmem:[#allocation128_spill] sm:$0xff] }
 0x27c   :  { %26598 = vmatprep.mubr.f32.mxu0 %v34770_v21  ;;  %v34829_v21 = vld [vmem:[#allocation163_spill] sm:$0xff] }
 0x27d   :  { %v34830_v34 = vand.u32 4294901760, %v34829_v21  ;;  %v34893_v21 = vld [vmem:[#allocation133_spill] sm:$0xff] }
 0x27f   :  { %26599 = vmatmul.mubr.f32.gmra.mrb[36].mxu0 %v34772_v5  ;;  %v34832_v5 = vand.u32 4294901760, %v34831_v42  ;;  %v34895_v42 = vld [vmem:[#allocation136_spill] sm:$0xff] }
 0x280   :  { %26601 = vmatprep.mubr.f32.mxu0 %v34774_v25  ;;  %v34834_v25 = vld [vmem:[#allocation17_spill] sm:$0xff] }
 0x283   :  { %26602 = vmatmul.mubr.f32.gmra.mrb[38].mxu0 %v34776_v40  ;;  %v34839_v40 = vld [vmem:[#allocation28_spill] sm:$0xff] }
 0x284   :  { %26604 = vmatprep.mubr.f32.mxu0 %v34778_v53  ;;  %v34841_v53 = vld [vmem:[#allocation32_spill] sm:$0xff] }
 0x287   :  { %26605 = vmatmul.mubr.f32.gmra.mrb[40].mxu0 %v34780_v32  ;;  %v34843_v32 = vld [vmem:[#allocation34_spill] sm:$0xff] }
 0x288   :  { %26607 = vmatprep.mubr.f32.mxu0 %v34782_v35  ;;  %v34845_v35 = vld [vmem:[#allocation40_spill] sm:$0xff] }
 0x28b   :  { %26608 = vmatmul.mubr.f32.gmra.mrb[42].mxu0 %v34784_v46  ;;  %v34848_v46 = vld [vmem:[#allocation45_spill] sm:$0xff] }
 0x28c   :  { %26610 = vmatprep.mubr.f32.mxu0 %v34785_v44  ;;  %v34849_v44 = vld [vmem:[#allocation48_spill] sm:$0xff] }
 0x28f   :  { %26611 = vmatmul.mubr.f32.gmra.mrb[44].mxu0 %v34786_v26  ;;  %v34850_v26 = vld [vmem:[#allocation49_spill] sm:$0xff] }
 0x290   :  { %26613 = vmatprep.mubr.f32.mxu0 %v34788_v37  ;;  %v34852_v37 = vld [vmem:[#allocation51_spill] sm:$0xff] }
 0x293   :  { %26614 = vmatmul.mubr.f32.gmra.mrb[46].mxu0 %v34789_v14  ;;  %v34853_v14 = vld [vmem:[#allocation55_spill] sm:$0xff] }
 0x294   :  { %26616 = vmatprep.mubr.f32.mxu0 %v34790_v50  ;;  %v34854_v50 = vld [vmem:[#allocation56_spill] sm:$0xff] }
 0x297   :  { %26617 = vmatmul.mubr.f32.gmra.mrb[48].mxu0 %v34791_v38  ;;  %v34855_v38 = vld [vmem:[#allocation60_spill] sm:$0xff] }
 0x298   :  { %26619 = vmatprep.mubr.f32.mxu0 %v34792_v9  ;;  %v34856_v9 = vld [vmem:[#allocation61_spill] sm:$0xff] }
 0x29b   :  { %26620 = vmatmul.mubr.f32.gmra.mrb[50].mxu0 %v34794_v33  ;;  %v34858_v33 = vld [vmem:[#allocation65_spill] sm:$0xff] }
 0x29c   :  { %26622 = vmatprep.mubr.f32.mxu0 %v34795_v6  ;;  %v34859_v6 = vld [vmem:[#allocation66_spill] sm:$0xff] }
 0x29f   :  { %26623 = vmatmul.mubr.f32.gmra.mrb[52].mxu0 %v34796_v39  ;;  %v34860_v39 = vld [vmem:[#allocation68_spill] sm:$0xff] }
 0x2a0   :  { %26625 = vmatprep.mubr.f32.mxu0 %v34797_v58  ;;  %v34861_v58 = vld [vmem:[#allocation71_spill] sm:$0xff] }
 0x2a3   :  { %26626 = vmatmul.mubr.f32.gmra.mrb[54].mxu0 %v34798_v19  ;;  %v34862_v19 = vld [vmem:[#allocation73_spill] sm:$0xff] }
 0x2a4   :  { %26628 = vmatprep.mubr.f32.mxu0 %v34800_v0  ;;  %v34864_v0 = vld [vmem:[#allocation77_spill] sm:$0xff] }
 0x2a7   :  { %26629 = vmatmul.mubr.f32.gmra.mrb[56].mxu0 %v34802_v24  ;;  %v34866_v24 = vld [vmem:[#allocation81_spill] sm:$0xff] }
 0x2a8   :  { %26631 = vmatprep.mubr.f32.mxu0 %v34803_v63  ;;  %v34867_v63 = vld [vmem:[#allocation82_spill] sm:$0xff] }
 0x2ab   :  { %26632 = vmatmul.mubr.f32.gmra.mrb[58].mxu0 %v34805_v31  ;;  %v34869_v31 = vld [vmem:[#allocation85_spill] sm:$0xff] }
 0x2ac   :  { %26634 = vmatprep.mubr.f32.mxu0 %v34806_v8  ;;  %v34870_v8 = vld [vmem:[#allocation89_spill] sm:$0xff] }
 0x2af   :  { %26635 = vmatmul.mubr.f32.gmra.mrb[60].mxu0 %v34807_v18  ;;  %v34871_v18 = vld [vmem:[#allocation91_spill] sm:$0xff] }
 0x2b0   :  { %26637 = vmatprep.mubr.f32.mxu0 %v34808_v51  ;;  %v34872_v51 = vld [vmem:[#allocation94_spill] sm:$0xff] }
 0x2b3   :  { %26638 = vmatmul.mubr.f32.gmra.mrb[62].mxu0 %v34809_v29  ;;  %v34873_v29 = vld [vmem:[#allocation95_spill] sm:$0xff] }
 0x2b4   :  { %26640 = vmatprep.mubr.f32.mxu0 %v34811_v13  ;;  %v34875_v13 = vld [vmem:[#allocation98_spill] sm:$0xff] }
 0x2b7   :  { %26641 = vmatmul.mubr.f32.gmra.mrb[64].mxu0 %v34812_v55  ;;  %v34876_v55 = vld [vmem:[#allocation100_spill] sm:$0xff] }
 0x2b8   :  { %26643 = vmatprep.mubr.f32.mxu0 %v34813_v61  ;;  %v34877_v61 = vld [vmem:[#allocation103_spill] sm:$0xff] }
 0x2bb   :  { %26644 = vmatmul.mubr.f32.gmra.mrb[66].mxu0 %v34814_v28  ;;  %v34878_v28 = vld [vmem:[#allocation105_spill] sm:$0xff] }
 0x2bc   :  { %26646 = vmatprep.mubr.f32.mxu0 %v34815_v3  ;;  %v34879_v3 = vld [vmem:[#allocation106_spill] sm:$0xff] }
 0x2bf   :  { %26647 = vmatmul.mubr.f32.gmra.mrb[68].mxu0 %v34816_v16  ;;  %v34880_v16 = vld [vmem:[#allocation109_spill] sm:$0xff] }
 0x2c0   :  { %26649 = vmatprep.mubr.f32.mxu0 %v34818_v62  ;;  %v34882_v62 = vld [vmem:[#allocation113_spill] sm:$0xff] }
 0x2c3   :  { %26650 = vmatmul.mubr.f32.gmra.mrb[70].mxu0 %v34820_v47  ;;  %v34884_v47 = vld [vmem:[#allocation116_spill] sm:$0xff] }
 0x2c4   :  { %26652 = vmatprep.mubr.f32.mxu0 %v34821_v57  ;;  %v34885_v57 = vld [vmem:[#allocation118_spill] sm:$0xff] }
 0x2c7   :  { %26653 = vmatmul.mubr.f32.gmra.mrb[72].mxu0 %v34823_v49  ;;  %v34887_v49 = vld [vmem:[#allocation123_spill] sm:$0xff] }
 0x2c8   :  { %26655 = vmatprep.mubr.f32.mxu0 %v34824_v56  ;;  %v34888_v56 = vld [vmem:[#allocation125_spill] sm:$0xff] }
 0x2cb   :  { %26656 = vmatmul.mubr.f32.gmra.mrb[74].mxu0 %v34825_v54  ;;  %v34889_v54 = vld [vmem:[#allocation127_spill] sm:$0xff] }
 0x2cc   :  { %26658 = vmatprep.mubr.f32.mxu0 %v34827_v59  ;;  %v34891_v59 = vld [vmem:[#allocation130_spill] sm:$0xff] }
 0x2cf   :  { %26659 = vmatmul.mubr.f32.gmra.mrb[76].mxu0 %v34828_v20  ;;  %v34892_v20 = vld [vmem:[#allocation131_spill] sm:$0xff] }
 0x2d0   :  { %26661 = vmatprep.mubr.f32.mxu0 %v34830_v34  ;;  %v34894_v34 = vld [vmem:[#allocation135_spill] sm:$0xff] }
 0x2d3   :  { %26662 = vmatmul.mubr.f32.gmra.mrb[78].mxu0 %v34832_v5  ;;  %v34896_v5 = vld [vmem:[#allocation137_spill] sm:$0xff] }
 0x2d4   :  { %26668 = vmatprep.mubr.f32.mxu0 %v34833_v52 }
 0x2d7   :  { %26669 = vmatmul.mubr.f32.vlgmr.msra.gmra.mrb[0].mxu0 %v34834_v25 }
 0x2d8   :  { %26671 = vmatprep.mubr.f32.mxu0 %v34835_v4  ;;  %28615 = vmatpush3.bf16.msra.mxu0 %v34613_v10  ;;  %v34846_v10 = vld [vmem:[#allocation41_spill] sm:$0xff] }
 0x2db   :  { %26672 = vmatmul.mubr.f32.gmra.mrb[2].mxu0 %v34836_v27 }
 0x2dc   :  { %26674 = vmatprep.mubr.f32.mxu0 %v34837_v45 }
 0x2df   :  { %26675 = vmatmul.mubr.f32.gmra.mrb[4].mxu0 %v34838_v23 }
 0x2e0   :  { %26677 = vmatprep.mubr.f32.mxu0 %v34839_v40 }
 0x2e3   :  { %26678 = vmatmul.mubr.f32.gmra.mrb[6].mxu0 %v34840_v36 }
 0x2e4   :  { %26680 = vmatprep.mubr.f32.mxu0 %v34841_v53 }
 0x2e7   :  { %26681 = vmatmul.mubr.f32.gmra.mrb[8].mxu0 %v34842_v1 }
 0x2e8   :  { %26683 = vmatprep.mubr.f32.mxu0 %v34843_v32 }
 0x2eb   :  { %26684 = vmatmul.mubr.f32.gmra.mrb[10].mxu0 %v34844_v22 }
 0x2ec   :  { %26686 = vmatprep.mubr.f32.mxu0 %v34845_v35 }
 0x2ef   :  { %26687 = vmatmul.mubr.f32.gmra.mrb[12].mxu0 %v34846_v10 }
 0x2f0   :  { %26689 = vmatprep.mubr.f32.mxu0 %v34847_v48 }
 0x2f3   :  { %26690 = vmatmul.mubr.f32.gmra.mrb[14].mxu0 %v34848_v46 }
 0x2f4   :  { %26692 = vmatprep.mubr.f32.mxu0 %v34849_v44 }
 0x2f7   :  { %26693 = vmatmul.mubr.f32.gmra.mrb[16].mxu0 %v34850_v26 }
 0x2f8   :  { %26695 = vmatprep.mubr.f32.mxu0 %v34851_v41 }
 0x2fb   :  { %26696 = vmatmul.mubr.f32.gmra.mrb[18].mxu0 %v34852_v37 }
 0x2fc   :  { %26698 = vmatprep.mubr.f32.mxu0 %v34853_v14 }
 0x2ff   :  { %26699 = vmatmul.mubr.f32.gmra.mrb[20].mxu0 %v34854_v50 }
 0x300   :  { %26701 = vmatprep.mubr.f32.mxu0 %v34855_v38 }
 0x303   :  { %26702 = vmatmul.mubr.f32.gmra.mrb[22].mxu0 %v34856_v9 }
 0x304   :  { %26704 = vmatprep.mubr.f32.mxu0 %v34857_v11 }
 0x307   :  { %26705 = vmatmul.mubr.f32.gmra.mrb[24].mxu0 %v34858_v33 }
 0x308   :  { %26707 = vmatprep.mubr.f32.mxu0 %v34859_v6 }
 0x30b   :  { %26708 = vmatmul.mubr.f32.gmra.mrb[26].mxu0 %v34860_v39 }
 0x30c   :  { %26710 = vmatprep.mubr.f32.mxu0 %v34861_v58 }
 0x30f   :  { %26711 = vmatmul.mubr.f32.gmra.mrb[28].mxu0 %v34862_v19 }
 0x310   :  { %26713 = vmatprep.mubr.f32.mxu0 %v34863_v60 }
 0x313   :  { %26714 = vmatmul.mubr.f32.gmra.mrb[30].mxu0 %v34864_v0 }
 0x314   :  { %26716 = vmatprep.mubr.f32.mxu0 %v34865_v12 }
 0x317   :  { %26717 = vmatmul.mubr.f32.gmra.mrb[32].mxu0 %v34866_v24 }
 0x318   :  { %26719 = vmatprep.mubr.f32.mxu0 %v34867_v63 }
 0x31b   :  { %26720 = vmatmul.mubr.f32.gmra.mrb[34].mxu0 %v34868_v15 }
 0x31c   :  { %26722 = vmatprep.mubr.f32.mxu0 %v34869_v31 }
 0x31f   :  { %26723 = vmatmul.mubr.f32.gmra.mrb[36].mxu0 %v34870_v8 }
 0x320   :  { %26725 = vmatprep.mubr.f32.mxu0 %v34871_v18 }
 0x323   :  { %26726 = vmatmul.mubr.f32.gmra.mrb[38].mxu0 %v34872_v51 }
 0x324   :  { %26728 = vmatprep.mubr.f32.mxu0 %v34873_v29 }
 0x327   :  { %26729 = vmatmul.mubr.f32.gmra.mrb[40].mxu0 %v34874_v30 }
 0x328   :  { %26731 = vmatprep.mubr.f32.mxu0 %v34875_v13 }
 0x32b   :  { %26732 = vmatmul.mubr.f32.gmra.mrb[42].mxu0 %v34876_v55 }
 0x32c   :  { %26734 = vmatprep.mubr.f32.mxu0 %v34877_v61 }
 0x32f   :  { %26735 = vmatmul.mubr.f32.gmra.mrb[44].mxu0 %v34878_v28 }
 0x330   :  { %26737 = vmatprep.mubr.f32.mxu0 %v34879_v3 }
 0x333   :  { %26738 = vmatmul.mubr.f32.gmra.mrb[46].mxu0 %v34880_v16 }
 0x334   :  { %26740 = vmatprep.mubr.f32.mxu0 %v34881_v2 }
 0x337   :  { %26741 = vmatmul.mubr.f32.gmra.mrb[48].mxu0 %v34882_v62 }
 0x338   :  { %26743 = vmatprep.mubr.f32.mxu0 %v34883_v7 }
 0x33b   :  { %26744 = vmatmul.mubr.f32.gmra.mrb[50].mxu0 %v34884_v47 }
 0x33c   :  { %26746 = vmatprep.mubr.f32.mxu0 %v34885_v57 }
 0x33f   :  { %26747 = vmatmul.mubr.f32.gmra.mrb[52].mxu0 %v34886_v17  ;;  %v34897_v17 = vld [vmem:[#allocation139_spill] sm:$0xff] }
 0x340   :  { %26749 = vmatprep.mubr.f32.mxu0 %v34887_v49  ;;  %v34898_v49 = vld [vmem:[#allocation141_spill] sm:$0xff] }
 0x343   :  { %26750 = vmatmul.mubr.f32.gmra.mrb[54].mxu0 %v34888_v56  ;;  %v34899_v56 = vld [vmem:[#allocation142_spill] sm:$0xff] }
 0x344   :  { %26752 = vmatprep.mubr.f32.mxu0 %v34889_v54  ;;  %v34900_v54 = vld [vmem:[#allocation143_spill] sm:$0xff] }
 0x347   :  { %26753 = vmatmul.mubr.f32.gmra.mrb[56].mxu0 %v34890_v43  ;;  %v34901_v43 = vld [vmem:[#allocation144_spill] sm:$0xff] }
 0x348   :  { %26755 = vmatprep.mubr.f32.mxu0 %v34891_v59  ;;  %v34902_v59 = vld [vmem:[#allocation146_spill] sm:$0xff] }
 0x34b   :  { %26756 = vmatmul.mubr.f32.gmra.mrb[58].mxu0 %v34892_v20  ;;  %v34903_v20 = vld [vmem:[#allocation147_spill] sm:$0xff] }
 0x34c   :  { %26758 = vmatprep.mubr.f32.mxu0 %v34893_v21  ;;  %v34904_v21 = vld [vmem:[#allocation150_spill] sm:$0xff] }
 0x34f   :  { %26759 = vmatmul.mubr.f32.gmra.mrb[60].mxu0 %v34894_v34  ;;  %v34905_v34 = vld [vmem:[#allocation151_spill] sm:$0xff] }
 0x350   :  { %26761 = vmatprep.mubr.f32.mxu0 %v34895_v42  ;;  %v34906_v42 = vld [vmem:[#allocation153_spill] sm:$0xff] }
 0x353   :  { %26762 = vmatmul.mubr.f32.gmra.mrb[62].mxu0 %v34896_v5  ;;  %v34907_v5 = vld [vmem:[#allocation154_spill] sm:$0xff] }
 0x354   :  { %26764 = vmatprep.mubr.f32.mxu0 %v34897_v17  ;;  %v34908_v17 = vld [vmem:[#allocation156_spill] sm:$0xff] }
 0x357   :  { %26765 = vmatmul.mubr.f32.gmra.mrb[64].mxu0 %v34898_v49  ;;  %v34909_v49 = vld [vmem:[#allocation157_spill] sm:$0xff] }
 0x358   :  { %26767 = vmatprep.mubr.f32.mxu0 %v34899_v56  ;;  %v34910_v56 = vld [vmem:[#allocation159_spill] sm:$0xff] }
 0x35b   :  { %26768 = vmatmul.mubr.f32.gmra.mrb[66].mxu0 %v34900_v54  ;;  %v34911_v54 = vld [vmem:[#allocation161_spill] sm:$0xff] }
 0x35c   :  { %26770 = vmatprep.mubr.f32.mxu0 %v34901_v43  ;;  %v34912_v43 = vld [vmem:[#allocation162_spill] sm:$0xff] }
 0x35f   :  { %26771 = vmatmul.mubr.f32.gmra.mrb[68].mxu0 %v34902_v59 }
 0x360   :  { %26773 = vmatprep.mubr.f32.mxu0 %v34903_v20 }
 0x363   :  { %26774 = vmatmul.mubr.f32.gmra.mrb[70].mxu0 %v34904_v21 }
 0x364   :  { %26776 = vmatprep.mubr.f32.mxu0 %v34905_v34 }
 0x367   :  { %26777 = vmatmul.mubr.f32.gmra.mrb[72].mxu0 %v34906_v42 }
 0x368   :  { %26779 = vmatprep.mubr.f32.mxu0 %v34907_v5 }
 0x36b   :  { %26780 = vmatmul.mubr.f32.gmra.mrb[74].mxu0 %v34908_v17 }
 0x36c   :  { %26782 = vmatprep.mubr.f32.mxu0 %v34909_v49 }
 0x36f   :  { %26783 = vmatmul.mubr.f32.gmra.mrb[76].mxu0 %v34910_v56 }
 0x370   :  { %26785 = vmatprep.mubr.f32.mxu0 %v34911_v54 }
 0x373   :  { %26786 = vmatmul.mubr.f32.gmra.mrb[78].mxu0 %v34912_v43 }
 0x374   :  { %26792 = vmatprep.mubr.f32.mxu0 %v34833_v52  ;;  %v4252_v52 = vld [vmem:[#allocation2] sm:$0xff] }
 0x377   :  { %26793 = vmatmul.mubr.f32.vlgmr.msra.gmra.mrb[0].mxu0 %v34834_v25  ;;  %v4255_v25 = vsel %vm155_vm0, %v4252_v52, 0 }
 0x378   :  { %26795 = vmatprep.mubr.f32.mxu0 %v34835_v4  ;;  %v32111_v4 = vand.u32 4294901760, %v4255_v25 }
 0x37b   :  { %26796 = vmatmul.mubr.f32.gmra.mrb[2].mxu0 %v34836_v27  ;;  %v32115_v27 = vsub.f32 %v4255_v25, %v32111_v4 }
 0x37c   :  { %26798 = vmatprep.mubr.f32.mxu0 %v34837_v45 }
 0x37d   :  { %v32119_v45 = vand.u32 4294901760, %v32115_v27 }
 0x37f   :  { %26799 = vmatmul.mubr.f32.gmra.mrb[4].mxu0 %v34838_v23  ;;  %v4330_v23 = vsub.f32 %v32115_v27, %v32119_v45 }
 0x380   :  { %26801 = vmatprep.mubr.f32.mxu0 %v34839_v40 }
 0x381   :  { %v32125_v40 = vand.u32 4294901760, %v4330_v23 }
 0x383   :  { %26802 = vmatmul.mubr.f32.gmra.mrb[6].mxu0 %v34840_v36  ;;  %26916 = vmatprep.mubr.f32.mxu1 %v32125_v40  ;;  %v34913_v36 = vld [vmem:[#allocation121_spill] sm:$0xff] }
 0x384   :  { %26804 = vmatprep.mubr.f32.mxu0 %v34841_v53  ;;  %v34914_v53 = vld [vmem:[#allocation123_spill] sm:$0xff] }
 0x387   :  { %26805 = vmatmul.mubr.f32.gmra.mrb[8].mxu0 %v34842_v1  ;;  %v34915_v1 = vld [vmem:[#allocation125_spill] sm:$0xff] }
 0x388   :  { %26807 = vmatprep.mubr.f32.mxu0 %v34843_v32  ;;  %v34916_v32 = vld [vmem:[#allocation127_spill] sm:$0xff] }
 0x38b   :  { %26808 = vmatmul.mubr.f32.gmra.mrb[10].mxu0 %v34844_v22  ;;  %v34917_v22 = vld [vmem:[#allocation128_spill] sm:$0xff] }
 0x38c   :  { %26810 = vmatprep.mubr.f32.mxu0 %v34845_v35  ;;  %v34918_v35 = vld [vmem:[#allocation130_spill] sm:$0xff] }
 0x38f   :  { %26811 = vmatmul.mubr.f32.gmra.mrb[12].mxu0 %v34846_v10  ;;  %v34919_v10 = vld [vmem:[#allocation131_spill] sm:$0xff] }
 0x390   :  { %26813 = vmatprep.mubr.f32.mxu0 %v34847_v48  ;;  %v34920_v48 = vld [vmem:[#allocation133_spill] sm:$0xff] }
 0x393   :  { %26814 = vmatmul.mubr.f32.gmra.mrb[14].mxu0 %v34848_v46  ;;  %v34921_v46 = vld [vmem:[#allocation135_spill] sm:$0xff] }
 0x394   :  { %26816 = vmatprep.mubr.f32.mxu0 %v34849_v44  ;;  %v34922_v44 = vld [vmem:[#allocation136_spill] sm:$0xff] }
 0x397   :  { %26817 = vmatmul.mubr.f32.gmra.mrb[16].mxu0 %v34850_v26  ;;  %v34923_v26 = vld [vmem:[#allocation137_spill] sm:$0xff] }
 0x398   :  { %26819 = vmatprep.mubr.f32.mxu0 %v34851_v41  ;;  %v34924_v41 = vld [vmem:[#allocation139_spill] sm:$0xff] }
 0x39b   :  { %26820 = vmatmul.mubr.f32.gmra.mrb[18].mxu0 %v34852_v37  ;;  %v34925_v37 = vld [vmem:[#allocation141_spill] sm:$0xff] }
 0x39c   :  { %26822 = vmatprep.mubr.f32.mxu0 %v34853_v14  ;;  %v34926_v14 = vld [vmem:[#allocation142_spill] sm:$0xff] }
 0x39f   :  { %26823 = vmatmul.mubr.f32.gmra.mrb[20].mxu0 %v34854_v50  ;;  %v34927_v50 = vld [vmem:[#allocation143_spill] sm:$0xff] }
 0x3a0   :  { %26825 = vmatprep.mubr.f32.mxu0 %v34855_v38  ;;  %v34928_v38 = vld [vmem:[#allocation144_spill] sm:$0xff] }
 0x3a3   :  { %26826 = vmatmul.mubr.f32.gmra.mrb[22].mxu0 %v34856_v9  ;;  %v4253_v9 = vld [vmem:[#allocation2 + $0x8] sm:$0xff] }
 0x3a4   :  { %26828 = vmatprep.mubr.f32.mxu0 %v34857_v11  ;;  %v4258_v11 = vsel %vm155_vm0, %v4253_v9, 0 }
 0x3a7   :  { %26829 = vmatmul.mubr.f32.gmra.mrb[24].mxu0 %v34858_v33  ;;  %v32162_v33 = vand.u32 4294901760, %v4258_v11 }
 0x3a8   :  { %26831 = vmatprep.mubr.f32.mxu0 %v34859_v6 }
 0x3a9   :  { %v32165_v6 = vsub.f32 %v4258_v11, %v32162_v33 }
 0x3ab   :  { %26832 = vmatmul.mubr.f32.gmra.mrb[26].mxu0 %v34860_v39  ;;  %v32168_v39 = vand.u32 4294901760, %v32165_v6 }
 0x3ac   :  { %26834 = vmatprep.mubr.f32.mxu0 %v34861_v58 }
 0x3af   :  { %26835 = vmatmul.mubr.f32.gmra.mrb[28].mxu0 %v34862_v19 }
 0x3b0   :  { %26837 = vmatprep.mubr.f32.mxu0 %v34863_v60 }
 0x3b3   :  { %26838 = vmatmul.mubr.f32.gmra.mrb[30].mxu0 %v34864_v0 }
 0x3b4   :  { %26840 = vmatprep.mubr.f32.mxu0 %v34865_v12  ;;  %v4340_v12 = vsub.f32 %v32165_v6, %v32168_v39 }
 0x3b7   :  { %26841 = vmatmul.mubr.f32.gmra.mrb[32].mxu0 %v34866_v24 }
 0x3b8   :  { %26843 = vmatprep.mubr.f32.mxu0 %v34867_v63 }
 0x3bb   :  { %26844 = vmatmul.mubr.f32.gmra.mrb[34].mxu0 %v34868_v15 }
 0x3bc   :  { %26846 = vmatprep.mubr.f32.mxu0 %v34869_v31 }
 0x3bf   :  { %26847 = vmatmul.mubr.f32.gmra.mrb[36].mxu0 %v34870_v8 }
 0x3c0   :  { %26849 = vmatprep.mubr.f32.mxu0 %v34871_v18 }
 0x3c3   :  { %26850 = vmatmul.mubr.f32.gmra.mrb[38].mxu0 %v34872_v51 }
 0x3c4   :  { %26852 = vmatprep.mubr.f32.mxu0 %v34873_v29 }
 0x3c7   :  { %26853 = vmatmul.mubr.f32.gmra.mrb[40].mxu0 %v34874_v30 }
 0x3c8   :  { %26855 = vmatprep.mubr.f32.mxu0 %v34875_v13  ;;  %v32175_v13 = vand.u32 4294901760, %v4340_v12 }
 0x3cb   :  { %26856 = vmatmul.mubr.f32.gmra.mrb[42].mxu0 %v34876_v55 }
 0x3cc   :  { %26858 = vmatprep.mubr.f32.mxu0 %v34877_v61 }
 0x3cf   :  { %26859 = vmatmul.mubr.f32.gmra.mrb[44].mxu0 %v34878_v28 }
 0x3d0   :  { %26861 = vmatprep.mubr.f32.mxu0 %v34879_v3 }
 0x3d3   :  { %26862 = vmatmul.mubr.f32.gmra.mrb[46].mxu0 %v34880_v16 }
 0x3d4   :  { %26864 = vmatprep.mubr.f32.mxu0 %v34881_v2 }
 0x3d7   :  { %26865 = vmatmul.mubr.f32.gmra.mrb[48].mxu0 %v34882_v62 }
 0x3d8   :  { %26867 = vmatprep.mubr.f32.mxu0 %v34883_v7 }
 0x3db   :  { %26868 = vmatmul.mubr.f32.gmra.mrb[50].mxu0 %v34884_v47 }
 0x3dc   :  { %26870 = vmatprep.mubr.f32.mxu0 %v34885_v57 }
 0x3df   :  { %26871 = vmatmul.mubr.f32.gmra.mrb[52].mxu0 %v34913_v36 }
 0x3e0   :  { %26873 = vmatprep.mubr.f32.mxu0 %v34914_v53 }
 0x3e3   :  { %26874 = vmatmul.mubr.f32.gmra.mrb[54].mxu0 %v34915_v1 }
 0x3e4   :  { %26876 = vmatprep.mubr.f32.mxu0 %v34916_v32 }
 0x3e7   :  { %26877 = vmatmul.mubr.f32.gmra.mrb[56].mxu0 %v34917_v22 }
 0x3e8   :  { %26879 = vmatprep.mubr.f32.mxu0 %v34918_v35 }
 0x3eb   :  { %26880 = vmatmul.mubr.f32.gmra.mrb[58].mxu0 %v34919_v10 }
 0x3ec   :  { %26882 = vmatprep.mubr.f32.mxu0 %v34920_v48 }
 0x3ef   :  { %26883 = vmatmul.mubr.f32.gmra.mrb[60].mxu0 %v34921_v46 }
 0x3f0   :  { %26885 = vmatprep.mubr.f32.mxu0 %v34922_v44 }
 0x3f3   :  { %26886 = vmatmul.mubr.f32.gmra.mrb[62].mxu0 %v34923_v26 }
 0x3f4   :  { %26888 = vmatprep.mubr.f32.mxu0 %v34924_v41 }
 0x3f7   :  { %26889 = vmatmul.mubr.f32.gmra.mrb[64].mxu0 %v34925_v37 }
 0x3f8   :  { %26891 = vmatprep.mubr.f32.mxu0 %v34926_v14 }
 0x3fb   :  { %26892 = vmatmul.mubr.f32.gmra.mrb[66].mxu0 %v34927_v50 }
 0x3fc   :  { %26894 = vmatprep.mubr.f32.mxu0 %v34928_v38 }
 0x3ff   :  { %26895 = vmatmul.mubr.f32.gmra.mrb[68].mxu0 %v34902_v59 }
 0x400   :  { %26897 = vmatprep.mubr.f32.mxu0 %v34903_v20 }
 0x403   :  { %26898 = vmatmul.mubr.f32.gmra.mrb[70].mxu0 %v34904_v21 }
 0x404   :  { %26900 = vmatprep.mubr.f32.mxu0 %v34905_v34 }
 0x407   :  { %26901 = vmatmul.mubr.f32.gmra.mrb[72].mxu0 %v34906_v42 }
 0x408   :  { %26903 = vmatprep.mubr.f32.mxu0 %v34907_v5 }
 0x40b   :  { %26904 = vmatmul.mubr.f32.gmra.mrb[74].mxu0 %v34908_v17 }
 0x40c   :  { %26906 = vmatprep.mubr.f32.mxu0 %v34909_v49 }
 0x40f   :  { %26907 = vmatmul.mubr.f32.gmra.mrb[76].mxu0 %v34910_v56 }
 0x410   :  { %26909 = vmatprep.mubr.f32.mxu0 %v34911_v54 }
 0x413   :  { %26910 = vmatmul.mubr.f32.gmra.mrb[78].mxu0 %v34912_v43 }
 0x44a   :  { %v26794_v58 = vpop.f32.mrb[0].mxu0 }
 0x44b   :  { %v4264_v19 = vand.u32 4294901760, %v26794_v58  ;;  %v3774_v60 = vpop.f32.mrb[1].mxu0 }
 0x44c   :  { %v4261_v0 = vand.u32 4294901760, %v3774_v60 }
 0x44d   :  { %v4356_v24 = vsub.f32 %v26794_v58, %v4264_v19 }
 0x44e   :  { %v32172_v63 = vpack.c.bf16 %v4264_v19, %v4261_v0  ;;  %v4349_v15 = vsub.f32 %v3774_v60, %v4261_v0  ;;  %v26797_v31 = vpop.f32.mrb[2].mxu0 }
 0x44f   :  { %v4357_v8 = vand.u32 4294901760, %v4356_v24  ;;  %v4766_v18 = vand.u32 4294901760, %v26797_v31  ;;  %v3786_v51 = vpop.f32.mrb[3].mxu0 }
 0x450   :  { %v4350_v29 = vand.u32 4294901760, %v4349_v15  ;;  %v4763_v30 = vand.u32 4294901760, %v3786_v51  ;;  %28617 = vmatprep.subr.bf16.mxu1 %v32172_v63  ;;  %v28624_v55 = vpack.c.bf16 %v4356_v24, %v4349_v15 }
 0x451   :  { %v4358_v61 = vsub.f32 %v4356_v24, %v4357_v8  ;;  %v4858_v28 = vsub.f32 %v26797_v31, %v4766_v18  ;;  %28619 = vmatpush3.bf16.msra.mxu1 %v32172_v63 }
 0x452   :  { %v4351_v3 = vsub.f32 %v4349_v15, %v4350_v29  ;;  %v32178_v16 = vpack.c.bf16 %v4766_v18, %v4763_v30  ;;  %v4851_v2 = vsub.f32 %v3786_v51, %v4763_v30  ;;  %v26800_v62 = vpop.f32.mrb[4].mxu0  ;;  %v32180_v7 = vpack.c.bf16 %v4357_v8, %v4350_v29 }
 0x453   :  { %v4859_v47 = vand.u32 4294901760, %v4858_v28  ;;  %v5268_v57 = vand.u32 4294901760, %v26800_v62  ;;  %v3798_v17 = vpop.f32.mrb[5].mxu0  ;;  %v4359_v49 = vand.u32 4294901760, %v4358_v61 }
 0x454   :  { %v4852_v56 = vand.u32 4294901760, %v4851_v2  ;;  %v5265_v54 = vand.u32 4294901760, %v3798_v17  ;;  %26917 = vmatmul.mubr.f32.vlgmr.msra.gmra.mrb[0].mxu1 %v32175_v13  ;;  %v4352_v43 = vand.u32 4294901760, %v4351_v3  ;;  %v32183_v59 = vpack.c.bf16 %v4858_v28, %v4851_v2 }
 0x455   :  { %v4860_v20 = vsub.f32 %v4858_v28, %v4859_v47  ;;  %v5360_v21 = vsub.f32 %v26800_v62, %v5268_v57  ;;  %26923 = vmatprep.mubr.f32.mxu1 %v32111_v4 }
 0x456   :  { %v4853_v34 = vsub.f32 %v4851_v2, %v4852_v56  ;;  %v32186_v42 = vpack.c.bf16 %v5268_v57, %v5265_v54  ;;  %v5353_v5 = vsub.f32 %v3798_v17, %v5265_v54  ;;  %v26803_v52 = vpop.f32.mrb[6].mxu0  ;;  %v28620_v25 = vpack.c.bf16 %v4359_v49, %v4352_v43 }
 0x457   :  { %v5361_v23 = vand.u32 4294901760, %v5360_v21  ;;  %v5770_v36 = vand.u32 4294901760, %v26803_v52  ;;  %v3810_v53 = vpop.f32.mrb[7].mxu0  ;;  %v4861_v1 = vand.u32 4294901760, %v4860_v20  ;;  %v32188_v32 = vpack.c.bf16 %v4859_v47, %v4852_v56 }
 0x458   :  { %v5354_v22 = vand.u32 4294901760, %v5353_v5  ;;  %v5767_v35 = vand.u32 4294901760, %v3810_v53  ;;  %28621 = vmatprep.subr.bf16.mxu1 %v28620_v25  ;;  %v4854_v10 = vand.u32 4294901760, %v4853_v34  ;;  %v32190_v48 = vpack.c.bf16 %v5360_v21, %v5353_v5 }
 0x459   :  { %v5362_v46 = vsub.f32 %v5360_v21, %v5361_v23  ;;  %v5862_v44 = vsub.f32 %v26803_v52, %v5770_v36  ;;  %28623 = vmatpush3.bf16.msra.mxu1 %v28620_v25 }
 0x45a   :  { %v5355_v26 = vsub.f32 %v5353_v5, %v5354_v22  ;;  %v32192_v41 = vpack.c.bf16 %v5770_v36, %v5767_v35  ;;  %v5855_v37 = vsub.f32 %v3810_v53, %v5767_v35  ;;  %v26806_v14 = vpop.f32.mrb[8].mxu0  ;;  %28625 = vmatprep.subr.bf16.mxu1 %v28624_v55  ;;  %v32194_v50 = vpack.c.bf16 %v4861_v1, %v4854_v10 }
 0x45b   :  { %v5863_v38 = vand.u32 4294901760, %v5862_v44  ;;  %v6272_v9 = vand.u32 4294901760, %v26806_v14  ;;  %v3822_v11 = vpop.f32.mrb[9].mxu0  ;;  %v5363_v58 = vand.u32 4294901760, %v5362_v46  ;;  %v32196_v19 = vpack.c.bf16 %v5361_v23, %v5354_v22 }
 0x45c   :  { %v5856_v60 = vand.u32 4294901760, %v5855_v37  ;;  %v6269_v0 = vand.u32 4294901760, %v3822_v11  ;;  %26924 = vmatmul.mubr.f32.vlgmr.msra.gmra.mrb[0].mxu1 %v32162_v33  ;;  %v5356_v12 = vand.u32 4294901760, %v5355_v26  ;;  %v32199_v24 = vpack.c.bf16 %v5862_v44, %v5855_v37 }
 0x45d   :  { %v5864_v15 = vsub.f32 %v5862_v44, %v5863_v38  ;;  %v6364_v31 = vsub.f32 %v26806_v14, %v6272_v9  ;;  %28627 = vmatpush3.bf16.msra.mxu1 %v28624_v55  ;;  %26930 = vmatprep.mubr.f32.mxu1 %v32115_v27 }
 0x45e   :  { %v5857_v8 = vsub.f32 %v5855_v37, %v5856_v60  ;;  %v32202_v18 = vpack.c.bf16 %v6272_v9, %v6269_v0  ;;  %v6357_v51 = vsub.f32 %v3822_v11, %v6269_v0  ;;  %v26809_v29 = vpop.f32.mrb[10].mxu0  ;;  %28629 = vmatprep.subr.bf16.mxu1 %v32172_v63  ;;  %v32205_v30 = vpack.c.bf16 %v5363_v58, %v5356_v12 }
 0x45f   :  { %v6365_v61 = vand.u32 4294901760, %v6364_v31  ;;  %v6774_v28 = vand.u32 4294901760, %v26809_v29  ;;  %v3834_v3 = vpop.f32.mrb[11].mxu0  ;;  %v5865_v2 = vand.u32 4294901760, %v5864_v15  ;;  %v32207_v62 = vpack.c.bf16 %v5863_v38, %v5856_v60 }
 0x460   :  { %v6358_v47 = vand.u32 4294901760, %v6357_v51  ;;  %v6771_v57 = vand.u32 4294901760, %v3834_v3  ;;  %v5858_v55 = vand.u32 4294901760, %v5857_v8  ;;  %v32209_v17 = vpack.c.bf16 %v6364_v31, %v6357_v51 }
 0x461   :  { %v6366_v49 = vsub.f32 %v6364_v31, %v6365_v61  ;;  %v6866_v56 = vsub.f32 %v26809_v29, %v6774_v28 }
 0x462   :  { %v6359_v54 = vsub.f32 %v6357_v51, %v6358_v47  ;;  %v32211_v43 = vpack.c.bf16 %v6774_v28, %v6771_v57  ;;  %v6859_v20 = vsub.f32 %v3834_v3, %v6771_v57  ;;  %v26812_v21 = vpop.f32.mrb[12].mxu0  ;;  %v32213_v34 = vpack.c.bf16 %v5865_v2, %v5858_v55 }
 0x463   :  { %v6867_v5 = vand.u32 4294901760, %v6866_v56  ;;  %v7276_v52 = vand.u32 4294901760, %v26812_v21  ;;  %v3846_v25 = vpop.f32.mrb[13].mxu0  ;;  %v6367_v23 = vand.u32 4294901760, %v6366_v49  ;;  %v32215_v36 = vpack.c.bf16 %v6365_v61, %v6358_v47 }
 0x464   :  { %v6860_v53 = vand.u32 4294901760, %v6859_v20  ;;  %v7273_v1 = vand.u32 4294901760, %v3846_v25  ;;  %26931 = vmatmul.mubr.f32.vlgmr.msra.gmra.mrb[0].mxu1 %v32165_v6  ;;  %v6360_v22 = vand.u32 4294901760, %v6359_v54  ;;  %v32218_v35 = vpack.c.bf16 %v6866_v56, %v6859_v20 }
 0x465   :  { %v6868_v10 = vsub.f32 %v6866_v56, %v6867_v5  ;;  %v7368_v46 = vsub.f32 %v26812_v21, %v7276_v52  ;;  %28631 = vmatpush3.bf16.msra.mxu1 %v32172_v63  ;;  %26937 = vmatprep.mubr.f32.mxu1 %v32119_v45 }
 0x466   :  { %v6861_v44 = vsub.f32 %v6859_v20, %v6860_v53  ;;  %v32222_v26 = vpack.c.bf16 %v7276_v52, %v7273_v1  ;;  %v7361_v37 = vsub.f32 %v3846_v25, %v7273_v1  ;;  %28633 = vmatprep.subr.bf16.mxu1 %v32180_v7  ;;  %v26815_v14 = vpop.f32.mrb[14].mxu0  ;;  %v32225_v38 = vpack.c.bf16 %v6367_v23, %v6360_v22 }
 0x467   :  { %v7369_v9 = vand.u32 4294901760, %v7368_v46  ;;  %v7778_v11 = vand.u32 4294901760, %v26815_v14  ;;  %v3858_v58 = vpop.f32.mrb[15].mxu0  ;;  %v6869_v60 = vand.u32 4294901760, %v6868_v10  ;;  %v32227_v0 = vpack.c.bf16 %v6867_v5, %v6860_v53 }
 0x468   :  { %v7362_v12 = vand.u32 4294901760, %v7361_v37  ;;  %v7775_v15 = vand.u32 4294901760, %v3858_v58  ;;  %v6862_v31 = vand.u32 4294901760, %v6861_v44  ;;  %v32229_v8 = vpack.c.bf16 %v7368_v46, %v7361_v37 }
 0x469   :  { %v7370_v51 = vsub.f32 %v7368_v46, %v7369_v9  ;;  %v7870_v29 = vsub.f32 %v26815_v14, %v7778_v11 }
 0x46a   :  { %v7363_v61 = vsub.f32 %v7361_v37, %v7362_v12  ;;  %v32231_v28 = vpack.c.bf16 %v7778_v11, %v7775_v15  ;;  %v7863_v3 = vsub.f32 %v3858_v58, %v7775_v15  ;;  %v26818_v2 = vpop.f32.mrb[16].mxu0  ;;  %v32233_v47 = vpack.c.bf16 %v6869_v60, %v6862_v31 }
 0x46b   :  { %v7871_v57 = vand.u32 4294901760, %v7870_v29  ;;  %v8280_v55 = vand.u32 4294901760, %v26818_v2  ;;  %v3870_v49 = vpop.f32.mrb[17].mxu0  ;;  %v7371_v56 = vand.u32 4294901760, %v7370_v51  ;;  %v32235_v54 = vpack.c.bf16 %v7369_v9, %v7362_v12 }
 0x46c   :  { %v7864_v20 = vand.u32 4294901760, %v7863_v3  ;;  %v8277_v21 = vand.u32 4294901760, %v3870_v49  ;;  %26938 = vmatmul.mubr.f32.vlgmr.msra.gmra.mrb[0].mxu1 %v32168_v39  ;;  %v7364_v5 = vand.u32 4294901760, %v7363_v61  ;;  %v32238_v52 = vpack.c.bf16 %v7870_v29, %v7863_v3 }
 0x46d   :  { %v7872_v25 = vsub.f32 %v7870_v29, %v7871_v57  ;;  %v8372_v23 = vsub.f32 %v26818_v2, %v8280_v55  ;;  %28635 = vmatpush3.bf16.msra.mxu1 %v32180_v7  ;;  %26944 = vmatprep.mubr.f32.mxu1 %v32111_v4 }
 0x46e   :  { %v7865_v53 = vsub.f32 %v7863_v3, %v7864_v20  ;;  %v32242_v1 = vpack.c.bf16 %v8280_v55, %v8277_v21  ;;  %v8365_v22 = vsub.f32 %v3870_v49, %v8277_v21  ;;  %28637 = vmatprep.subr.bf16.mxu1 %v32172_v63  ;;  %v26821_v10 = vpop.f32.mrb[18].mxu0  ;;  %v32245_v46 = vpack.c.bf16 %v7371_v56, %v7364_v5 }
 0x46f   :  { %v8373_v44 = vand.u32 4294901760, %v8372_v23  ;;  %v8782_v37 = vand.u32 4294901760, %v26821_v10  ;;  %v3882_v14 = vpop.f32.mrb[19].mxu0  ;;  %v7873_v9 = vand.u32 4294901760, %v7872_v25  ;;  %v32247_v11 = vpack.c.bf16 %v7871_v57, %v7864_v20 }
 0x470   :  { %v8366_v58 = vand.u32 4294901760, %v8365_v22  ;;  %v8779_v60 = vand.u32 4294901760, %v3882_v14  ;;  %v7866_v7 = vand.u32 4294901760, %v7865_v53  ;;  %v32249_v12 = vpack.c.bf16 %v8372_v23, %v8365_v22 }
 0x471   :  { %v8374_v15 = vsub.f32 %v8372_v23, %v8373_v44  ;;  %v8874_v31 = vsub.f32 %v26821_v10, %v8782_v37 }
 0x472   :  { %34929 = vst [vmem:[#allocation16_spill] sm:$0xff] %v32249_v12  ;;  %v8367_v51 = vsub.f32 %v8365_v22, %v8366_v58  ;;  %v32251_v29 = vpack.c.bf16 %v8782_v37, %v8779_v60  ;;  %v8867_v61 = vsub.f32 %v3882_v14, %v8779_v60  ;;  %v26824_v3 = vpop.f32.mrb[20].mxu0  ;;  %v32253_v2 = vpack.c.bf16 %v7873_v9, %v7866_v7 }
 0x473   :  { %v8875_v55 = vand.u32 4294901760, %v8874_v31  ;;  %v9284_v49 = vand.u32 4294901760, %v26824_v3  ;;  %v3894_v56 = vpop.f32.mrb[21].mxu0  ;;  %v8375_v21 = vand.u32 4294901760, %v8374_v15  ;;  %v32255_v57 = vpack.c.bf16 %v8373_v44, %v8366_v58 }
 0x474   :  { %34930 = vst [vmem:[#allocation19_spill] sm:$0xff] %v32251_v29  ;;  %v8868_v20 = vand.u32 4294901760, %v8867_v61  ;;  %v9281_v5 = vand.u32 4294901760, %v3894_v56  ;;  %26945 = vmatmul.mubr.f32.vlgmr.msra.gmra.mrb[0].mxu1 %v32162_v33  ;;  %v8368_v25 = vand.u32 4294901760, %v8367_v51  ;;  %v32258_v23 = vpack.c.bf16 %v8874_v31, %v8867_v61 }
 0x475   :  { %34931 = vst [vmem:[#allocation21_spill] sm:$0xff] %v32255_v57  ;;  %v8876_v53 = vsub.f32 %v8874_v31, %v8875_v55  ;;  %v9376_v22 = vsub.f32 %v26824_v3, %v9284_v49  ;;  %28639 = vmatpush3.bf16.msra.mxu1 %v32172_v63  ;;  %26951 = vmatprep.mubr.f32.mxu1 %v32111_v4 }
 0x476   :  { %34932 = vst [vmem:[#allocation22_spill] sm:$0xff] %v32258_v23  ;;  %v8869_v10 = vsub.f32 %v8867_v61, %v8868_v20  ;;  %v32262_v37 = vpack.c.bf16 %v9284_v49, %v9281_v5  ;;  %v9369_v14 = vsub.f32 %v3894_v56, %v9281_v5  ;;  %28641 = vmatprep.subr.bf16.mxu1 %v32178_v16  ;;  %v26827_v44 = vpop.f32.mrb[22].mxu0 }
 0x477   :  { %v32265_v9 = vpack.c.bf16 %v8375_v21, %v8368_v25  ;;  %v9377_v58 = vand.u32 4294901760, %v9376_v22  ;;  %v9786_v60 = vand.u32 4294901760, %v26827_v44  ;;  %v3906_v7 = vpop.f32.mrb[23].mxu0  ;;  %v8877_v15 = vand.u32 4294901760, %v8876_v53 }
 0x478   :  { %34933 = vst [vmem:[#allocation23_spill] sm:$0xff] %v32262_v37  ;;  %v32267_v51 = vpack.c.bf16 %v8875_v55, %v8868_v20  ;;  %v9370_v31 = vand.u32 4294901760, %v9369_v14  ;;  %v9783_v3 = vand.u32 4294901760, %v3906_v7  ;;  %v8870_v63 = vand.u32 4294901760, %v8869_v10 }
 0x479   :  { %v32269_v23 = vpack.c.bf16 %v9376_v22, %v9369_v14  ;;  %v9378_v61 = vsub.f32 %v9376_v22, %v9377_v58  ;;  %v9878_v49 = vsub.f32 %v26827_v44, %v9786_v60 }
 0x47a   :  { %34934 = vst [vmem:[#allocation26_spill] sm:$0xff] %v32267_v51  ;;  %v9371_v37 = vsub.f32 %v9369_v14, %v9370_v31  ;;  %v32271_v56 = vpack.c.bf16 %v9786_v60, %v9783_v3  ;;  %v9871_v5 = vsub.f32 %v3906_v7, %v9783_v3  ;;  %v26830_v29 = vpop.f32.mrb[24].mxu0  ;;  %v32273_v21 = vpack.c.bf16 %v8877_v15, %v8870_v63 }
 0x47b   :  { %34935 = vst [vmem:[#allocation27_spill] sm:$0xff] %v32269_v23  ;;  %v9879_v25 = vand.u32 4294901760, %v9878_v49  ;;  %v10288_v57 = vand.u32 4294901760, %v26830_v29  ;;  %v3918_v12 = vpop.f32.mrb[25].mxu0  ;;  %v9379_v53 = vand.u32 4294901760, %v9378_v61  ;;  %v32275_v55 = vpack.c.bf16 %v9377_v58, %v9370_v31 }
 0x47c   :  { %34936 = vst [vmem:[#allocation30_spill] sm:$0xff] %v32271_v56  ;;  %v9872_v20 = vand.u32 4294901760, %v9871_v5  ;;  %v10285_v51 = vand.u32 4294901760, %v3918_v12  ;;  %26952 = vmatmul.mubr.f32.vlgmr.msra.gmra.mrb[0].mxu1 %v32162_v33  ;;  %v9372_v10 = vand.u32 4294901760, %v9371_v37  ;;  %v32278_v22 = vpack.c.bf16 %v9878_v49, %v9871_v5 }
 0x47d   :  { %34937 = vst [vmem:[#allocation31_spill] sm:$0xff] %v32275_v55  ;;  %v9880_v14 = vsub.f32 %v9878_v49, %v9879_v25  ;;  %v10380_v44 = vsub.f32 %v26830_v29, %v10288_v57  ;;  %28643 = vmatpush3.bf16.msra.mxu1 %v32178_v16  ;;  %26958 = vmatprep.mubr.f32.mxu1 %v32125_v40 }
 0x47e   :  { %34938 = vst [vmem:[#allocation36_spill] sm:$0xff] %v32278_v22  ;;  %v9873_v60 = vsub.f32 %v9871_v5, %v9872_v20  ;;  %v32282_v7 = vpack.c.bf16 %v10288_v57, %v10285_v51  ;;  %v10373_v15 = vsub.f32 %v3918_v12, %v10285_v51  ;;  %28645 = vmatprep.subr.bf16.mxu1 %v32194_v50  ;;  %v26833_v58 = vpop.f32.mrb[26].mxu0 }
 0x47f   :  { %v32285_v31 = vpack.c.bf16 %v9379_v53, %v9372_v10  ;;  %v10381_v3 = vand.u32 4294901760, %v10380_v44  ;;  %v10790_v63 = vand.u32 4294901760, %v26833_v58  ;;  %v3930_v37 = vpop.f32.mrb[27].mxu0  ;;  %v9881_v61 = vand.u32 4294901760, %v9880_v14 }
 0x480   :  { %34939 = vst [vmem:[#allocation37_spill] sm:$0xff] %v32282_v7  ;;  %v32287_v22 = vpack.c.bf16 %v9879_v25, %v9872_v20  ;;  %v10374_v29 = vand.u32 4294901760, %v10373_v15  ;;  %v10787_v49 = vand.u32 4294901760, %v3930_v37  ;;  %26959 = vmatmul.mubr.f32.vlgmr.msra.gmra.mrb[2].mxu1 %v32175_v13  ;;  %v9874_v56 = vand.u32 4294901760, %v9873_v60 }
 0x481   :  { %34940 = vst [vmem:[#allocation38_spill] sm:$0xff] %v32285_v31  ;;  %v32290_v5 = vpack.c.bf16 %v10380_v44, %v10373_v15  ;;  %v10382_v57 = vsub.f32 %v10380_v44, %v10381_v3  ;;  %v10882_v12 = vsub.f32 %v26833_v58, %v10790_v63  ;;  %28647 = vmatpush3.bf16.msra.mxu1 %v32194_v50 }
 0x482   :  { %34941 = vst [vmem:[#allocation39_spill] sm:$0xff] %v32287_v22  ;;  %26965 = vmatprep.mubr.f32.mxu1 %v32111_v4  ;;  %v10375_v51 = vsub.f32 %v10373_v15, %v10374_v29  ;;  %v32294_v53 = vpack.c.bf16 %v10790_v63, %v10787_v49  ;;  %v10875_v10 = vsub.f32 %v3930_v37, %v10787_v49  ;;  %v26836_v25 = vpop.f32.mrb[28].mxu0 }
 0x483   :  { %34942 = vst [vmem:[#allocation42_spill] sm:$0xff] %v32290_v5  ;;  %28649 = vmatprep.subr.bf16.mxu1 %v32183_v59  ;;  %v32297_v20 = vpack.c.bf16 %v9881_v61, %v9874_v56  ;;  %v10883_v14 = vand.u32 4294901760, %v10882_v12  ;;  %v11292_v7 = vand.u32 4294901760, %v26836_v25  ;;  %v3942_v60 = vpop.f32.mrb[29].mxu0  ;;  %v10383_v22 = vand.u32 4294901760, %v10382_v57 }
 0x484   :  { %34943 = vst [vmem:[#allocation43_spill] sm:$0xff] %v32294_v53  ;;  %v32299_v5 = vpack.c.bf16 %v10381_v3, %v10374_v29  ;;  %v10876_v44 = vand.u32 4294901760, %v10875_v10  ;;  %v11289_v58 = vand.u32 4294901760, %v3942_v60  ;;  %v10376_v50 = vand.u32 4294901760, %v10375_v51 }
 0x485   :  { %34944 = vst [vmem:[#allocation46_spill] sm:$0xff] %v32297_v20  ;;  %v32301_v55 = vpack.c.bf16 %v10882_v12, %v10875_v10  ;;  %v10884_v15 = vsub.f32 %v10882_v12, %v10883_v14  ;;  %v11384_v63 = vsub.f32 %v26836_v25, %v11292_v7 }
 0x486   :  { %34945 = vst [vmem:[#allocation47_spill] sm:$0xff] %v32299_v5  ;;  %v10877_v53 = vsub.f32 %v10875_v10, %v10876_v44  ;;  %v32303_v37 = vpack.c.bf16 %v11292_v7, %v11289_v58  ;;  %v11377_v49 = vsub.f32 %v3942_v60, %v11289_v58  ;;  %v26839_v23 = vpop.f32.mrb[30].mxu0  ;;  %v32305_v56 = vpack.c.bf16 %v10383_v22, %v10376_v50 }
 0x487   :  { %34946 = vst [vmem:[#allocation52_spill] sm:$0xff] %v32301_v55  ;;  %v11385_v61 = vand.u32 4294901760, %v11384_v63  ;;  %v11794_v20 = vand.u32 4294901760, %v26839_v23  ;;  %v3954_v31 = vpop.f32.mrb[31].mxu0  ;;  %v10885_v57 = vand.u32 4294901760, %v10884_v15  ;;  %v32307_v3 = vpack.c.bf16 %v10883_v14, %v10876_v44 }
 0x488   :  { %34947 = vst [vmem:[#allocation53_spill] sm:$0xff] %v32303_v37  ;;  %v11378_v29 = vand.u32 4294901760, %v11377_v49  ;;  %v11791_v5 = vand.u32 4294901760, %v3954_v31  ;;  %26966 = vmatmul.mubr.f32.vlgmr.msra.gmra.mrb[2].mxu1 %v32162_v33  ;;  %v10878_v51 = vand.u32 4294901760, %v10877_v53  ;;  %v32310_v12 = vpack.c.bf16 %v11384_v63, %v11377_v49 }
 0x489   :  { %34948 = vst [vmem:[#allocation54_spill] sm:$0xff] %v32307_v3  ;;  %v11386_v10 = vsub.f32 %v11384_v63, %v11385_v61  ;;  %v11886_v7 = vsub.f32 %v26839_v23, %v11794_v20  ;;  %28651 = vmatpush3.bf16.msra.mxu1 %v32183_v59  ;;  %26972 = vmatprep.mubr.f32.mxu1 %v32115_v27 }
 0x48a   :  { %34949 = vst [vmem:[#allocation57_spill] sm:$0xff] %v32310_v12  ;;  %v11379_v22 = vsub.f32 %v11377_v49, %v11378_v29  ;;  %v32314_v25 = vpack.c.bf16 %v11794_v20, %v11791_v5  ;;  %v11879_v60 = vsub.f32 %v3954_v31, %v11791_v5  ;;  %28653 = vmatprep.subr.bf16.mxu1 %v32178_v16  ;;  %v26842_v14 = vpop.f32.mrb[32].mxu0 }
 0x48b   :  { %v32317_v44 = vpack.c.bf16 %v10885_v57, %v10878_v51  ;;  %v11887_v58 = vand.u32 4294901760, %v11886_v7  ;;  %v12296_v50 = vand.u32 4294901760, %v26842_v14  ;;  %v3966_v53 = vpop.f32.mrb[33].mxu0  ;;  %v11387_v15 = vand.u32 4294901760, %v11386_v10 }
 0x48c   :  { %34950 = vst [vmem:[#allocation58_spill] sm:$0xff] %v32314_v25  ;;  %v32319_v12 = vpack.c.bf16 %v11385_v61, %v11378_v29  ;;  %v11880_v23 = vand.u32 4294901760, %v11879_v60  ;;  %v12293_v63 = vand.u32 4294901760, %v3966_v53  ;;  %v11380_v59 = vand.u32 4294901760, %v11379_v22 }
 0x48d   :  { %34951 = vst [vmem:[#allocation59_spill] sm:$0xff] %v32317_v44  ;;  %v32321_v37 = vpack.c.bf16 %v11886_v7, %v11879_v60  ;;  %v11888_v49 = vsub.f32 %v11886_v7, %v11887_v58  ;;  %v12388_v20 = vsub.f32 %v26842_v14, %v12296_v50 }
 0x48e   :  { %34952 = vst [vmem:[#allocation62_spill] sm:$0xff] %v32319_v12  ;;  %v11881_v25 = vsub.f32 %v11879_v60, %v11880_v23  ;;  %v32323_v31 = vpack.c.bf16 %v12296_v50, %v12293_v63  ;;  %v12381_v5 = vsub.f32 %v3966_v53, %v12293_v63  ;;  %v26845_v3 = vpop.f32.mrb[34].mxu0  ;;  %v32325_v57 = vpack.c.bf16 %v11387_v15, %v11380_v59 }
 0x48f   :  { %34953 = vst [vmem:[#allocation63_spill] sm:$0xff] %v32321_v37  ;;  %v12389_v51 = vand.u32 4294901760, %v12388_v20  ;;  %v12798_v55 = vand.u32 4294901760, %v26845_v3  ;;  %v3978_v44 = vpop.f32.mrb[35].mxu0  ;;  %v11889_v10 = vand.u32 4294901760, %v11888_v49  ;;  %v32327_v61 = vpack.c.bf16 %v11887_v58, %v11880_v23 }
 0x490   :  { %34954 = vst [vmem:[#allocation67_spill] sm:$0xff] %v32323_v31  ;;  %34955 = vst [vmem:[#allocation69_spill] sm:$0xff] %v32325_v57  ;;  %v12382_v29 = vand.u32 4294901760, %v12381_v5  ;;  %v12795_v12 = vand.u32 4294901760, %v3978_v44  ;;  %26973 = vmatmul.mubr.f32.vlgmr.msra.gmra.mrb[2].mxu1 %v32165_v6  ;;  %v11882_v22 = vand.u32 4294901760, %v11881_v25  ;;  %v32330_v7 = vpack.c.bf16 %v12388_v20, %v12381_v5 }
 0x491   :  { %34956 = vst [vmem:[#allocation70_spill] sm:$0xff] %v32327_v61  ;;  %v12390_v60 = vsub.f32 %v12388_v20, %v12389_v51  ;;  %v12890_v14 = vsub.f32 %v26845_v3, %v12798_v55  ;;  %28655 = vmatpush3.bf16.msra.mxu1 %v32178_v16  ;;  %26979 = vmatprep.mubr.f32.mxu1 %v32119_v45 }
 0x492   :  { %34957 = vst [vmem:[#allocation72_spill] sm:$0xff] %v32330_v7  ;;  %v12383_v50 = vsub.f32 %v12381_v5, %v12382_v29  ;;  %v32334_v53 = vpack.c.bf16 %v12798_v55, %v12795_v12  ;;  %v12883_v15 = vsub.f32 %v3978_v44, %v12795_v12  ;;  %28657 = vmatprep.subr.bf16.mxu1 %v32188_v32  ;;  %v26848_v58 = vpop.f32.mrb[36].mxu0 }
 0x493   :  { %v32337_v23 = vpack.c.bf16 %v11889_v10, %v11882_v22  ;;  %v12891_v63 = vand.u32 4294901760, %v12890_v14  ;;  %v13300_v59 = vand.u32 4294901760, %v26848_v58  ;;  %v3990_v25 = vpop.f32.mrb[37].mxu0  ;;  %v12391_v49 = vand.u32 4294901760, %v12390_v60 }
 0x494   :  { %34958 = vst [vmem:[#allocation74_spill] sm:$0xff] %v32334_v53  ;;  %v32339_v7 = vpack.c.bf16 %v12389_v51, %v12382_v29  ;;  %v12884_v3 = vand.u32 4294901760, %v12883_v15  ;;  %v13297_v20 = vand.u32 4294901760, %v3990_v25  ;;  %v12384_v31 = vand.u32 4294901760, %v12383_v50 }
 0x495   :  { %34959 = vst [vmem:[#allocation76_spill] sm:$0xff] %v32337_v23  ;;  %v32341_v61 = vpack.c.bf16 %v12890_v14, %v12883_v15  ;;  %v12892_v5 = vsub.f32 %v12890_v14, %v12891_v63  ;;  %v13392_v55 = vsub.f32 %v26848_v58, %v13300_v59 }
 0x496   :  { %34960 = vst [vmem:[#allocation78_spill] sm:$0xff] %v32339_v7  ;;  %v12885_v53 = vsub.f32 %v12883_v15, %v12884_v3  ;;  %v32343_v12 = vpack.c.bf16 %v13300_v59, %v13297_v20  ;;  %v13385_v44 = vsub.f32 %v3990_v25, %v13297_v20  ;;  %v26851_v37 = vpop.f32.mrb[38].mxu0  ;;  %v32345_v10 = vpack.c.bf16 %v12391_v49, %v12384_v31 }
 0x497   :  { %34961 = vst [vmem:[#allocation80_spill] sm:$0xff] %v32341_v61  ;;  %v13393_v22 = vand.u32 4294901760, %v13392_v55  ;;  %v13802_v23 = vand.u32 4294901760, %v26851_v37  ;;  %v4002_v57 = vpop.f32.mrb[39].mxu0  ;;  %v12893_v60 = vand.u32 4294901760, %v12892_v5  ;;  %v32347_v51 = vpack.c.bf16 %v12891_v63, %v12884_v3 }
 0x498   :  { %34962 = vst [vmem:[#allocation107_spill] sm:$0xff] %v32343_v12  ;;  %v13386_v29 = vand.u32 4294901760, %v13385_v44  ;;  %v13799_v7 = vand.u32 4294901760, %v4002_v57  ;;  %26980 = vmatmul.mubr.f32.vlgmr.msra.gmra.mrb[2].mxu1 %v32168_v39  ;;  %v12886_v50 = vand.u32 4294901760, %v12885_v53  ;;  %v32350_v14 = vpack.c.bf16 %v13392_v55, %v13385_v44 }
 0x499   :  { %34963 = vst [vmem:[#allocation108_spill] sm:$0xff] %v32347_v51  ;;  %v13394_v15 = vsub.f32 %v13392_v55, %v13393_v22  ;;  %v13894_v58 = vsub.f32 %v26851_v37, %v13802_v23  ;;  %28659 = vmatpush3.bf16.msra.mxu1 %v32188_v32  ;;  %26986 = vmatprep.mubr.f32.mxu1 %v32111_v4 }
 0x49a   :  { %34964 = vst [vmem:[#allocation112_spill] sm:$0xff] %v32350_v14  ;;  %v13387_v31 = vsub.f32 %v13385_v44, %v13386_v29  ;;  %v32354_v59 = vpack.c.bf16 %v13802_v23, %v13799_v7  ;;  %v13887_v25 = vsub.f32 %v4002_v57, %v13799_v7  ;;  %28661 = vmatprep.subr.bf16.mxu1 %v32178_v16  ;;  %v26854_v63 = vpop.f32.mrb[40].mxu0 }
 0x49b   :  { %v32357_v49 = vpack.c.bf16 %v12893_v60, %v12886_v50  ;;  %v13895_v3 = vand.u32 4294901760, %v13894_v58  ;;  %v14304_v20 = vand.u32 4294901760, %v26854_v63  ;;  %v4014_v53 = vpop.f32.mrb[41].mxu0  ;;  %v13395_v5 = vand.u32 4294901760, %v13394_v15 }
 0x49c   :  { %34965 = vst [vmem:[#allocation114_spill] sm:$0xff] %v32354_v59  ;;  %v32359_v14 = vpack.c.bf16 %v13393_v22, %v13386_v29  ;;  %v13888_v37 = vand.u32 4294901760, %v13887_v25  ;;  %v14301_v55 = vand.u32 4294901760, %v4014_v53  ;;  %v13388_v32 = vand.u32 4294901760, %v13387_v31 }
 0x49d   :  { %34966 = vst [vmem:[#allocation117_spill] sm:$0xff] %v32357_v49  ;;  %v32361_v12 = vpack.c.bf16 %v13894_v58, %v13887_v25  ;;  %v13896_v44 = vsub.f32 %v13894_v58, %v13895_v3  ;;  %v14396_v23 = vsub.f32 %v26854_v63, %v14304_v20 }
 0x49e   :  { %34967 = vst [vmem:[#allocation119_spill] sm:$0xff] %v32359_v14  ;;  %v13889_v59 = vsub.f32 %v13887_v25, %v13888_v37  ;;  %v32363_v57 = vpack.c.bf16 %v14304_v20, %v14301_v55  ;;  %v14389_v7 = vsub.f32 %v4014_v53, %v14301_v55  ;;  %v26857_v51 = vpop.f32.mrb[42].mxu0  ;;  %v32365_v60 = vpack.c.bf16 %v13395_v5, %v13388_v32 }
 0x49f   :  { %34968 = vst [vmem:[#allocation122_spill] sm:$0xff] %v32361_v12  ;;  %v14397_v50 = vand.u32 4294901760, %v14396_v23  ;;  %v14806_v61 = vand.u32 4294901760, %v26857_v51  ;;  %v4026_v49 = vpop.f32.mrb[43].mxu0  ;;  %v13897_v15 = vand.u32 4294901760, %v13896_v44  ;;  %v32367_v22 = vpack.c.bf16 %v13895_v3, %v13888_v37 }
 0x4a0   :  { %34969 = vst [vmem:[#allocation124_spill] sm:$0xff] %v32363_v57  ;;  %v14390_v29 = vand.u32 4294901760, %v14389_v7  ;;  %v14803_v14 = vand.u32 4294901760, %v4026_v49  ;;  %26987 = vmatmul.mubr.f32.vlgmr.msra.gmra.mrb[2].mxu1 %v32162_v33  ;;  %v13890_v31 = vand.u32 4294901760, %v13889_v59  ;;  %v32370_v58 = vpack.c.bf16 %v14396_v23, %v14389_v7 }
 0x4a1   :  { %34970 = vst [vmem:[#allocation126_spill] sm:$0xff] %v32367_v22  ;;  %v14398_v25 = vsub.f32 %v14396_v23, %v14397_v50  ;;  %v14898_v63 = vsub.f32 %v26857_v51, %v14806_v61  ;;  %28663 = vmatpush3.bf16.msra.mxu1 %v32178_v16  ;;  %26993 = vmatprep.mubr.f32.mxu1 %v32111_v4 }
 0x4a2   :  { %34971 = vst [vmem:[#allocation138_spill] sm:$0xff] %v32370_v58  ;;  %v14391_v20 = vsub.f32 %v14389_v7, %v14390_v29  ;;  %v32374_v53 = vpack.c.bf16 %v14806_v61, %v14803_v14  ;;  %v14891_v5 = vsub.f32 %v4026_v49, %v14803_v14  ;;  %28665 = vmatprep.subr.bf16.mxu1 %v32186_v42  ;;  %v26860_v3 = vpop.f32.mrb[44].mxu0 }
 0x4a3   :  { %v32377_v37 = vpack.c.bf16 %v13897_v15, %v13890_v31  ;;  %v14899_v55 = vand.u32 4294901760, %v14898_v63  ;;  %v15308_v32 = vand.u32 4294901760, %v26860_v3  ;;  %v4038_v59 = vpop.f32.mrb[45].mxu0  ;;  %v14399_v44 = vand.u32 4294901760, %v14398_v25 }
 0x4a4   :  { %34972 = vst [vmem:[#allocation145_spill] sm:$0xff] %v32374_v53  ;;  %v32379_v58 = vpack.c.bf16 %v14397_v50, %v14390_v29  ;;  %v14892_v51 = vand.u32 4294901760, %v14891_v5  ;;  %v15305_v23 = vand.u32 4294901760, %v4038_v59  ;;  %v14392_v16 = vand.u32 4294901760, %v14391_v20 }
 0x4a5   :  { %34973 = vst [vmem:[#allocation148_spill] sm:$0xff] %v32377_v37  ;;  %v32381_v57 = vpack.c.bf16 %v14898_v63, %v14891_v5  ;;  %v14900_v7 = vsub.f32 %v14898_v63, %v14899_v55  ;;  %v15400_v61 = vsub.f32 %v26860_v3, %v15308_v32 }
 0x4a6   :  { %34974 = vst [vmem:[#allocation158_spill] sm:$0xff] %v32379_v58  ;;  %v14893_v53 = vsub.f32 %v14891_v5, %v14892_v51  ;;  %v32383_v14 = vpack.c.bf16 %v15308_v32, %v15305_v23  ;;  %v15393_v49 = vsub.f32 %v4038_v59, %v15305_v23  ;;  %v26863_v22 = vpop.f32.mrb[46].mxu0  ;;  %v32385_v15 = vpack.c.bf16 %v14399_v44, %v14392_v16 }
 0x4a7   :  { %34975 = vst [vmem:[#allocation83_spill] sm:$0xff] %v32381_v57  ;;  %v15401_v31 = vand.u32 4294901760, %v15400_v61  ;;  %v15810_v12 = vand.u32 4294901760, %v26863_v22  ;;  %v4050_v37 = vpop.f32.mrb[47].mxu0  ;;  %v14901_v25 = vand.u32 4294901760, %v14900_v7  ;;  %v32387_v50 = vpack.c.bf16 %v14899_v55, %v14892_v51 }
 0x4a8   :  { %34976 = vst [vmem:[#allocation86_spill] sm:$0xff] %v32383_v14  ;;  %v15394_v29 = vand.u32 4294901760, %v15393_v49  ;;  %v15807_v58 = vand.u32 4294901760, %v4050_v37  ;;  %26994 = vmatmul.mubr.f32.vlgmr.msra.gmra.mrb[2].mxu1 %v32162_v33  ;;  %v14894_v20 = vand.u32 4294901760, %v14893_v53  ;;  %v32390_v63 = vpack.c.bf16 %v15400_v61, %v15393_v49 }
 0x4a9   :  { %34977 = vst [vmem:[#allocation87_spill] sm:$0xff] %v32387_v50  ;;  %v15402_v5 = vsub.f32 %v15400_v61, %v15401_v31  ;;  %v15902_v3 = vsub.f32 %v26863_v22, %v15810_v12  ;;  %28667 = vmatpush3.bf16.msra.mxu1 %v32186_v42  ;;  %27000 = vmatprep.mubr.f32.mxu1 %v32125_v40 }
 0x4aa   :  { %34978 = vst [vmem:[#allocation88_spill] sm:$0xff] %v32390_v63  ;;  %v15395_v32 = vsub.f32 %v15393_v49, %v15394_v29  ;;  %v32394_v59 = vpack.c.bf16 %v15810_v12, %v15807_v58  ;;  %v15895_v44 = vsub.f32 %v4050_v37, %v15807_v58  ;;  %28669 = vmatprep.subr.bf16.mxu1 %v32205_v30  ;;  %v26866_v55 = vpop.f32.mrb[48].mxu0 }
 0x4ab   :  { %v32397_v51 = vpack.c.bf16 %v14901_v25, %v14894_v20  ;;  %v15903_v23 = vand.u32 4294901760, %v15902_v3  ;;  %v16312_v16 = vand.u32 4294901760, %v26866_v55  ;;  %v4062_v53 = vpop.f32.mrb[49].mxu0  ;;  %v15403_v7 = vand.u32 4294901760, %v15402_v5 }
 0x4ac   :  { %34979 = vst [vmem:[#allocation90_spill] sm:$0xff] %v32394_v59  ;;  %v32399_v63 = vpack.c.bf16 %v15401_v31, %v15394_v29  ;;  %v15896_v22 = vand.u32 4294901760, %v15895_v44  ;;  %v16309_v61 = vand.u32 4294901760, %v4062_v53  ;;  %27001 = vmatmul.mubr.f32.vlgmr.msra.gmra.mrb[4].mxu1 %v32175_v13  ;;  %v15396_v14 = vand.u32 4294901760, %v15395_v32 }
 0x4ad   :  { %34980 = vst [vmem:[#allocation92_spill] sm:$0xff] %v32397_v51  ;;  %v32402_v49 = vpack.c.bf16 %v15902_v3, %v15895_v44  ;;  %v15904_v12 = vsub.f32 %v15902_v3, %v15903_v23  ;;  %v16404_v58 = vsub.f32 %v26866_v55, %v16312_v16  ;;  %28671 = vmatpush3.bf16.msra.mxu1 %v32205_v30 }
 0x4ae   :  { %34981 = vst [vmem:[#allocation93_spill] sm:$0xff] %v32399_v63  ;;  %27007 = vmatprep.mubr.f32.mxu1 %v32111_v4  ;;  %v15897_v37 = vsub.f32 %v15895_v44, %v15896_v22  ;;  %v32406_v25 = vpack.c.bf16 %v16312_v16, %v16309_v61  ;;  %v16397_v20 = vsub.f32 %v4062_v53, %v16309_v61  ;;  %v26869_v31 = vpop.f32.mrb[50].mxu0 }
 0x4af   :  { %34982 = vst [vmem:[#allocation96_spill] sm:$0xff] %v32402_v49  ;;  %28673 = vmatprep.subr.bf16.mxu1 %v32190_v48  ;;  %v32409_v29 = vpack.c.bf16 %v15403_v7, %v15396_v14  ;;  %v16405_v5 = vand.u32 4294901760, %v16404_v58  ;;  %v16814_v59 = vand.u32 4294901760, %v26869_v31  ;;  %v4074_v32 = vpop.f32.mrb[51].mxu0  ;;  %v15905_v63 = vand.u32 4294901760, %v15904_v12 }
 0x4b0   :  { %34983 = vst [vmem:[#allocation99_spill] sm:$0xff] %v32406_v25  ;;  %v32411_v49 = vpack.c.bf16 %v15903_v23, %v15896_v22  ;;  %v16398_v3 = vand.u32 4294901760, %v16397_v20  ;;  %v16811_v55 = vand.u32 4294901760, %v4074_v32  ;;  %v15898_v30 = vand.u32 4294901760, %v15897_v37 }
 0x4b1   :  { %34984 = vst [vmem:[#allocation101_spill] sm:$0xff] %v32409_v29  ;;  %v32413_v50 = vpack.c.bf16 %v16404_v58, %v16397_v20  ;;  %v16406_v44 = vsub.f32 %v16404_v58, %v16405_v5  ;;  %v16906_v16 = vsub.f32 %v26869_v31, %v16814_v59 }
 0x4b2   :  { %34985 = vst [vmem:[#allocation102_spill] sm:$0xff] %v32411_v49  ;;  %v16399_v25 = vsub.f32 %v16397_v20, %v16398_v3  ;;  %v32415_v53 = vpack.c.bf16 %v16814_v59, %v16811_v55  ;;  %v16899_v61 = vsub.f32 %v4074_v32, %v16811_v55  ;;  %v26872_v57 = vpop.f32.mrb[52].mxu0  ;;  %v32417_v14 = vpack.c.bf16 %v15905_v63, %v15898_v30 }
 0x4b3   :  { %34986 = vst [vmem:[#allocation104_spill] sm:$0xff] %v32413_v50  ;;  %v16907_v7 = vand.u32 4294901760, %v16906_v16  ;;  %v17316_v29 = vand.u32 4294901760, %v26872_v57  ;;  %v4086_v51 = vpop.f32.mrb[53].mxu0  ;;  %v16407_v12 = vand.u32 4294901760, %v16406_v44  ;;  %v32419_v23 = vpack.c.bf16 %v16405_v5, %v16398_v3 }
 0x4b4   :  { %34987 = vst [vmem:[#allocation110_spill] sm:$0xff] %v32415_v53  ;;  %v16900_v22 = vand.u32 4294901760, %v16899_v61  ;;  %v17313_v49 = vand.u32 4294901760, %v4086_v51  ;;  %27008 = vmatmul.mubr.f32.vlgmr.msra.gmra.mrb[4].mxu1 %v32162_v33  ;;  %v16400_v37 = vand.u32 4294901760, %v16399_v25  ;;  %v32422_v58 = vpack.c.bf16 %v16906_v16, %v16899_v61 }
 0x4b5   :  { %34988 = vst [vmem:[#allocation120_spill] sm:$0xff] %v32419_v23  ;;  %v16908_v20 = vsub.f32 %v16906_v16, %v16907_v7  ;;  %v17408_v59 = vsub.f32 %v26872_v57, %v17316_v29  ;;  %28675 = vmatpush3.bf16.msra.mxu1 %v32190_v48  ;;  %27014 = vmatprep.mubr.f32.mxu1 %v32115_v27 }
 0x4b6   :  { %34989 = vst [vmem:[#allocation129_spill] sm:$0xff] %v32422_v58  ;;  %v16901_v63 = vsub.f32 %v16899_v61, %v16900_v22  ;;  %v32426_v31 = vpack.c.bf16 %v17316_v29, %v17313_v49  ;;  %v17401_v32 = vsub.f32 %v4086_v51, %v17313_v49  ;;  %28677 = vmatprep.subr.bf16.mxu1 %v32186_v42  ;;  %v26875_v5 = vpop.f32.mrb[54].mxu0 }
 0x4b7   :  { %v32429_v3 = vpack.c.bf16 %v16407_v12, %v16400_v37  ;;  %v17409_v55 = vand.u32 4294901760, %v17408_v59  ;;  %v17818_v30 = vand.u32 4294901760, %v26875_v5  ;;  %v4098_v25 = vpop.f32.mrb[55].mxu0  ;;  %v16909_v44 = vand.u32 4294901760, %v16908_v20 }
 0x4b8   :  { %34990 = vst [vmem:[#allocation132_spill] sm:$0xff] %v32426_v31  ;;  %v32431_v58 = vpack.c.bf16 %v16907_v7, %v16900_v22  ;;  %v17402_v57 = vand.u32 4294901760, %v17401_v32  ;;  %v17815_v16 = vand.u32 4294901760, %v4098_v25  ;;  %v16902_v48 = vand.u32 4294901760, %v16901_v63 }
 0x4b9   :  { %34991 = vst [vmem:[#allocation134_spill] sm:$0xff] %v32429_v3  ;;  %v32433_v53 = vpack.c.bf16 %v17408_v59, %v17401_v32  ;;  %v17410_v61 = vsub.f32 %v17408_v59, %v17409_v55  ;;  %v17910_v29 = vsub.f32 %v26875_v5, %v17818_v30 }
 0x4ba   :  { %34992 = vst [vmem:[#allocation140_spill] sm:$0xff] %v32431_v58  ;;  %v17403_v31 = vsub.f32 %v17401_v32, %v17402_v57  ;;  %v32435_v51 = vpack.c.bf16 %v17818_v30, %v17815_v16  ;;  %v17903_v49 = vsub.f32 %v4098_v25, %v17815_v16  ;;  %v26878_v23 = vpop.f32.mrb[56].mxu0  ;;  %v32437_v12 = vpack.c.bf16 %v16909_v44, %v16902_v48 }
 0x4bb   :  { %34993 = vst [vmem:[#allocation149_spill] sm:$0xff] %v32433_v53  ;;  %v17911_v37 = vand.u32 4294901760, %v17910_v29  ;;  %v18320_v50 = vand.u32 4294901760, %v26878_v23  ;;  %v4110_v3 = vpop.f32.mrb[57].mxu0  ;;  %v17411_v20 = vand.u32 4294901760, %v17410_v61  ;;  %v32439_v7 = vpack.c.bf16 %v17409_v55, %v17402_v57 }
 0x4bc   :  { %34994 = vst [vmem:[#allocation152_spill] sm:$0xff] %v32435_v51  ;;  %34995 = vst [vmem:[#allocation155_spill] sm:$0xff] %v32437_v12  ;;  %v17904_v22 = vand.u32 4294901760, %v17903_v49  ;;  %v18317_v58 = vand.u32 4294901760, %v4110_v3  ;;  %27015 = vmatmul.mubr.f32.vlgmr.msra.gmra.mrb[4].mxu1 %v32165_v6  ;;  %v17404_v63 = vand.u32 4294901760, %v17403_v31  ;;  %v32442_v59 = vpack.c.bf16 %v17910_v29, %v17903_v49 }
 0x4bd   :  { %34996 = vst [vmem:[#allocation160_spill] sm:$0xff] %v32439_v7  ;;  %v17912_v32 = vsub.f32 %v17910_v29, %v17911_v37  ;;  %v18412_v5 = vsub.f32 %v26878_v23, %v18320_v50  ;;  %28679 = vmatpush3.bf16.msra.mxu1 %v32186_v42  ;;  %27021 = vmatprep.mubr.f32.mxu1 %v32119_v45 }
 0x4be   :  { %34997 = vst [vmem:[#allocation163_spill] sm:$0xff] %v32442_v59  ;;  %v17905_v30 = vsub.f32 %v17903_v49, %v17904_v22  ;;  %v32446_v25 = vpack.c.bf16 %v18320_v50, %v18317_v58  ;;  %v18405_v44 = vsub.f32 %v4110_v3, %v18317_v58  ;;  %28681 = vmatprep.subr.bf16.mxu1 %v32196_v19  ;;  %v26881_v55 = vpop.f32.mrb[58].mxu0 }
 0x4bf   :  { %v32449_v57 = vpack.c.bf16 %v17411_v20, %v17404_v63  ;;  %v18413_v16 = vand.u32 4294901760, %v18412_v5  ;;  %v18822_v48 = vand.u32 4294901760, %v26881_v55  ;;  %v4122_v31 = vpop.f32.mrb[59].mxu0  ;;  %v17913_v61 = vand.u32 4294901760, %v17912_v32 }
 0x4c0   :  { %34998 = vst [vmem:[#allocation164_spill] sm:$0xff] %v32446_v25  ;;  %v32451_v59 = vpack.c.bf16 %v17911_v37, %v17904_v22  ;;  %v18406_v23 = vand.u32 4294901760, %v18405_v44  ;;  %v18819_v29 = vand.u32 4294901760, %v4122_v31  ;;  %v17906_v51 = vand.u32 4294901760, %v17905_v30 }
 0x4c1   :  { %34999 = vst [vmem:[#allocation15_spill] sm:$0xff] %v32449_v57  ;;  %v32453_v7 = vpack.c.bf16 %v18412_v5, %v18405_v44  ;;  %v18414_v49 = vsub.f32 %v18412_v5, %v18413_v16  ;;  %v18914_v50 = vsub.f32 %v26881_v55, %v18822_v48 }
 0x4c2   :  { %35000 = vst [vmem:[#allocation17_spill] sm:$0xff] %v32451_v59  ;;  %v18407_v25 = vsub.f32 %v18405_v44, %v18406_v23  ;;  %v32455_v58 = vpack.c.bf16 %v18822_v48, %v18819_v29  ;;  %v18907_v3 = vsub.f32 %v4122_v31, %v18819_v29  ;;  %v26884_v53 = vpop.f32.mrb[60].mxu0  ;;  %v32457_v20 = vpack.c.bf16 %v17913_v61, %v17906_v51 }
 0x4c3   :  { %35001 = vst [vmem:[#allocation18_spill] sm:$0xff] %v32453_v7  ;;  %v18915_v63 = vand.u32 4294901760, %v18914_v50  ;;  %v19324_v57 = vand.u32 4294901760, %v26884_v53  ;;  %v4134_v12 = vpop.f32.mrb[61].mxu0  ;;  %v18415_v32 = vand.u32 4294901760, %v18414_v49  ;;  %v32459_v37 = vpack.c.bf16 %v18413_v16, %v18406_v23 }
 0x4c4   :  { %35002 = vst [vmem:[#allocation20_spill] sm:$0xff] %v32455_v58  ;;  %v18908_v22 = vand.u32 4294901760, %v18907_v3  ;;  %v19321_v59 = vand.u32 4294901760, %v4134_v12  ;;  %27022 = vmatmul.mubr.f32.vlgmr.msra.gmra.mrb[4].mxu1 %v32168_v39  ;;  %v18408_v30 = vand.u32 4294901760, %v18407_v25  ;;  %v32462_v5 = vpack.c.bf16 %v18914_v50, %v18907_v3 }
 0x4c5   :  { %35003 = vst [vmem:[#allocation24_spill] sm:$0xff] %v32459_v37  ;;  %v18916_v44 = vsub.f32 %v18914_v50, %v18915_v63  ;;  %v19416_v55 = vsub.f32 %v26884_v53, %v19324_v57  ;;  %28683 = vmatpush3.bf16.msra.mxu1 %v32196_v19  ;;  %27028 = vmatprep.mubr.f32.mxu1 %v32111_v4 }
 0x4c6   :  { %35004 = vst [vmem:[#allocation25_spill] sm:$0xff] %v32462_v5  ;;  %v18909_v51 = vsub.f32 %v18907_v3, %v18908_v22  ;;  %v32466_v48 = vpack.c.bf16 %v19324_v57, %v19321_v59  ;;  %v19409_v31 = vsub.f32 %v4134_v12, %v19321_v59  ;;  %28685 = vmatprep.subr.bf16.mxu1 %v32186_v42  ;;  %v26887_v16 = vpop.f32.mrb[62].mxu0 }
 0x4c7   :  { %v32469_v61 = vpack.c.bf16 %v18415_v32, %v18408_v30  ;;  %v19417_v23 = vand.u32 4294901760, %v19416_v55  ;;  %v19826_v29 = vand.u32 4294901760, %v26887_v16  ;;  %v4146_v25 = vpop.f32.mrb[63].mxu0  ;;  %v18917_v49 = vand.u32 4294901760, %v18916_v44 }
 0x4c8   :  { %35005 = vst [vmem:[#allocation28_spill] sm:$0xff] %v32466_v48  ;;  %v32471_v5 = vpack.c.bf16 %v18915_v63, %v18908_v22  ;;  %v19410_v53 = vand.u32 4294901760, %v19409_v31  ;;  %v19823_v50 = vand.u32 4294901760, %v4146_v25  ;;  %v18910_v19 = vand.u32 4294901760, %v18909_v51 }
 0x4c9   :  { %35006 = vst [vmem:[#allocation29_spill] sm:$0xff] %v32469_v61  ;;  %v32473_v58 = vpack.c.bf16 %v19416_v55, %v19409_v31  ;;  %v19418_v3 = vsub.f32 %v19416_v55, %v19417_v23  ;;  %v19918_v57 = vsub.f32 %v26887_v16, %v19826_v29 }
 0x4ca   :  { %35007 = vst [vmem:[#allocation32_spill] sm:$0xff] %v32471_v5  ;;  %v19411_v48 = vsub.f32 %v19409_v31, %v19410_v53  ;;  %v32475_v12 = vpack.c.bf16 %v19826_v29, %v19823_v50  ;;  %v19911_v59 = vsub.f32 %v4146_v25, %v19823_v50  ;;  %v26890_v37 = vpop.f32.mrb[64].mxu0  ;;  %v32477_v32 = vpack.c.bf16 %v18917_v49, %v18910_v19 }
 0x4cb   :  { %35008 = vst [vmem:[#allocation33_spill] sm:$0xff] %v32473_v58  ;;  %v19919_v30 = vand.u32 4294901760, %v19918_v57  ;;  %v20328_v7 = vand.u32 4294901760, %v26890_v37  ;;  %v4158_v61 = vpop.f32.mrb[65].mxu0  ;;  %v19419_v44 = vand.u32 4294901760, %v19418_v3  ;;  %v32479_v63 = vpack.c.bf16 %v19417_v23, %v19410_v53 }
 0x4cc   :  { %35009 = vst [vmem:[#allocation34_spill] sm:$0xff] %v32475_v12  ;;  %v19912_v22 = vand.u32 4294901760, %v19911_v59  ;;  %v20325_v5 = vand.u32 4294901760, %v4158_v61  ;;  %27029 = vmatmul.mubr.f32.vlgmr.msra.gmra.mrb[4].mxu1 %v32162_v33  ;;  %v19412_v51 = vand.u32 4294901760, %v19411_v48  ;;  %v32482_v55 = vpack.c.bf16 %v19918_v57, %v19911_v59 }
 0x4cd   :  { %35010 = vst [vmem:[#allocation35_spill] sm:$0xff] %v32479_v63  ;;  %v19920_v31 = vsub.f32 %v19918_v57, %v19919_v30  ;;  %v20420_v16 = vsub.f32 %v26890_v37, %v20328_v7  ;;  %28687 = vmatpush3.bf16.msra.mxu1 %v32186_v42  ;;  %27035 = vmatprep.mubr.f32.mxu1 %v32111_v4 }
 0x4ce   :  { %35011 = vst [vmem:[#allocation40_spill] sm:$0xff] %v32482_v55  ;;  %v19913_v29 = vsub.f32 %v19911_v59, %v19912_v22  ;;  %v32486_v25 = vpack.c.bf16 %v20328_v7, %v20325_v5  ;;  %v20413_v49 = vsub.f32 %v4158_v61, %v20325_v5  ;;  %28689 = vmatprep.subr.bf16.mxu1 %v32192_v41  ;;  %v26893_v23 = vpop.f32.mrb[66].mxu0 }
 0x4cf   :  { %v32489_v53 = vpack.c.bf16 %v19419_v44, %v19412_v51  ;;  %v20421_v50 = vand.u32 4294901760, %v20420_v16  ;;  %v20830_v19 = vand.u32 4294901760, %v26893_v23  ;;  %v4170_v48 = vpop.f32.mrb[67].mxu0  ;;  %v19921_v3 = vand.u32 4294901760, %v19920_v31 }
 0x4d0   :  { %35012 = vst [vmem:[#allocation41_spill] sm:$0xff] %v32486_v25  ;;  %v32491_v55 = vpack.c.bf16 %v19919_v30, %v19912_v22  ;;  %v20414_v37 = vand.u32 4294901760, %v20413_v49  ;;  %v20827_v57 = vand.u32 4294901760, %v4170_v48  ;;  %v19914_v42 = vand.u32 4294901760, %v19913_v29 }
 0x4d1   :  { %35013 = vst [vmem:[#allocation44_spill] sm:$0xff] %v32489_v53  ;;  %v32493_v12 = vpack.c.bf16 %v20420_v16, %v20413_v49  ;;  %v20422_v59 = vsub.f32 %v20420_v16, %v20421_v50  ;;  %v20922_v7 = vsub.f32 %v26893_v23, %v20830_v19 }
 0x4d2   :  { %35014 = vst [vmem:[#allocation45_spill] sm:$0xff] %v32491_v55  ;;  %v20415_v25 = vsub.f32 %v20413_v49, %v20414_v37  ;;  %v32495_v5 = vpack.c.bf16 %v20830_v19, %v20827_v57  ;;  %v20915_v61 = vsub.f32 %v4170_v48, %v20827_v57  ;;  %v26896_v63 = vpop.f32.mrb[68].mxu0  ;;  %v32497_v44 = vpack.c.bf16 %v19921_v3, %v19914_v42 }
 0x4d3   :  { %35015 = vst [vmem:[#allocation48_spill] sm:$0xff] %v32493_v12  ;;  %v20923_v51 = vand.u32 4294901760, %v20922_v7  ;;  %v21332_v58 = vand.u32 4294901760, %v26896_v63  ;;  %v4182_v53 = vpop.f32.mrb[69].mxu0  ;;  %v20423_v31 = vand.u32 4294901760, %v20422_v59  ;;  %v32499_v30 = vpack.c.bf16 %v20421_v50, %v20414_v37 }
 0x4d4   :  { %35016 = vst [vmem:[#allocation49_spill] sm:$0xff] %v32495_v5  ;;  %v20916_v22 = vand.u32 4294901760, %v20915_v61  ;;  %v21329_v55 = vand.u32 4294901760, %v4182_v53  ;;  %27036 = vmatmul.mubr.f32.vlgmr.msra.gmra.mrb[4].mxu1 %v32162_v33  ;;  %v20416_v29 = vand.u32 4294901760, %v20415_v25  ;;  %v32502_v16 = vpack.c.bf16 %v20922_v7, %v20915_v61 }
 0x4d5   :  { %35017 = vst [vmem:[#allocation50_spill] sm:$0xff] %v32499_v30  ;;  %v20924_v49 = vsub.f32 %v20922_v7, %v20923_v51  ;;  %v21424_v23 = vsub.f32 %v26896_v63, %v21332_v58  ;;  %28691 = vmatpush3.bf16.msra.mxu1 %v32192_v41  ;;  %27042 = vmatprep.mubr.f32.mxu1 %v32125_v40 }
 0x4d6   :  { %35018 = vst [vmem:[#allocation51_spill] sm:$0xff] %v32502_v16  ;;  %v20917_v19 = vsub.f32 %v20915_v61, %v20916_v22  ;;  %v32506_v48 = vpack.c.bf16 %v21332_v58, %v21329_v55  ;;  %v21417_v3 = vsub.f32 %v4182_v53, %v21329_v55  ;;  %28693 = vmatprep.subr.bf16.mxu1 %v32213_v34  ;;  %v26899_v50 = vpop.f32.mrb[70].mxu0 }
 0x4d7   :  { %v32509_v37 = vpack.c.bf16 %v20423_v31, %v20416_v29  ;;  %v21425_v57 = vand.u32 4294901760, %v21424_v23  ;;  %v21834_v42 = vand.u32 4294901760, %v26899_v50  ;;  %v4194_v25 = vpop.f32.mrb[71].mxu0  ;;  %v20925_v59 = vand.u32 4294901760, %v20924_v49 }
 0x4d8   :  { %35019 = vst [vmem:[#allocation55_spill] sm:$0xff] %v32506_v48  ;;  %v32511_v16 = vpack.c.bf16 %v20923_v51, %v20916_v22  ;;  %v21418_v63 = vand.u32 4294901760, %v21417_v3  ;;  %v21831_v7 = vand.u32 4294901760, %v4194_v25  ;;  %27043 = vmatmul.mubr.f32.vlgmr.msra.gmra.mrb[6].mxu1 %v32175_v13  ;;  %v20918_v5 = vand.u32 4294901760, %v20917_v19 }
 0x4d9   :  { %35020 = vst [vmem:[#allocation56_spill] sm:$0xff] %v32509_v37  ;;  %v32514_v61 = vpack.c.bf16 %v21424_v23, %v21417_v3  ;;  %v21426_v58 = vsub.f32 %v21424_v23, %v21425_v57  ;;  %v21926_v55 = vsub.f32 %v26899_v50, %v21834_v42  ;;  %28695 = vmatpush3.bf16.msra.mxu1 %v32213_v34 }
 0x4da   :  { %35021 = vst [vmem:[#allocation60_spill] sm:$0xff] %v32511_v16  ;;  %27049 = vmatprep.mubr.f32.mxu1 %v32111_v4  ;;  %v21419_v53 = vsub.f32 %v21417_v3, %v21418_v63  ;;  %v32518_v31 = vpack.c.bf16 %v21834_v42, %v21831_v7  ;;  %v21919_v29 = vsub.f32 %v4194_v25, %v21831_v7  ;;  %v26902_v51 = vpop.f32.mrb[72].mxu0 }
 0x4db   :  { %35022 = vst [vmem:[#allocation61_spill] sm:$0xff] %v32514_v61  ;;  %28697 = vmatprep.subr.bf16.mxu1 %v32199_v24  ;;  %v32521_v22 = vpack.c.bf16 %v20925_v59, %v20918_v5  ;;  %v21927_v49 = vand.u32 4294901760, %v21926_v55  ;;  %v22336_v48 = vand.u32 4294901760, %v26902_v51  ;;  %v4206_v19 = vpop.f32.mrb[73].mxu0  ;;  %v21427_v16 = vand.u32 4294901760, %v21426_v58 }
 0x4dc   :  { %35023 = vst [vmem:[#allocation64_spill] sm:$0xff] %v32518_v31  ;;  %v32523_v61 = vpack.c.bf16 %v21425_v57, %v21418_v63  ;;  %v21920_v23 = vand.u32 4294901760, %v21919_v29  ;;  %v22333_v50 = vand.u32 4294901760, %v4206_v19  ;;  %v21420_v34 = vand.u32 4294901760, %v21419_v53 }
 0x4dd   :  { %35024 = vst [vmem:[#allocation65_spill] sm:$0xff] %v32521_v22  ;;  %v32525_v30 = vpack.c.bf16 %v21926_v55, %v21919_v29  ;;  %v21928_v3 = vsub.f32 %v21926_v55, %v21927_v49  ;;  %v22428_v42 = vsub.f32 %v26902_v51, %v22336_v48 }
 0x4de   :  { %35025 = vst [vmem:[#allocation66_spill] sm:$0xff] %v32523_v61  ;;  %v21921_v31 = vsub.f32 %v21919_v29, %v21920_v23  ;;  %v32527_v25 = vpack.c.bf16 %v22336_v48, %v22333_v50  ;;  %v22421_v7 = vsub.f32 %v4206_v19, %v22333_v50  ;;  %v26905_v12 = vpop.f32.mrb[74].mxu0  ;;  %v32529_v5 = vpack.c.bf16 %v21427_v16, %v21420_v34 }
 0x4df   :  { %35026 = vst [vmem:[#allocation68_spill] sm:$0xff] %v32525_v30  ;;  %v22429_v59 = vand.u32 4294901760, %v22428_v42  ;;  %v22838_v22 = vand.u32 4294901760, %v26905_v12  ;;  %v4218_v37 = vpop.f32.mrb[75].mxu0  ;;  %v21929_v58 = vand.u32 4294901760, %v21928_v3  ;;  %v32531_v57 = vpack.c.bf16 %v21927_v49, %v21920_v23 }
 0x4e0   :  { %35027 = vst [vmem:[#allocation71_spill] sm:$0xff] %v32527_v25  ;;  %v22422_v63 = vand.u32 4294901760, %v22421_v7  ;;  %v22835_v61 = vand.u32 4294901760, %v4218_v37  ;;  %27050 = vmatmul.mubr.f32.vlgmr.msra.gmra.mrb[6].mxu1 %v32162_v33  ;;  %v21922_v53 = vand.u32 4294901760, %v21921_v31  ;;  %v32534_v55 = vpack.c.bf16 %v22428_v42, %v22421_v7 }
 0x4e1   :  { %35028 = vst [vmem:[#allocation73_spill] sm:$0xff] %v32531_v57  ;;  %v22430_v29 = vsub.f32 %v22428_v42, %v22429_v59  ;;  %v22930_v48 = vsub.f32 %v26905_v12, %v22838_v22  ;;  %28699 = vmatpush3.bf16.msra.mxu1 %v32199_v24  ;;  %27056 = vmatprep.mubr.f32.mxu1 %v32115_v27 }
 0x4e2   :  { %35029 = vst [vmem:[#allocation75_spill] sm:$0xff] %v32534_v55  ;;  %v22423_v16 = vsub.f32 %v22421_v7, %v22422_v63  ;;  %v32538_v51 = vpack.c.bf16 %v22838_v22, %v22835_v61  ;;  %v22923_v19 = vsub.f32 %v4218_v37, %v22835_v61  ;;  %28701 = vmatprep.subr.bf16.mxu1 %v32192_v41  ;;  %v26908_v49 = vpop.f32.mrb[76].mxu0 }
 0x4e3   :  { %v32541_v23 = vpack.c.bf16 %v21929_v58, %v21922_v53  ;;  %v22931_v50 = vand.u32 4294901760, %v22930_v48  ;;  %v23340_v34 = vand.u32 4294901760, %v26908_v49  ;;  %v4230_v31 = vpop.f32.mrb[77].mxu0  ;;  %v22431_v3 = vand.u32 4294901760, %v22430_v29 }
 0x4e4   :  { %35030 = vst [vmem:[#allocation77_spill] sm:$0xff] %v32538_v51  ;;  %v32543_v55 = vpack.c.bf16 %v22429_v59, %v22422_v63  ;;  %v22924_v12 = vand.u32 4294901760, %v22923_v19  ;;  %v23337_v42 = vand.u32 4294901760, %v4230_v31  ;;  %v22424_v24 = vand.u32 4294901760, %v22423_v16 }
 0x4e5   :  { %35031 = vst [vmem:[#allocation79_spill] sm:$0xff] %v32541_v23  ;;  %v32545_v25 = vpack.c.bf16 %v22930_v48, %v22923_v19  ;;  %v22932_v7 = vsub.f32 %v22930_v48, %v22931_v50  ;;  %v23432_v22 = vsub.f32 %v26908_v49, %v23340_v34 }
 0x4e6   :  { %35032 = vst [vmem:[#allocation81_spill] sm:$0xff] %v32543_v55  ;;  %v22925_v51 = vsub.f32 %v22923_v19, %v22924_v12  ;;  %v32547_v37 = vpack.c.bf16 %v23340_v34, %v23337_v42  ;;  %v23425_v61 = vsub.f32 %v4230_v31, %v23337_v42  ;;  %v26911_v57 = vpop.f32.mrb[78].mxu0  ;;  %v32549_v58 = vpack.c.bf16 %v22431_v3, %v22424_v24 }
 0x4e7   :  { %35033 = vst [vmem:[#allocation82_spill] sm:$0xff] %v32545_v25  ;;  %v23433_v53 = vand.u32 4294901760, %v23432_v22  ;;  %v23842_v30 = vand.u32 4294901760, %v26911_v57  ;;  %v4242_v23 = vpop.f32.mrb[79].mxu0  ;;  %v22933_v29 = vand.u32 4294901760, %v22932_v7  ;;  %v32551_v59 = vpack.c.bf16 %v22931_v50, %v22924_v12 }
 0x4e8   :  { %35034 = vst [vmem:[#allocation84_spill] sm:$0xff] %v32547_v37  ;;  %35035 = vst [vmem:[#allocation85_spill] sm:$0xff] %v32549_v58  ;;  %v23426_v63 = vand.u32 4294901760, %v23425_v61  ;;  %v23839_v55 = vand.u32 4294901760, %v4242_v23  ;;  %27057 = vmatmul.mubr.f32.vlgmr.msra.gmra.mrb[6].mxu1 %v32165_v6  ;;  %v22926_v16 = vand.u32 4294901760, %v22925_v51  ;;  %v32554_v48 = vpack.c.bf16 %v23432_v22, %v23425_v61 }
 0x4e9   :  { %35036 = vst [vmem:[#allocation89_spill] sm:$0xff] %v32551_v59  ;;  %v23434_v19 = vsub.f32 %v23432_v22, %v23433_v53  ;;  %v23934_v49 = vsub.f32 %v26911_v57, %v23842_v30  ;;  %28703 = vmatpush3.bf16.msra.mxu1 %v32192_v41  ;;  %27063 = vmatprep.mubr.f32.mxu1 %v32119_v45 }
 0x4ea   :  { %35037 = vst [vmem:[#allocation91_spill] sm:$0xff] %v32554_v48  ;;  %v23427_v34 = vsub.f32 %v23425_v61, %v23426_v63  ;;  %v32558_v31 = vpack.c.bf16 %v23842_v30, %v23839_v55  ;;  %v23927_v3 = vsub.f32 %v4242_v23, %v23839_v55  ;;  %28705 = vmatprep.subr.bf16.mxu1 %v32207_v62 }
 0x4eb   :  { %v32561_v50 = vpack.c.bf16 %v22933_v29, %v22926_v16  ;;  %v23935_v12 = vand.u32 4294901760, %v23934_v49  ;;  %v23435_v42 = vand.u32 4294901760, %v23434_v19  ;;  %v32563_v24 = vpack.c.bf16 %v23433_v53, %v23426_v63  ;;  %v35054_v53 = vld [vmem:[#allocation30_spill] sm:$0xff]  ;;  %v35056_v63 = vld [vmem:[#allocation36_spill] sm:$0xff]  ;;  %v35057_v16 = vld [vmem:[#allocation39_spill] sm:$0xff] }
 0x4ec   :  { %35038 = vst [vmem:[#allocation94_spill] sm:$0xff] %v32558_v31  ;;  %v23928_v51 = vand.u32 4294901760, %v23927_v3  ;;  %v23428_v7 = vand.u32 4294901760, %v23427_v34  ;;  %v32565_v22 = vpack.c.bf16 %v23934_v49, %v23927_v3  ;;  %v35055_v29 = vld [vmem:[#allocation46_spill] sm:$0xff] }
 0x4ed   :  { %35039 = vst [vmem:[#allocation95_spill] sm:$0xff] %v32561_v50  ;;  %35040 = vst [vmem:[#allocation97_spill] sm:$0xff] %v32563_v24  ;;  %v23936_v57 = vsub.f32 %v23934_v49, %v23935_v12  ;;  %v35058_v49 = vld [vmem:[#allocation37_spill] sm:$0xff]  ;;  %v35059_v34 = vld [vmem:[#allocation42_spill] sm:$0xff] }
 0x4ee   :  { %35041 = vst [vmem:[#allocation98_spill] sm:$0xff] %v32565_v22  ;;  %v23929_v48 = vsub.f32 %v23927_v3, %v23928_v51  ;;  %v32567_v37 = vpack.c.bf16 %v23435_v42, %v23428_v7  ;;  %v32569_v61 = vpack.c.bf16 %v23935_v12, %v23928_v51  ;;  %v35060_v3 = vld [vmem:[#allocation47_spill] sm:$0xff]  ;;  %v35063_v7 = vld [vmem:[#allocation52_spill] sm:$0xff] }
 0x4ef   :  { %v23937_v30 = vand.u32 4294901760, %v23936_v57  ;;  %v35061_v42 = vld [vmem:[#allocation43_spill] sm:$0xff]  ;;  %v35064_v57 = vld [vmem:[#allocation54_spill] sm:$0xff] }
 0x4f0   :  { %35042 = vst [vmem:[#allocation100_spill] sm:$0xff] %v32567_v37  ;;  %35043 = vst [vmem:[#allocation103_spill] sm:$0xff] %v32569_v61  ;;  %v23930_v55 = vand.u32 4294901760, %v23929_v48  ;;  %27064 = vmatmul.mubr.f32.vlgmr.msra.gmra.mrb[6].mxu1 %v32168_v39  ;;  %v35062_v51 = vld [vmem:[#allocation59_spill] sm:$0xff] }
 0x4f1   :  { %28707 = vmatpush3.bf16.msra.mxu1 %v32207_v62  ;;  %27070 = vmatprep.mubr.f32.mxu1 %v32111_v4 }
 0x4f2   :  { %28709 = vmatprep.subr.bf16.mxu1 %v32192_v41  ;;  %v32575_v23 = vpack.c.bf16 %v23937_v30, %v23930_v55 }
 0x4f4   :  { %35044 = vst [vmem:[#allocation105_spill] sm:$0xff] %v32575_v23 }
 0x4f8   :  { %27071 = vmatmul.mubr.f32.vlgmr.msra.gmra.mrb[6].mxu1 %v32162_v33 }
 0x4f9   :  { %28711 = vmatpush3.bf16.msra.mxu1 %v32192_v41  ;;  %27077 = vmatprep.mubr.f32.mxu1 %v32111_v4 }
 0x4fa   :  { %28713 = vmatprep.subr.bf16.mxu1 %v32202_v18 }
 0x500   :  { %27078 = vmatmul.mubr.f32.vlgmr.msra.gmra.mrb[6].mxu1 %v32162_v33 }
 0x501   :  { %28715 = vmatpush3.bf16.msra.mxu1 %v32202_v18  ;;  %27084 = vmatprep.mubr.f32.mxu1 %v32125_v40 }
 0x502   :  { %28717 = vmatprep.subr.bf16.mxu1 %v32225_v38 }
 0x504   :  { %27085 = vmatmul.mubr.f32.vlgmr.msra.gmra.mrb[8].mxu1 %v32175_v13 }
 0x505   :  { %28719 = vmatpush3.bf16.msra.mxu1 %v32225_v38  ;;  %27091 = vmatprep.mubr.f32.mxu1 %v32111_v4 }
 0x506   :  { %28721 = vmatprep.subr.bf16.mxu1 %v32209_v17 }
 0x50c   :  { %27092 = vmatmul.mubr.f32.vlgmr.msra.gmra.mrb[8].mxu1 %v32162_v33 }
 0x50d   :  { %28723 = vmatpush3.bf16.msra.mxu1 %v32209_v17  ;;  %27098 = vmatprep.mubr.f32.mxu1 %v32115_v27 }
 0x50e   :  { %28725 = vmatprep.subr.bf16.mxu1 %v32202_v18 }
 0x514   :  { %27099 = vmatmul.mubr.f32.vlgmr.msra.gmra.mrb[8].mxu1 %v32165_v6 }
 0x515   :  { %28727 = vmatpush3.bf16.msra.mxu1 %v32202_v18  ;;  %27105 = vmatprep.mubr.f32.mxu1 %v32119_v45 }
 0x516   :  { %28729 = vmatprep.subr.bf16.mxu1 %v32215_v36 }
 0x51c   :  { %27106 = vmatmul.mubr.f32.vlgmr.msra.gmra.mrb[8].mxu1 %v32168_v39 }
 0x51d   :  { %28731 = vmatpush3.bf16.msra.mxu1 %v32215_v36  ;;  %27112 = vmatprep.mubr.f32.mxu1 %v32111_v4 }
 0x51e   :  { %28733 = vmatprep.subr.bf16.mxu1 %v32202_v18 }
 0x524   :  { %27113 = vmatmul.mubr.f32.vlgmr.msra.gmra.mrb[8].mxu1 %v32162_v33 }
 0x525   :  { %28735 = vmatpush3.bf16.msra.mxu1 %v32202_v18  ;;  %27119 = vmatprep.mubr.f32.mxu1 %v32111_v4 }
 0x526   :  { %28737 = vmatprep.subr.bf16.mxu1 %v32211_v43 }
 0x52c   :  { %27120 = vmatmul.mubr.f32.vlgmr.msra.gmra.mrb[8].mxu1 %v32162_v33 }
 0x52d   :  { %28739 = vmatpush3.bf16.msra.mxu1 %v32211_v43  ;;  %27126 = vmatprep.mubr.f32.mxu1 %v32125_v40 }
 0x52e   :  { %28741 = vmatprep.subr.bf16.mxu1 %v32233_v47 }
 0x530   :  { %27127 = vmatmul.mubr.f32.vlgmr.msra.gmra.mrb[10].mxu1 %v32175_v13 }
 0x531   :  { %28743 = vmatpush3.bf16.msra.mxu1 %v32233_v47  ;;  %27133 = vmatprep.mubr.f32.mxu1 %v32111_v4  ;;  %v35049_v47 = vld [vmem:[#allocation26_spill] sm:$0xff] }
 0x532   :  { %28745 = vmatprep.subr.bf16.mxu1 %v32218_v35 }
 0x538   :  { %27134 = vmatmul.mubr.f32.vlgmr.msra.gmra.mrb[10].mxu1 %v32162_v33 }
 0x539   :  { %28747 = vmatpush3.bf16.msra.mxu1 %v32218_v35  ;;  %27140 = vmatprep.mubr.f32.mxu1 %v32115_v27  ;;  %v35045_v35 = vld [vmem:[#allocation16_spill] sm:$0xff] }
 0x53a   :  { %28749 = vmatprep.subr.bf16.mxu1 %v32211_v43 }
 0x540   :  { %27141 = vmatmul.mubr.f32.vlgmr.msra.gmra.mrb[10].mxu1 %v32165_v6 }
 0x541   :  { %28751 = vmatpush3.bf16.msra.mxu1 %v32211_v43  ;;  %27147 = vmatprep.mubr.f32.mxu1 %v32119_v45 }
 0x542   :  { %28753 = vmatprep.subr.bf16.mxu1 %v32227_v0 }
 0x548   :  { %27148 = vmatmul.mubr.f32.vlgmr.msra.gmra.mrb[10].mxu1 %v32168_v39 }
 0x549   :  { %28755 = vmatpush3.bf16.msra.mxu1 %v32227_v0  ;;  %27154 = vmatprep.mubr.f32.mxu1 %v32111_v4 }
 0x54a   :  { %28757 = vmatprep.subr.bf16.mxu1 %v32211_v43 }
 0x54f   :  { %v32625_v41 = vpop.f32.mrb[0].mxu1 }
 0x550   :  { %v32627_v18 = vpop.f32.mrb[1].mxu1  ;;  %27155 = vmatmul.mubr.f32.vlgmr.msra.gmra.mrb[10].mxu1 %v32162_v33  ;;  %v32851_v55 = vmul.f32 %v32625_v41, %v32625_v41 }
 0x551   :  { %28759 = vmatpush3.bf16.msra.mxu1 %v32211_v43  ;;  %27161 = vmatprep.mubr.f32.mxu1 %v32111_v4 }
 0x552   :  { %28761 = vmatprep.subr.bf16.mxu1 %v32222_v26 }
 0x558   :  { %27162 = vmatmul.mubr.f32.vlgmr.msra.gmra.mrb[10].mxu1 %v32162_v33 }
 0x559   :  { %28763 = vmatpush3.bf16.msra.mxu1 %v32222_v26  ;;  %27168 = vmatprep.mubr.f32.mxu1 %v32125_v40 }
 0x55a   :  { %28765 = vmatprep.subr.bf16.mxu1 %v32245_v46 }
 0x55c   :  { %27169 = vmatmul.mubr.f32.vlgmr.msra.gmra.mrb[12].mxu1 %v32175_v13 }
 0x55d   :  { %28767 = vmatpush3.bf16.msra.mxu1 %v32245_v46  ;;  %27175 = vmatprep.mubr.f32.mxu1 %v32111_v4  ;;  %v35051_v46 = vld [vmem:[#allocation38_spill] sm:$0xff] }
 0x55e   :  { %28769 = vmatprep.subr.bf16.mxu1 %v32229_v8 }
 0x564   :  { %27176 = vmatmul.mubr.f32.vlgmr.msra.gmra.mrb[12].mxu1 %v32162_v33 }
 0x565   :  { %28771 = vmatpush3.bf16.msra.mxu1 %v32229_v8  ;;  %27182 = vmatprep.mubr.f32.mxu1 %v32115_v27  ;;  %v35047_v8 = vld [vmem:[#allocation19_spill] sm:$0xff] }
 0x566   :  { %28773 = vmatprep.subr.bf16.mxu1 %v32222_v26 }
 0x56c   :  { %27183 = vmatmul.mubr.f32.vlgmr.msra.gmra.mrb[12].mxu1 %v32165_v6 }
 0x56d   :  { %28775 = vmatpush3.bf16.msra.mxu1 %v32222_v26  ;;  %27189 = vmatprep.mubr.f32.mxu1 %v32119_v45 }
 0x56e   :  { %28777 = vmatprep.subr.bf16.mxu1 %v32235_v54 }
 0x574   :  { %27190 = vmatmul.mubr.f32.vlgmr.msra.gmra.mrb[12].mxu1 %v32168_v39 }
 0x575   :  { %28779 = vmatpush3.bf16.msra.mxu1 %v32235_v54  ;;  %27196 = vmatprep.mubr.f32.mxu1 %v32111_v4 }
 0x576   :  { %28781 = vmatprep.subr.bf16.mxu1 %v32222_v26 }
 0x57b   :  { %v32653_v62 = vpop.f32.mrb[2].mxu1 }
 0x57c   :  { %v32655_v17 = vpop.f32.mrb[3].mxu1  ;;  %27197 = vmatmul.mubr.f32.vlgmr.msra.gmra.mrb[12].mxu1 %v32162_v33 }
 0x57d   :  { %28783 = vmatpush3.bf16.msra.mxu1 %v32222_v26  ;;  %27203 = vmatprep.mubr.f32.mxu1 %v32111_v4  ;;  %v35046_v26 = vld [vmem:[#allocation21_spill] sm:$0xff] }
 0x57e   :  { %28785 = vmatprep.subr.bf16.mxu1 %v32231_v28 }
 0x584   :  { %27204 = vmatmul.mubr.f32.vlgmr.msra.gmra.mrb[12].mxu1 %v32162_v33 }
 0x585   :  { %28787 = vmatpush3.bf16.msra.mxu1 %v32231_v28  ;;  %27210 = vmatprep.mubr.f32.mxu1 %v32125_v40 }
 0x586   :  { %28789 = vmatprep.subr.bf16.mxu1 %v32253_v2 }
 0x588   :  { %27211 = vmatmul.mubr.f32.vlgmr.msra.gmra.mrb[14].mxu1 %v32175_v13 }
 0x589   :  { %28791 = vmatpush3.bf16.msra.mxu1 %v32253_v2  ;;  %27217 = vmatprep.mubr.f32.mxu1 %v32111_v4  ;;  %v35053_v2 = vld [vmem:[#allocation31_spill] sm:$0xff] }
 0x58a   :  { %28793 = vmatprep.subr.bf16.mxu1 %v32238_v52 }
 0x590   :  { %27218 = vmatmul.mubr.f32.vlgmr.msra.gmra.mrb[14].mxu1 %v32162_v33 }
 0x591   :  { %28795 = vmatpush3.bf16.msra.mxu1 %v32238_v52  ;;  %27224 = vmatprep.mubr.f32.mxu1 %v32115_v27 }
 0x592   :  { %28797 = vmatprep.subr.bf16.mxu1 %v32231_v28 }
 0x598   :  { %27225 = vmatmul.mubr.f32.vlgmr.msra.gmra.mrb[14].mxu1 %v32165_v6 }
 0x599   :  { %28799 = vmatpush3.bf16.msra.mxu1 %v32231_v28  ;;  %27231 = vmatprep.mubr.f32.mxu1 %v32119_v45 }
 0x59a   :  { %28801 = vmatprep.subr.bf16.mxu1 %v32247_v11 }
 0x5a0   :  { %27232 = vmatmul.mubr.f32.vlgmr.msra.gmra.mrb[14].mxu1 %v32168_v39 }
 0x5a1   :  { %28803 = vmatpush3.bf16.msra.mxu1 %v32247_v11  ;;  %27238 = vmatprep.mubr.f32.mxu1 %v32111_v4  ;;  %v35052_v11 = vld [vmem:[#allocation27_spill] sm:$0xff] }
 0x5a2   :  { %28805 = vmatprep.subr.bf16.mxu1 %v32231_v28 }
 0x5a7   :  { %v32681_v43 = vpop.f32.mrb[4].mxu1 }
 0x5a8   :  { %v32683_v36 = vpop.f32.mrb[5].mxu1  ;;  %27239 = vmatmul.mubr.f32.vlgmr.msra.gmra.mrb[14].mxu1 %v32162_v33 }
 0x5a9   :  { %28807 = vmatpush3.bf16.msra.mxu1 %v32231_v28  ;;  %27245 = vmatprep.mubr.f32.mxu1 %v32111_v4  ;;  %v35048_v28 = vld [vmem:[#allocation22_spill] sm:$0xff] }
 0x5aa   :  { %28809 = vmatprep.subr.bf16.mxu1 %v32242_v1 }
 0x5b0   :  { %27246 = vmatmul.mubr.f32.vlgmr.msra.gmra.mrb[14].mxu1 %v32162_v33 }
 0x5b1   :  { %28811 = vmatpush3.bf16.msra.mxu1 %v32242_v1  ;;  %27252 = vmatprep.mubr.f32.mxu1 %v32125_v40 }
 0x5b2   :  { %28813 = vmatprep.subr.bf16.mxu1 %v32265_v9 }
 0x5b4   :  { %27253 = vmatmul.mubr.f32.vlgmr.msra.gmra.mrb[16].mxu1 %v32175_v13 }
 0x5b5   :  { %28815 = vmatpush3.bf16.msra.mxu1 %v32265_v9  ;;  %27259 = vmatprep.mubr.f32.mxu1 %v32111_v4 }
 0x5b6   :  { %28817 = vmatprep.subr.bf16.mxu1 %v35045_v35 }
 0x5bc   :  { %27260 = vmatmul.mubr.f32.vlgmr.msra.gmra.mrb[16].mxu1 %v32162_v33 }
 0x5bd   :  { %28819 = vmatpush3.bf16.msra.mxu1 %v35045_v35  ;;  %27266 = vmatprep.mubr.f32.mxu1 %v32115_v27 }
 0x5be   :  { %28821 = vmatprep.subr.bf16.mxu1 %v32242_v1 }
 0x5c4   :  { %27267 = vmatmul.mubr.f32.vlgmr.msra.gmra.mrb[16].mxu1 %v32165_v6 }
 0x5c5   :  { %28823 = vmatpush3.bf16.msra.mxu1 %v32242_v1  ;;  %27273 = vmatprep.mubr.f32.mxu1 %v32119_v45 }
 0x5c6   :  { %28825 = vmatprep.subr.bf16.mxu1 %v35046_v26 }
 0x5cc   :  { %27274 = vmatmul.mubr.f32.vlgmr.msra.gmra.mrb[16].mxu1 %v32168_v39 }
 0x5cd   :  { %28827 = vmatpush3.bf16.msra.mxu1 %v35046_v26  ;;  %27280 = vmatprep.mubr.f32.mxu1 %v32111_v4 }
 0x5ce   :  { %28829 = vmatprep.subr.bf16.mxu1 %v32242_v1 }
 0x5d3   :  { %v32709_v38 = vpop.f32.mrb[6].mxu1 }
 0x5d4   :  { %v32711_v0 = vpop.f32.mrb[7].mxu1  ;;  %27281 = vmatmul.mubr.f32.vlgmr.msra.gmra.mrb[16].mxu1 %v32162_v33 }
 0x5d5   :  { %28831 = vmatpush3.bf16.msra.mxu1 %v32242_v1  ;;  %27287 = vmatprep.mubr.f32.mxu1 %v32111_v4  ;;  %v35050_v1 = vld [vmem:[#allocation23_spill] sm:$0xff] }
 0x5d6   :  { %28833 = vmatprep.subr.bf16.mxu1 %v35047_v8 }
 0x5dc   :  { %27288 = vmatmul.mubr.f32.vlgmr.msra.gmra.mrb[16].mxu1 %v32162_v33 }
 0x5dd   :  { %28835 = vmatpush3.bf16.msra.mxu1 %v35047_v8  ;;  %27294 = vmatprep.mubr.f32.mxu1 %v32125_v40 }
 0x5de   :  { %28837 = vmatprep.subr.bf16.mxu1 %v32273_v21 }
 0x5e0   :  { %27295 = vmatmul.mubr.f32.vlgmr.msra.gmra.mrb[18].mxu1 %v32175_v13 }
 0x5e1   :  { %28839 = vmatpush3.bf16.msra.mxu1 %v32273_v21  ;;  %27301 = vmatprep.mubr.f32.mxu1 %v32111_v4 }
 0x5e2   :  { %28841 = vmatprep.subr.bf16.mxu1 %v35048_v28 }
 0x5e8   :  { %27302 = vmatmul.mubr.f32.vlgmr.msra.gmra.mrb[18].mxu1 %v32162_v33 }
 0x5e9   :  { %28843 = vmatpush3.bf16.msra.mxu1 %v35048_v28  ;;  %27308 = vmatprep.mubr.f32.mxu1 %v32115_v27  ;;  %v32861_v28 = vmul.f32 %v32627_v18, %v32627_v18 }
 0x5ea   :  { %28845 = vmatprep.subr.bf16.mxu1 %v35047_v8 }
 0x5f0   :  { %27309 = vmatmul.mubr.f32.vlgmr.msra.gmra.mrb[18].mxu1 %v32165_v6 }
 0x5f1   :  { %28847 = vmatpush3.bf16.msra.mxu1 %v35047_v8  ;;  %27315 = vmatprep.mubr.f32.mxu1 %v32119_v45 }
 0x5f2   :  { %28849 = vmatprep.subr.bf16.mxu1 %v35049_v47 }
 0x5f8   :  { %27316 = vmatmul.mubr.f32.vlgmr.msra.gmra.mrb[18].mxu1 %v32168_v39 }
 0x5f9   :  { %28851 = vmatpush3.bf16.msra.mxu1 %v35049_v47  ;;  %27322 = vmatprep.mubr.f32.mxu1 %v32111_v4 }
 0x5fa   :  { %28853 = vmatprep.subr.bf16.mxu1 %v35047_v8 }
 0x5ff   :  { %v32737_v54 = vpop.f32.mrb[8].mxu1 }
 0x600   :  { %v32739_v52 = vpop.f32.mrb[9].mxu1  ;;  %27323 = vmatmul.mubr.f32.vlgmr.msra.gmra.mrb[18].mxu1 %v32162_v33 }
 0x601   :  { %28855 = vmatpush3.bf16.msra.mxu1 %v35047_v8  ;;  %27329 = vmatprep.mubr.f32.mxu1 %v32111_v4 }
 0x602   :  { %28857 = vmatprep.subr.bf16.mxu1 %v35050_v1 }
 0x608   :  { %27330 = vmatmul.mubr.f32.vlgmr.msra.gmra.mrb[18].mxu1 %v32162_v33 }
 0x609   :  { %28859 = vmatpush3.bf16.msra.mxu1 %v35050_v1  ;;  %27336 = vmatprep.mubr.f32.mxu1 %v32125_v40 }
 0x60a   :  { %28861 = vmatprep.subr.bf16.mxu1 %v35051_v46 }
 0x60c   :  { %27337 = vmatmul.mubr.f32.vlgmr.msra.gmra.mrb[20].mxu1 %v32175_v13 }
 0x60d   :  { %28863 = vmatpush3.bf16.msra.mxu1 %v35051_v46  ;;  %27343 = vmatprep.mubr.f32.mxu1 %v32111_v4  ;;  %v35067_v46 = vld [vmem:[#allocation53_spill] sm:$0xff] }
 0x60e   :  { %28865 = vmatprep.subr.bf16.mxu1 %v35052_v11 }
 0x614   :  { %27344 = vmatmul.mubr.f32.vlgmr.msra.gmra.mrb[20].mxu1 %v32162_v33 }
 0x615   :  { %28867 = vmatpush3.bf16.msra.mxu1 %v35052_v11  ;;  %27350 = vmatprep.mubr.f32.mxu1 %v32115_v27 }
 0x616   :  { %28869 = vmatprep.subr.bf16.mxu1 %v35050_v1 }
 0x61c   :  { %27351 = vmatmul.mubr.f32.vlgmr.msra.gmra.mrb[20].mxu1 %v32165_v6 }
 0x61d   :  { %28871 = vmatpush3.bf16.msra.mxu1 %v35050_v1  ;;  %27357 = vmatprep.mubr.f32.mxu1 %v32119_v45 }
 0x61e   :  { %28873 = vmatprep.subr.bf16.mxu1 %v35053_v2 }
 0x624   :  { %27358 = vmatmul.mubr.f32.vlgmr.msra.gmra.mrb[20].mxu1 %v32168_v39 }
 0x625   :  { %28875 = vmatpush3.bf16.msra.mxu1 %v35053_v2  ;;  %27364 = vmatprep.mubr.f32.mxu1 %v32111_v4  ;;  %v35069_v2 = vld [vmem:[#allocation57_spill] sm:$0xff] }
 0x626   :  { %28877 = vmatprep.subr.bf16.mxu1 %v35050_v1 }
 0x62b   :  { %v32765_v9 = vpop.f32.mrb[10].mxu1 }
 0x62c   :  { %v32767_v21 = vpop.f32.mrb[11].mxu1  ;;  %27365 = vmatmul.mubr.f32.vlgmr.msra.gmra.mrb[20].mxu1 %v32162_v33 }
 0x62d   :  { %28879 = vmatpush3.bf16.msra.mxu1 %v35050_v1  ;;  %27371 = vmatprep.mubr.f32.mxu1 %v32111_v4 }
 0x62e   :  { %28881 = vmatprep.subr.bf16.mxu1 %v35054_v53 }
 0x634   :  { %27372 = vmatmul.mubr.f32.vlgmr.msra.gmra.mrb[20].mxu1 %v32162_v33 }
 0x635   :  { %28883 = vmatpush3.bf16.msra.mxu1 %v35054_v53  ;;  %27378 = vmatprep.mubr.f32.mxu1 %v32125_v40 }
 0x636   :  { %28885 = vmatprep.subr.bf16.mxu1 %v35055_v29 }
 0x638   :  { %27379 = vmatmul.mubr.f32.vlgmr.msra.gmra.mrb[22].mxu1 %v32175_v13 }
 0x639   :  { %28887 = vmatpush3.bf16.msra.mxu1 %v35055_v29  ;;  %27385 = vmatprep.mubr.f32.mxu1 %v32111_v4 }
 0x63a   :  { %28889 = vmatprep.subr.bf16.mxu1 %v35056_v63 }
 0x640   :  { %27386 = vmatmul.mubr.f32.vlgmr.msra.gmra.mrb[22].mxu1 %v32162_v33 }
 0x641   :  { %28891 = vmatpush3.bf16.msra.mxu1 %v35056_v63  ;;  %27392 = vmatprep.mubr.f32.mxu1 %v32115_v27  ;;  %v32901_v63 = vmul.f32 %v32653_v62, %v32653_v62 }
 0x642   :  { %28893 = vmatprep.subr.bf16.mxu1 %v35054_v53 }
 0x648   :  { %27393 = vmatmul.mubr.f32.vlgmr.msra.gmra.mrb[22].mxu1 %v32165_v6 }
 0x649   :  { %28895 = vmatpush3.bf16.msra.mxu1 %v35054_v53  ;;  %27399 = vmatprep.mubr.f32.mxu1 %v32119_v45 }
 0x64a   :  { %28897 = vmatprep.subr.bf16.mxu1 %v35057_v16 }
 0x650   :  { %27400 = vmatmul.mubr.f32.vlgmr.msra.gmra.mrb[22].mxu1 %v32168_v39 }
 0x651   :  { %28899 = vmatpush3.bf16.msra.mxu1 %v35057_v16  ;;  %27406 = vmatprep.mubr.f32.mxu1 %v32111_v4 }
 0x652   :  { %28901 = vmatprep.subr.bf16.mxu1 %v35054_v53 }
 0x657   :  { %v32793_v48 = vpop.f32.mrb[12].mxu1 }
 0x658   :  { %v32795_v19 = vpop.f32.mrb[13].mxu1  ;;  %27407 = vmatmul.mubr.f32.vlgmr.msra.gmra.mrb[22].mxu1 %v32162_v33 }
 0x659   :  { %28903 = vmatpush3.bf16.msra.mxu1 %v35054_v53  ;;  %27413 = vmatprep.mubr.f32.mxu1 %v32111_v4  ;;  %v35070_v53 = vld [vmem:[#allocation62_spill] sm:$0xff] }
 0x65a   :  { %28905 = vmatprep.subr.bf16.mxu1 %v35058_v49 }
 0x660   :  { %27414 = vmatmul.mubr.f32.vlgmr.msra.gmra.mrb[22].mxu1 %v32162_v33 }
 0x661   :  { %28907 = vmatpush3.bf16.msra.mxu1 %v35058_v49  ;;  %27420 = vmatprep.mubr.f32.mxu1 %v32125_v40 }
 0x662   :  { %28909 = vmatprep.subr.bf16.mxu1 %v32305_v56 }
 0x664   :  { %27421 = vmatmul.mubr.f32.vlgmr.msra.gmra.mrb[24].mxu1 %v32175_v13 }
 0x665   :  { %28911 = vmatpush3.bf16.msra.mxu1 %v32305_v56  ;;  %27427 = vmatprep.mubr.f32.mxu1 %v32111_v4 }
 0x666   :  { %28913 = vmatprep.subr.bf16.mxu1 %v35059_v34 }
 0x66c   :  { %27428 = vmatmul.mubr.f32.vlgmr.msra.gmra.mrb[24].mxu1 %v32162_v33 }
 0x66d   :  { %28915 = vmatpush3.bf16.msra.mxu1 %v35059_v34  ;;  %27434 = vmatprep.mubr.f32.mxu1 %v32115_v27 }
 0x66e   :  { %28917 = vmatprep.subr.bf16.mxu1 %v35058_v49 }
 0x674   :  { %27435 = vmatmul.mubr.f32.vlgmr.msra.gmra.mrb[24].mxu1 %v32165_v6 }
 0x675   :  { %28919 = vmatpush3.bf16.msra.mxu1 %v35058_v49  ;;  %27441 = vmatprep.mubr.f32.mxu1 %v32119_v45 }
 0x676   :  { %28921 = vmatprep.subr.bf16.mxu1 %v35060_v3 }
 0x67c   :  { %27442 = vmatmul.mubr.f32.vlgmr.msra.gmra.mrb[24].mxu1 %v32168_v39 }
 0x67d   :  { %28923 = vmatpush3.bf16.msra.mxu1 %v35060_v3  ;;  %27448 = vmatprep.mubr.f32.mxu1 %v32111_v4  ;;  %v32911_v3 = vmul.f32 %v32655_v17, %v32655_v17 }
 0x67e   :  { %28925 = vmatprep.subr.bf16.mxu1 %v35058_v49 }
 0x683   :  { %v32821_v56 = vpop.f32.mrb[14].mxu1 }
 0x684   :  { %v32823_v12 = vpop.f32.mrb[15].mxu1  ;;  %27449 = vmatmul.mubr.f32.vlgmr.msra.gmra.mrb[24].mxu1 %v32162_v33 }
 0x685   :  { %28927 = vmatpush3.bf16.msra.mxu1 %v35058_v49  ;;  %27455 = vmatprep.mubr.f32.mxu1 %v32111_v4 }
 0x686   :  { %28929 = vmatprep.subr.bf16.mxu1 %v35061_v42 }
 0x68c   :  { %27456 = vmatmul.mubr.f32.vlgmr.msra.gmra.mrb[24].mxu1 %v32162_v33 }
 0x68d   :  { %28931 = vmatpush3.bf16.msra.mxu1 %v35061_v42  ;;  %27462 = vmatprep.mubr.f32.mxu1 %v32125_v40 }
 0x68e   :  { %28933 = vmatprep.subr.bf16.mxu1 %v35062_v51 }
 0x690   :  { %27463 = vmatmul.mubr.f32.vlgmr.msra.gmra.mrb[26].mxu1 %v32175_v13 }
 0x691   :  { %28935 = vmatpush3.bf16.msra.mxu1 %v35062_v51  ;;  %27469 = vmatprep.mubr.f32.mxu1 %v32111_v4 }
 0x692   :  { %28937 = vmatprep.subr.bf16.mxu1 %v35063_v7 }
 0x698   :  { %27470 = vmatmul.mubr.f32.vlgmr.msra.gmra.mrb[26].mxu1 %v32162_v33 }
 0x699   :  { %28939 = vmatpush3.bf16.msra.mxu1 %v35063_v7  ;;  %27476 = vmatprep.mubr.f32.mxu1 %v32115_v27  ;;  %v35073_v7 = vld [vmem:[#allocation58_spill] sm:$0xff] }
 0x69a   :  { %28941 = vmatprep.subr.bf16.mxu1 %v35061_v42 }
 0x6a0   :  { %27477 = vmatmul.mubr.f32.vlgmr.msra.gmra.mrb[26].mxu1 %v32165_v6 }
 0x6a1   :  { %28943 = vmatpush3.bf16.msra.mxu1 %v35061_v42  ;;  %27483 = vmatprep.mubr.f32.mxu1 %v32119_v45 }
 0x6a2   :  { %28945 = vmatprep.subr.bf16.mxu1 %v35064_v57 }
 0x6a8   :  { %27484 = vmatmul.mubr.f32.vlgmr.msra.gmra.mrb[26].mxu1 %v32168_v39 }
 0x6a9   :  { %28947 = vmatpush3.bf16.msra.mxu1 %v35064_v57  ;;  %27490 = vmatprep.mubr.f32.mxu1 %v32111_v4 }
 0x6aa   :  { %28949 = vmatprep.subr.bf16.mxu1 %v35061_v42 }
 0x6af   :  { %v27289_v30 = vpop.f32.mrb[16].mxu1 }
 0x6b0   :  { %v32853_v35 = vmul.f32 %v27289_v30, %v27289_v30  ;;  %v32856_v26 = vmul.f32 %v27289_v30, %v32625_v41  ;;  %v8768_v8 = vpop.f32.mrb[17].mxu1  ;;  %27491 = vmatmul.mubr.f32.vlgmr.msra.gmra.mrb[26].mxu1 %v32162_v33  ;;  %v35075_v30 = vld [vmem:[#allocation63_spill] sm:$0xff] }
 0x6b1   :  { %v32863_v47 = vmul.f32 %v8768_v8, %v8768_v8  ;;  %v32866_v1 = vmul.f32 %v8768_v8, %v32627_v18  ;;  %28951 = vmatpush3.bf16.msra.mxu1 %v35061_v42  ;;  %27497 = vmatprep.mubr.f32.mxu1 %v32111_v4  ;;  %v35068_v18 = vld [vmem:[#allocation69_spill] sm:$0xff]  ;;  %v35076_v8 = vld [vmem:[#allocation70_spill] sm:$0xff] }
 0x6b2   :  { %35065 = vst [vmem:[#allocation106_spill] sm:$0xff] %v32856_v26  ;;  %v32872_v41 = vadd.f32 %v32853_v35, %v32851_v55  ;;  %28953 = vmatprep.subr.bf16.mxu1 %v35067_v46 }
 0x6b3   :  { %35066 = vst [vmem:[#allocation109_spill] sm:$0xff] %v32866_v1  ;;  %v32877_v11 = vadd.f32 %v32863_v47, %v32861_v28 }
 0x6b8   :  { %27498 = vmatmul.mubr.f32.vlgmr.msra.gmra.mrb[26].mxu1 %v32162_v33 }
 0x6b9   :  { %28955 = vmatpush3.bf16.msra.mxu1 %v35067_v46  ;;  %27504 = vmatprep.mubr.f32.mxu1 %v32125_v40 }
 0x6ba   :  { %28957 = vmatprep.subr.bf16.mxu1 %v35068_v18 }
 0x6bc   :  { %27505 = vmatmul.mubr.f32.vlgmr.msra.gmra.mrb[28].mxu1 %v32175_v13 }
 0x6bd   :  { %28959 = vmatpush3.bf16.msra.mxu1 %v35068_v18  ;;  %27511 = vmatprep.mubr.f32.mxu1 %v32111_v4  ;;  %v32951_v18 = vmul.f32 %v32681_v43, %v32681_v43 }
 0x6be   :  { %28961 = vmatprep.subr.bf16.mxu1 %v35069_v2 }
 0x6c4   :  { %27512 = vmatmul.mubr.f32.vlgmr.msra.gmra.mrb[28].mxu1 %v32162_v33 }
 0x6c5   :  { %28963 = vmatpush3.bf16.msra.mxu1 %v35069_v2  ;;  %27518 = vmatprep.mubr.f32.mxu1 %v32115_v27 }
 0x6c6   :  { %28965 = vmatprep.subr.bf16.mxu1 %v35067_v46 }
 0x6cc   :  { %27519 = vmatmul.mubr.f32.vlgmr.msra.gmra.mrb[28].mxu1 %v32165_v6 }
 0x6cd   :  { %28967 = vmatpush3.bf16.msra.mxu1 %v35067_v46  ;;  %27525 = vmatprep.mubr.f32.mxu1 %v32119_v45 }
 0x6ce   :  { %28969 = vmatprep.subr.bf16.mxu1 %v35070_v53 }
 0x6d4   :  { %27526 = vmatmul.mubr.f32.vlgmr.msra.gmra.mrb[28].mxu1 %v32168_v39 }
 0x6d5   :  { %28971 = vmatpush3.bf16.msra.mxu1 %v35070_v53  ;;  %27532 = vmatprep.mubr.f32.mxu1 %v32111_v4 }
 0x6d6   :  { %28973 = vmatprep.subr.bf16.mxu1 %v35067_v46 }
 0x6db   :  { %v27331_v29 = vpop.f32.mrb[18].mxu1 }
 0x6dc   :  { %v32903_v16 = vmul.f32 %v27331_v29, %v27331_v29  ;;  %v32906_v49 = vmul.f32 %v27331_v29, %v32653_v62  ;;  %v9270_v34 = vpop.f32.mrb[19].mxu1  ;;  %27533 = vmatmul.mubr.f32.vlgmr.msra.gmra.mrb[28].mxu1 %v32162_v33 }
 0x6dd   :  { %v32913_v42 = vmul.f32 %v9270_v34, %v9270_v34  ;;  %v32916_v51 = vmul.f32 %v9270_v34, %v32655_v17  ;;  %28975 = vmatpush3.bf16.msra.mxu1 %v35067_v46  ;;  %27539 = vmatprep.mubr.f32.mxu1 %v32111_v4  ;;  %v35074_v17 = vld [vmem:[#allocation76_spill] sm:$0xff]  ;;  %v32961_v34 = vmul.f32 %v32683_v36, %v32683_v36 }
 0x6de   :  { %35071 = vst [vmem:[#allocation111_spill] sm:$0xff] %v32906_v49  ;;  %v32922_v62 = vadd.f32 %v32903_v16, %v32901_v63  ;;  %28977 = vmatprep.subr.bf16.mxu1 %v35073_v7 }
 0x6df   :  { %35072 = vst [vmem:[#allocation113_spill] sm:$0xff] %v32916_v51  ;;  %v32927_v57 = vadd.f32 %v32913_v42, %v32911_v3 }
 0x6e4   :  { %27540 = vmatmul.mubr.f32.vlgmr.msra.gmra.mrb[28].mxu1 %v32162_v33 }
 0x6e5   :  { %28979 = vmatpush3.bf16.msra.mxu1 %v35073_v7  ;;  %27546 = vmatprep.mubr.f32.mxu1 %v32125_v40 }
 0x6e6   :  { %28981 = vmatprep.subr.bf16.mxu1 %v35074_v17 }
 0x6e8   :  { %27547 = vmatmul.mubr.f32.vlgmr.msra.gmra.mrb[30].mxu1 %v32175_v13 }
 0x6e9   :  { %28983 = vmatpush3.bf16.msra.mxu1 %v35074_v17  ;;  %27553 = vmatprep.mubr.f32.mxu1 %v32111_v4 }
 0x6ea   :  { %28985 = vmatprep.subr.bf16.mxu1 %v35075_v30 }
 0x6f0   :  { %27554 = vmatmul.mubr.f32.vlgmr.msra.gmra.mrb[30].mxu1 %v32162_v33 }
 0x6f1   :  { %28987 = vmatpush3.bf16.msra.mxu1 %v35075_v30  ;;  %27560 = vmatprep.mubr.f32.mxu1 %v32115_v27 }
 0x6f2   :  { %28989 = vmatprep.subr.bf16.mxu1 %v35073_v7 }
 0x6f8   :  { %27561 = vmatmul.mubr.f32.vlgmr.msra.gmra.mrb[30].mxu1 %v32165_v6 }
 0x6f9   :  { %28991 = vmatpush3.bf16.msra.mxu1 %v35073_v7  ;;  %27567 = vmatprep.mubr.f32.mxu1 %v32119_v45 }
 0x6fa   :  { %28993 = vmatprep.subr.bf16.mxu1 %v35076_v8 }
 0x700   :  { %27568 = vmatmul.mubr.f32.vlgmr.msra.gmra.mrb[30].mxu1 %v32168_v39 }
 0x701   :  { %28995 = vmatpush3.bf16.msra.mxu1 %v35076_v8  ;;  %27574 = vmatprep.mubr.f32.mxu1 %v32111_v4  ;;  %v35079_v8 = vld [vmem:[#allocation67_spill] sm:$0xff] }
 0x702   :  { %28997 = vmatprep.subr.bf16.mxu1 %v35073_v7 }
 0x707   :  { %v27373_v46 = vpop.f32.mrb[20].mxu1 }
 0x708   :  { %v32953_v2 = vmul.f32 %v27373_v46, %v27373_v46  ;;  %v32956_v53 = vmul.f32 %v27373_v46, %v32681_v43  ;;  %v9772_v29 = vpop.f32.mrb[21].mxu1  ;;  %27575 = vmatmul.mubr.f32.vlgmr.msra.gmra.mrb[30].mxu1 %v32162_v33 }
 0x709   :  { %v32963_v17 = vmul.f32 %v9772_v29, %v9772_v29  ;;  %v32966_v30 = vmul.f32 %v9772_v29, %v32683_v36  ;;  %28999 = vmatpush3.bf16.msra.mxu1 %v35073_v7  ;;  %27581 = vmatprep.mubr.f32.mxu1 %v32111_v4  ;;  %v35080_v36 = vld [vmem:[#allocation72_spill] sm:$0xff]  ;;  %v35081_v7 = vld [vmem:[#allocation78_spill] sm:$0xff]  ;;  %v33001_v29 = vmul.f32 %v32709_v38, %v32709_v38 }
 0x70a   :  { %35077 = vst [vmem:[#allocation115_spill] sm:$0xff] %v32956_v53  ;;  %v32972_v43 = vadd.f32 %v32953_v2, %v32951_v18  ;;  %29001 = vmatprep.subr.bf16.mxu1 %v35079_v8 }
 0x70b   :  { %35078 = vst [vmem:[#allocation116_spill] sm:$0xff] %v32966_v30  ;;  %v32977_v46 = vadd.f32 %v32963_v17, %v32961_v34 }
 0x710   :  { %27582 = vmatmul.mubr.f32.vlgmr.msra.gmra.mrb[30].mxu1 %v32162_v33 }
 0x711   :  { %29003 = vmatpush3.bf16.msra.mxu1 %v35079_v8  ;;  %27588 = vmatprep.mubr.f32.mxu1 %v32125_v40 }
 0x712   :  { %29005 = vmatprep.subr.bf16.mxu1 %v32345_v10 }
 0x714   :  { %27589 = vmatmul.mubr.f32.vlgmr.msra.gmra.mrb[32].mxu1 %v32175_v13 }
 0x715   :  { %29007 = vmatpush3.bf16.msra.mxu1 %v32345_v10  ;;  %27595 = vmatprep.mubr.f32.mxu1 %v32111_v4 }
 0x716   :  { %29009 = vmatprep.subr.bf16.mxu1 %v35080_v36 }
 0x71c   :  { %27596 = vmatmul.mubr.f32.vlgmr.msra.gmra.mrb[32].mxu1 %v32162_v33 }
 0x71d   :  { %29011 = vmatpush3.bf16.msra.mxu1 %v35080_v36  ;;  %27602 = vmatprep.mubr.f32.mxu1 %v32115_v27 }
 0x71e   :  { %29013 = vmatprep.subr.bf16.mxu1 %v35079_v8 }
 0x724   :  { %27603 = vmatmul.mubr.f32.vlgmr.msra.gmra.mrb[32].mxu1 %v32165_v6 }
 0x725   :  { %29015 = vmatpush3.bf16.msra.mxu1 %v35079_v8  ;;  %27609 = vmatprep.mubr.f32.mxu1 %v32119_v45 }
 0x726   :  { %29017 = vmatprep.subr.bf16.mxu1 %v35081_v7 }
 0x72c   :  { %27610 = vmatmul.mubr.f32.vlgmr.msra.gmra.mrb[32].mxu1 %v32168_v39 }
 0x72d   :  { %29019 = vmatpush3.bf16.msra.mxu1 %v35081_v7  ;;  %27616 = vmatprep.mubr.f32.mxu1 %v32111_v4  ;;  %v33011_v7 = vmul.f32 %v32711_v0, %v32711_v0 }
 0x72e   :  { %29021 = vmatprep.subr.bf16.mxu1 %v35079_v8 }
 0x733   :  { %v27415_v10 = vpop.f32.mrb[22].mxu1 }
 0x734   :  { %v33003_v36 = vmul.f32 %v27415_v10, %v27415_v10  ;;  %v33006_v30 = vmul.f32 %v27415_v10, %v32709_v38  ;;  %v10274_v53 = vpop.f32.mrb[23].mxu1  ;;  %27617 = vmatmul.mubr.f32.vlgmr.msra.gmra.mrb[32].mxu1 %v32162_v33  ;;  %v35084_v10 = vld [vmem:[#allocation74_spill] sm:$0xff] }
 0x735   :  { %v33013_v61 = vmul.f32 %v10274_v53, %v10274_v53  ;;  %v33016_v22 = vmul.f32 %v10274_v53, %v32711_v0  ;;  %29023 = vmatpush3.bf16.msra.mxu1 %v35079_v8  ;;  %27623 = vmatprep.mubr.f32.mxu1 %v32111_v4  ;;  %v35085_v0 = vld [vmem:[#allocation117_spill] sm:$0xff]  ;;  %v35086_v53 = vld [vmem:[#allocation80_spill] sm:$0xff] }
 0x736   :  { %35082 = vst [vmem:[#allocation118_spill] sm:$0xff] %v33006_v30  ;;  %v33022_v38 = vadd.f32 %v33003_v36, %v33001_v29  ;;  %29025 = vmatprep.subr.bf16.mxu1 %v35084_v10  ;;  %v35087_v8 = vld [vmem:[#allocation108_spill] sm:$0xff] }
 0x737   :  { %35083 = vst [vmem:[#allocation146_spill] sm:$0xff] %v33016_v22  ;;  %v33027_v30 = vadd.f32 %v33013_v61, %v33011_v7 }
 0x73c   :  { %27624 = vmatmul.mubr.f32.vlgmr.msra.gmra.mrb[32].mxu1 %v32162_v33 }
 0x73d   :  { %29027 = vmatpush3.bf16.msra.mxu1 %v35084_v10  ;;  %27630 = vmatprep.mubr.f32.mxu1 %v32125_v40 }
 0x73e   :  { %29029 = vmatprep.subr.bf16.mxu1 %v35085_v0 }
 0x740   :  { %27631 = vmatmul.mubr.f32.vlgmr.msra.gmra.mrb[34].mxu1 %v32175_v13 }
 0x741   :  { %29031 = vmatpush3.bf16.msra.mxu1 %v35085_v0  ;;  %27637 = vmatprep.mubr.f32.mxu1 %v32111_v4 }
 0x742   :  { %29033 = vmatprep.subr.bf16.mxu1 %v35086_v53 }
 0x748   :  { %27638 = vmatmul.mubr.f32.vlgmr.msra.gmra.mrb[34].mxu1 %v32162_v33 }
 0x749   :  { %29035 = vmatpush3.bf16.msra.mxu1 %v35086_v53  ;;  %27644 = vmatprep.mubr.f32.mxu1 %v32115_v27  ;;  %v33051_v53 = vmul.f32 %v32737_v54, %v32737_v54 }
 0x74a   :  { %29037 = vmatprep.subr.bf16.mxu1 %v35084_v10 }
 0x750   :  { %27645 = vmatmul.mubr.f32.vlgmr.msra.gmra.mrb[34].mxu1 %v32165_v6 }
 0x751   :  { %29039 = vmatpush3.bf16.msra.mxu1 %v35084_v10  ;;  %27651 = vmatprep.mubr.f32.mxu1 %v32119_v45 }
 0x752   :  { %29041 = vmatprep.subr.bf16.mxu1 %v35087_v8 }
 0x758   :  { %27652 = vmatmul.mubr.f32.vlgmr.msra.gmra.mrb[34].mxu1 %v32168_v39 }
 0x759   :  { %29043 = vmatpush3.bf16.msra.mxu1 %v35087_v8  ;;  %27658 = vmatprep.mubr.f32.mxu1 %v32111_v4  ;;  %v33061_v8 = vmul.f32 %v32739_v52, %v32739_v52 }
 0x75a   :  { %29045 = vmatprep.subr.bf16.mxu1 %v35084_v10 }
 0x75f   :  { %v27457_v0 = vpop.f32.mrb[24].mxu1 }
 0x760   :  { %v33053_v22 = vmul.f32 %v27457_v0, %v27457_v0  ;;  %v33056_v23 = vmul.f32 %v27457_v0, %v32737_v54  ;;  %v10776_v31 = vpop.f32.mrb[25].mxu1  ;;  %27659 = vmatmul.mubr.f32.vlgmr.msra.gmra.mrb[34].mxu1 %v32162_v33  ;;  %v35090_v0 = vld [vmem:[#allocation107_spill] sm:$0xff] }
 0x761   :  { %v33063_v51 = vmul.f32 %v10776_v31, %v10776_v31  ;;  %v33066_v49 = vmul.f32 %v10776_v31, %v32739_v52  ;;  %29047 = vmatpush3.bf16.msra.mxu1 %v35084_v10  ;;  %27665 = vmatprep.mubr.f32.mxu1 %v32111_v4  ;;  %v35091_v31 = vld [vmem:[#allocation112_spill] sm:$0xff]  ;;  %v35092_v52 = vld [vmem:[#allocation119_spill] sm:$0xff]  ;;  %v33101_v10 = vmul.f32 %v32765_v9, %v32765_v9 }
 0x762   :  { %35088 = vst [vmem:[#allocation147_spill] sm:$0xff] %v33056_v23  ;;  %v33072_v54 = vadd.f32 %v33053_v22, %v33051_v53  ;;  %29049 = vmatprep.subr.bf16.mxu1 %v35090_v0 }
 0x763   :  { %35089 = vst [vmem:[#allocation150_spill] sm:$0xff] %v33066_v49  ;;  %v33077_v23 = vadd.f32 %v33063_v51, %v33061_v8 }
 0x768   :  { %27666 = vmatmul.mubr.f32.vlgmr.msra.gmra.mrb[34].mxu1 %v32162_v33 }
 0x769   :  { %29051 = vmatpush3.bf16.msra.mxu1 %v35090_v0  ;;  %27672 = vmatprep.mubr.f32.mxu1 %v32125_v40 }
 0x76a   :  { %29053 = vmatprep.subr.bf16.mxu1 %v32365_v60 }
 0x76c   :  { %27673 = vmatmul.mubr.f32.vlgmr.msra.gmra.mrb[36].mxu1 %v32175_v13 }
 0x76d   :  { %29055 = vmatpush3.bf16.msra.mxu1 %v32365_v60  ;;  %27679 = vmatprep.mubr.f32.mxu1 %v32111_v4 }
 0x76e   :  { %29057 = vmatprep.subr.bf16.mxu1 %v35091_v31 }
 0x774   :  { %27680 = vmatmul.mubr.f32.vlgmr.msra.gmra.mrb[36].mxu1 %v32162_v33 }
 0x775   :  { %29059 = vmatpush3.bf16.msra.mxu1 %v35091_v31  ;;  %27686 = vmatprep.mubr.f32.mxu1 %v32115_v27 }
 0x776   :  { %29061 = vmatprep.subr.bf16.mxu1 %v35090_v0 }
 0x77c   :  { %27687 = vmatmul.mubr.f32.vlgmr.msra.gmra.mrb[36].mxu1 %v32165_v6 }
 0x77d   :  { %29063 = vmatpush3.bf16.msra.mxu1 %v35090_v0  ;;  %27693 = vmatprep.mubr.f32.mxu1 %v32119_v45 }
 0x77e   :  { %29065 = vmatprep.subr.bf16.mxu1 %v35092_v52 }
 0x784   :  { %27694 = vmatmul.mubr.f32.vlgmr.msra.gmra.mrb[36].mxu1 %v32168_v39 }
 0x785   :  { %29067 = vmatpush3.bf16.msra.mxu1 %v35092_v52  ;;  %27700 = vmatprep.mubr.f32.mxu1 %v32111_v4  ;;  %v33111_v52 = vmul.f32 %v32767_v21, %v32767_v21 }
 0x786   :  { %29069 = vmatprep.subr.bf16.mxu1 %v35090_v0 }
 0x787   :  { %35095 = vst [vmem:[#allocation154_spill] sm:$0xff] %v33111_v52 }
 0x78b   :  { %v27499_v60 = vpop.f32.mrb[26].mxu1 }
 0x78c   :  { %v33103_v31 = vmul.f32 %v27499_v60, %v27499_v60  ;;  %v33106_v49 = vmul.f32 %v27499_v60, %v32765_v9  ;;  %v11278_v24 = vpop.f32.mrb[27].mxu1  ;;  %27701 = vmatmul.mubr.f32.vlgmr.msra.gmra.mrb[36].mxu1 %v32162_v33  ;;  %v35099_v60 = vld [vmem:[#allocation114_spill] sm:$0xff] }
 0x78d   :  { %v33113_v37 = vmul.f32 %v11278_v24, %v11278_v24  ;;  %v33116_v1 = vmul.f32 %v11278_v24, %v32767_v21  ;;  %29071 = vmatpush3.bf16.msra.mxu1 %v35090_v0  ;;  %27707 = vmatprep.mubr.f32.mxu1 %v32111_v4  ;;  %v35101_v24 = vld [vmem:[#allocation148_spill] sm:$0xff]  ;;  %v35102_v21 = vld [vmem:[#allocation122_spill] sm:$0xff] }
 0x78e   :  { %35093 = vst [vmem:[#allocation151_spill] sm:$0xff] %v33103_v31  ;;  %35094 = vst [vmem:[#allocation153_spill] sm:$0xff] %v33106_v49  ;;  %v33122_v9 = vadd.f32 %v33103_v31, %v33101_v10  ;;  %29073 = vmatprep.subr.bf16.mxu1 %v35099_v60  ;;  %v35103_v0 = vld [vmem:[#allocation126_spill] sm:$0xff]  ;;  %v35147_v31 = vld [vmem:[#allocation163_spill] sm:$0xff] }
 0x78f   :  { %35096 = vst [vmem:[#allocation156_spill] sm:$0xff] %v33113_v37  ;;  %35097 = vst [vmem:[#allocation157_spill] sm:$0xff] %v33116_v1  ;;  %v33127_v49 = vadd.f32 %v33113_v37, %v33111_v52  ;;  %v35153_v52 = vld [vmem:[#allocation18_spill] sm:$0xff] }
 0x790   :  { %35098 = vst [vmem:[#allocation159_spill] sm:$0xff] %v33122_v9  ;;  %v35144_v9 = vld [vmem:[#allocation149_spill] sm:$0xff] }
 0x791   :  { %35100 = vst [vmem:[#allocation161_spill] sm:$0xff] %v33127_v49 }
 0x794   :  { %27708 = vmatmul.mubr.f32.vlgmr.msra.gmra.mrb[36].mxu1 %v32162_v33 }
 0x795   :  { %29075 = vmatpush3.bf16.msra.mxu1 %v35099_v60  ;;  %27714 = vmatprep.mubr.f32.mxu1 %v32125_v40 }
 0x796   :  { %29077 = vmatprep.subr.bf16.mxu1 %v35101_v24 }
 0x798   :  { %27715 = vmatmul.mubr.f32.vlgmr.msra.gmra.mrb[38].mxu1 %v32175_v13 }
 0x799   :  { %29079 = vmatpush3.bf16.msra.mxu1 %v35101_v24  ;;  %27721 = vmatprep.mubr.f32.mxu1 %v32111_v4 }
 0x79a   :  { %29081 = vmatprep.subr.bf16.mxu1 %v35102_v21 }
 0x7a0   :  { %27722 = vmatmul.mubr.f32.vlgmr.msra.gmra.mrb[38].mxu1 %v32162_v33 }
 0x7a1   :  { %29083 = vmatpush3.bf16.msra.mxu1 %v35102_v21  ;;  %27728 = vmatprep.mubr.f32.mxu1 %v32115_v27  ;;  %v33151_v21 = vmul.f32 %v32793_v48, %v32793_v48 }
 0x7a2   :  { %29085 = vmatprep.subr.bf16.mxu1 %v35099_v60 }
 0x7a3   :  { %35104 = vst [vmem:[#allocation162_spill] sm:$0xff] %v33151_v21 }
 0x7a8   :  { %27729 = vmatmul.mubr.f32.vlgmr.msra.gmra.mrb[38].mxu1 %v32165_v6 }
 0x7a9   :  { %29087 = vmatpush3.bf16.msra.mxu1 %v35099_v60  ;;  %27735 = vmatprep.mubr.f32.mxu1 %v32119_v45 }
 0x7aa   :  { %29089 = vmatprep.subr.bf16.mxu1 %v35103_v0 }
 0x7b0   :  { %27736 = vmatmul.mubr.f32.vlgmr.msra.gmra.mrb[38].mxu1 %v32168_v39 }
 0x7b1   :  { %29091 = vmatpush3.bf16.msra.mxu1 %v35103_v0  ;;  %27742 = vmatprep.mubr.f32.mxu1 %v32111_v4  ;;  %v33161_v0 = vmul.f32 %v32795_v19, %v32795_v19 }
 0x7b2   :  { %29093 = vmatprep.subr.bf16.mxu1 %v35099_v60 }
 0x7b3   :  { %35107 = vst [vmem:[#allocation125_spill] sm:$0xff] %v33161_v0 }
 0x7b7   :  { %v27541_v24 = vpop.f32.mrb[28].mxu1 }
 0x7b8   :  { %v33153_v1 = vmul.f32 %v27541_v24, %v27541_v24  ;;  %v33156_v26 = vmul.f32 %v27541_v24, %v32793_v48  ;;  %v11780_v59 = vpop.f32.mrb[29].mxu1  ;;  %27743 = vmatmul.mubr.f32.vlgmr.msra.gmra.mrb[38].mxu1 %v32162_v33  ;;  %v35111_v24 = vld [vmem:[#allocation124_spill] sm:$0xff] }
 0x7b9   :  { %v33163_v25 = vmul.f32 %v11780_v59, %v11780_v59  ;;  %v33166_v50 = vmul.f32 %v11780_v59, %v32795_v19  ;;  %29095 = vmatpush3.bf16.msra.mxu1 %v35099_v60  ;;  %27749 = vmatprep.mubr.f32.mxu1 %v32111_v4  ;;  %v35113_v59 = vld [vmem:[#allocation138_spill] sm:$0xff]  ;;  %v33201_v60 = vmul.f32 %v32821_v56, %v32821_v56 }
 0x7ba   :  { %35105 = vst [vmem:[#allocation121_spill] sm:$0xff] %v33153_v1  ;;  %35106 = vst [vmem:[#allocation123_spill] sm:$0xff] %v33156_v26  ;;  %v33172_v48 = vadd.f32 %v33153_v1, %v33151_v21  ;;  %29097 = vmatprep.subr.bf16.mxu1 %v35111_v24  ;;  %v35114_v19 = vld [vmem:[#allocation158_spill] sm:$0xff]  ;;  %v35140_v1 = vld [vmem:[#allocation129_spill] sm:$0xff] }
 0x7bb   :  { %35108 = vst [vmem:[#allocation127_spill] sm:$0xff] %v33163_v25  ;;  %35109 = vst [vmem:[#allocation128_spill] sm:$0xff] %v33166_v50  ;;  %v33177_v26 = vadd.f32 %v33163_v25, %v33161_v0 }
 0x7bc   :  { %35110 = vst [vmem:[#allocation130_spill] sm:$0xff] %v33172_v48  ;;  %35115 = vst [vmem:[#allocation133_spill] sm:$0xff] %v33201_v60 }
 0x7bd   :  { %35112 = vst [vmem:[#allocation131_spill] sm:$0xff] %v33177_v26 }
 0x7c0   :  { %27750 = vmatmul.mubr.f32.vlgmr.msra.gmra.mrb[38].mxu1 %v32162_v33 }
 0x7c1   :  { %29099 = vmatpush3.bf16.msra.mxu1 %v35111_v24  ;;  %27756 = vmatprep.mubr.f32.mxu1 %v32125_v40 }
 0x7c2   :  { %29101 = vmatprep.subr.bf16.mxu1 %v32385_v15 }
 0x7c4   :  { %27757 = vmatmul.mubr.f32.vlgmr.msra.gmra.mrb[40].mxu1 %v32175_v13 }
 0x7c5   :  { %29103 = vmatpush3.bf16.msra.mxu1 %v32385_v15  ;;  %27763 = vmatprep.mubr.f32.mxu1 %v32111_v4 }
 0x7c6   :  { %29105 = vmatprep.subr.bf16.mxu1 %v35113_v59 }
 0x7cc   :  { %27764 = vmatmul.mubr.f32.vlgmr.msra.gmra.mrb[40].mxu1 %v32162_v33 }
 0x7cd   :  { %29107 = vmatpush3.bf16.msra.mxu1 %v35113_v59  ;;  %27770 = vmatprep.mubr.f32.mxu1 %v32115_v27 }
 0x7ce   :  { %29109 = vmatprep.subr.bf16.mxu1 %v35111_v24 }
 0x7d4   :  { %27771 = vmatmul.mubr.f32.vlgmr.msra.gmra.mrb[40].mxu1 %v32165_v6 }
 0x7d5   :  { %29111 = vmatpush3.bf16.msra.mxu1 %v35111_v24  ;;  %27777 = vmatprep.mubr.f32.mxu1 %v32119_v45 }
 0x7d6   :  { %29113 = vmatprep.subr.bf16.mxu1 %v35114_v19 }
 0x7dc   :  { %27778 = vmatmul.mubr.f32.vlgmr.msra.gmra.mrb[40].mxu1 %v32168_v39 }
 0x7dd   :  { %29115 = vmatpush3.bf16.msra.mxu1 %v35114_v19  ;;  %27784 = vmatprep.mubr.f32.mxu1 %v32111_v4  ;;  %v33211_v19 = vmul.f32 %v32823_v12, %v32823_v12 }
 0x7de   :  { %29117 = vmatprep.subr.bf16.mxu1 %v35111_v24 }
 0x7df   :  { %35118 = vst [vmem:[#allocation137_spill] sm:$0xff] %v33211_v19 }
 0x7e3   :  { %v27583_v15 = vpop.f32.mrb[30].mxu1 }
 0x7e4   :  { %v33203_v59 = vmul.f32 %v27583_v15, %v27583_v15  ;;  %v33206_v50 = vmul.f32 %v27583_v15, %v32821_v56  ;;  %v12282_v58 = vpop.f32.mrb[31].mxu1  ;;  %27785 = vmatmul.mubr.f32.vlgmr.msra.gmra.mrb[40].mxu1 %v32162_v33  ;;  %v35122_v15 = vld [vmem:[#allocation145_spill] sm:$0xff] }
 0x7e5   :  { %v33213_v26 = vmul.f32 %v12282_v58, %v12282_v58  ;;  %v33216_v48 = vmul.f32 %v12282_v58, %v32823_v12  ;;  %29119 = vmatpush3.bf16.msra.mxu1 %v35111_v24  ;;  %27791 = vmatprep.mubr.f32.mxu1 %v32111_v4  ;;  %v35124_v58 = vld [vmem:[#allocation92_spill] sm:$0xff]  ;;  %v35125_v12 = vld [vmem:[#allocation83_spill] sm:$0xff] }
 0x7e6   :  { %35116 = vst [vmem:[#allocation135_spill] sm:$0xff] %v33203_v59  ;;  %35117 = vst [vmem:[#allocation136_spill] sm:$0xff] %v33206_v50  ;;  %v33222_v56 = vadd.f32 %v33203_v59, %v33201_v60  ;;  %29121 = vmatprep.subr.bf16.mxu1 %v35122_v15  ;;  %v35126_v24 = vld [vmem:[#allocation87_spill] sm:$0xff]  ;;  %v35136_v59 = vld [vmem:[#allocation104_spill] sm:$0xff] }
 0x7e7   :  { %35119 = vst [vmem:[#allocation139_spill] sm:$0xff] %v33213_v26  ;;  %35120 = vst [vmem:[#allocation141_spill] sm:$0xff] %v33216_v48  ;;  %v33227_v50 = vadd.f32 %v33213_v26, %v33211_v19  ;;  %v35132_v26 = vld [vmem:[#allocation96_spill] sm:$0xff] }
 0x7e8   :  { %35121 = vst [vmem:[#allocation142_spill] sm:$0xff] %v33222_v56  ;;  %v35161_v60 = vld [vmem:[#allocation28_spill] sm:$0xff] }
 0x7e9   :  { %35123 = vst [vmem:[#allocation143_spill] sm:$0xff] %v33227_v50  ;;  %v35129_v50 = vld [vmem:[#allocation88_spill] sm:$0xff] }
 0x7ec   :  { %27792 = vmatmul.mubr.f32.vlgmr.msra.gmra.mrb[40].mxu1 %v32162_v33 }
 0x7ed   :  { %29123 = vmatpush3.bf16.msra.mxu1 %v35122_v15  ;;  %27798 = vmatprep.mubr.f32.mxu1 %v32125_v40 }
 0x7ee   :  { %29125 = vmatprep.subr.bf16.mxu1 %v35124_v58 }
 0x7f0   :  { %27799 = vmatmul.mubr.f32.vlgmr.msra.gmra.mrb[42].mxu1 %v32175_v13 }
 0x7f1   :  { %29127 = vmatpush3.bf16.msra.mxu1 %v35124_v58  ;;  %27805 = vmatprep.mubr.f32.mxu1 %v32111_v4 }
 0x7f2   :  { %29129 = vmatprep.subr.bf16.mxu1 %v35125_v12 }
 0x7f8   :  { %27806 = vmatmul.mubr.f32.vlgmr.msra.gmra.mrb[42].mxu1 %v32162_v33 }
 0x7f9   :  { %29131 = vmatpush3.bf16.msra.mxu1 %v35125_v12  ;;  %27812 = vmatprep.mubr.f32.mxu1 %v32115_v27  ;;  %v35128_v12 = vld [vmem:[#allocation101_spill] sm:$0xff] }
 0x7fa   :  { %29133 = vmatprep.subr.bf16.mxu1 %v35122_v15 }
 0x800   :  { %27813 = vmatmul.mubr.f32.vlgmr.msra.gmra.mrb[42].mxu1 %v32165_v6 }
 0x801   :  { %29135 = vmatpush3.bf16.msra.mxu1 %v35122_v15  ;;  %27819 = vmatprep.mubr.f32.mxu1 %v32119_v45 }
 0x802   :  { %29137 = vmatprep.subr.bf16.mxu1 %v35126_v24 }
 0x808   :  { %27820 = vmatmul.mubr.f32.vlgmr.msra.gmra.mrb[42].mxu1 %v32168_v39 }
 0x809   :  { %29139 = vmatpush3.bf16.msra.mxu1 %v35126_v24  ;;  %27826 = vmatprep.mubr.f32.mxu1 %v32111_v4  ;;  %v35127_v24 = vld [vmem:[#allocation86_spill] sm:$0xff] }
 0x80a   :  { %29141 = vmatprep.subr.bf16.mxu1 %v35122_v15 }
 0x80f   :  { %v33249_v58 = vpop.f32.mrb[32].mxu1 }
 0x810   :  { %v33253_v48 = vpop.f32.mrb[33].mxu1  ;;  %27827 = vmatmul.mubr.f32.vlgmr.msra.gmra.mrb[42].mxu1 %v32162_v33 }
 0x811   :  { %29143 = vmatpush3.bf16.msra.mxu1 %v35122_v15  ;;  %27833 = vmatprep.mubr.f32.mxu1 %v32111_v4  ;;  %v35130_v15 = vld [vmem:[#allocation93_spill] sm:$0xff] }
 0x812   :  { %29145 = vmatprep.subr.bf16.mxu1 %v35127_v24 }
 0x818   :  { %27834 = vmatmul.mubr.f32.vlgmr.msra.gmra.mrb[42].mxu1 %v32162_v33 }
 0x819   :  { %29147 = vmatpush3.bf16.msra.mxu1 %v35127_v24  ;;  %27840 = vmatprep.mubr.f32.mxu1 %v32125_v40 }
 0x81a   :  { %29149 = vmatprep.subr.bf16.mxu1 %v35128_v12 }
 0x81c   :  { %27841 = vmatmul.mubr.f32.vlgmr.msra.gmra.mrb[44].mxu1 %v32175_v13 }
 0x81d   :  { %29151 = vmatpush3.bf16.msra.mxu1 %v35128_v12  ;;  %27847 = vmatprep.mubr.f32.mxu1 %v32111_v4 }
 0x81e   :  { %29153 = vmatprep.subr.bf16.mxu1 %v35129_v50 }
 0x824   :  { %27848 = vmatmul.mubr.f32.vlgmr.msra.gmra.mrb[44].mxu1 %v32162_v33 }
 0x825   :  { %29155 = vmatpush3.bf16.msra.mxu1 %v35129_v50  ;;  %27854 = vmatprep.mubr.f32.mxu1 %v32115_v27 }
 0x826   :  { %29157 = vmatprep.subr.bf16.mxu1 %v35127_v24 }
 0x82c   :  { %27855 = vmatmul.mubr.f32.vlgmr.msra.gmra.mrb[44].mxu1 %v32165_v6 }
 0x82d   :  { %29159 = vmatpush3.bf16.msra.mxu1 %v35127_v24  ;;  %27861 = vmatprep.mubr.f32.mxu1 %v32119_v45 }
 0x82e   :  { %29161 = vmatprep.subr.bf16.mxu1 %v35130_v15 }
 0x834   :  { %27862 = vmatmul.mubr.f32.vlgmr.msra.gmra.mrb[44].mxu1 %v32168_v39 }
 0x835   :  { %29163 = vmatpush3.bf16.msra.mxu1 %v35130_v15  ;;  %27868 = vmatprep.mubr.f32.mxu1 %v32111_v4  ;;  %v35131_v15 = vld [vmem:[#allocation90_spill] sm:$0xff] }
 0x836   :  { %29165 = vmatprep.subr.bf16.mxu1 %v35127_v24 }
 0x83b   :  { %v33281_v50 = vpop.f32.mrb[34].mxu1 }
 0x83c   :  { %v33285_v56 = vpop.f32.mrb[35].mxu1  ;;  %27869 = vmatmul.mubr.f32.vlgmr.msra.gmra.mrb[44].mxu1 %v32162_v33 }
 0x83d   :  { %29167 = vmatpush3.bf16.msra.mxu1 %v35127_v24  ;;  %27875 = vmatprep.mubr.f32.mxu1 %v32111_v4  ;;  %v35133_v24 = vld [vmem:[#allocation102_spill] sm:$0xff] }
 0x83e   :  { %29169 = vmatprep.subr.bf16.mxu1 %v35131_v15 }
 0x844   :  { %27876 = vmatmul.mubr.f32.vlgmr.msra.gmra.mrb[44].mxu1 %v32162_v33 }
 0x845   :  { %29171 = vmatpush3.bf16.msra.mxu1 %v35131_v15  ;;  %27882 = vmatprep.mubr.f32.mxu1 %v32125_v40 }
 0x846   :  { %29173 = vmatprep.subr.bf16.mxu1 %v32417_v14 }
 0x848   :  { %27883 = vmatmul.mubr.f32.vlgmr.msra.gmra.mrb[46].mxu1 %v32175_v13 }
 0x849   :  { %29175 = vmatpush3.bf16.msra.mxu1 %v32417_v14  ;;  %27889 = vmatprep.mubr.f32.mxu1 %v32111_v4 }
 0x84a   :  { %29177 = vmatprep.subr.bf16.mxu1 %v35132_v26 }
 0x850   :  { %27890 = vmatmul.mubr.f32.vlgmr.msra.gmra.mrb[46].mxu1 %v32162_v33 }
 0x851   :  { %29179 = vmatpush3.bf16.msra.mxu1 %v35132_v26  ;;  %27896 = vmatprep.mubr.f32.mxu1 %v32115_v27  ;;  %v35135_v26 = vld [vmem:[#allocation134_spill] sm:$0xff] }
 0x852   :  { %29181 = vmatprep.subr.bf16.mxu1 %v35131_v15 }
 0x858   :  { %27897 = vmatmul.mubr.f32.vlgmr.msra.gmra.mrb[46].mxu1 %v32165_v6 }
 0x859   :  { %29183 = vmatpush3.bf16.msra.mxu1 %v35131_v15  ;;  %27903 = vmatprep.mubr.f32.mxu1 %v32119_v45 }
 0x85a   :  { %29185 = vmatprep.subr.bf16.mxu1 %v35133_v24 }
 0x860   :  { %27904 = vmatmul.mubr.f32.vlgmr.msra.gmra.mrb[46].mxu1 %v32168_v39 }
 0x861   :  { %29187 = vmatpush3.bf16.msra.mxu1 %v35133_v24  ;;  %27910 = vmatprep.mubr.f32.mxu1 %v32111_v4  ;;  %v35134_v24 = vld [vmem:[#allocation99_spill] sm:$0xff] }
 0x862   :  { %29189 = vmatprep.subr.bf16.mxu1 %v35131_v15 }
 0x867   :  { %v33313_v14 = vpop.f32.mrb[36].mxu1 }
 0x868   :  { %v33317_v12 = vpop.f32.mrb[37].mxu1  ;;  %27911 = vmatmul.mubr.f32.vlgmr.msra.gmra.mrb[46].mxu1 %v32162_v33 }
 0x869   :  { %29191 = vmatpush3.bf16.msra.mxu1 %v35131_v15  ;;  %27917 = vmatprep.mubr.f32.mxu1 %v32111_v4  ;;  %v35137_v15 = vld [vmem:[#allocation120_spill] sm:$0xff] }
 0x86a   :  { %29193 = vmatprep.subr.bf16.mxu1 %v35134_v24 }
 0x870   :  { %27918 = vmatmul.mubr.f32.vlgmr.msra.gmra.mrb[46].mxu1 %v32162_v33 }
 0x871   :  { %29195 = vmatpush3.bf16.msra.mxu1 %v35134_v24  ;;  %27924 = vmatprep.mubr.f32.mxu1 %v32125_v40 }
 0x872   :  { %29197 = vmatprep.subr.bf16.mxu1 %v35135_v26 }
 0x874   :  { %27925 = vmatmul.mubr.f32.vlgmr.msra.gmra.mrb[48].mxu1 %v32175_v13 }
 0x875   :  { %29199 = vmatpush3.bf16.msra.mxu1 %v35135_v26  ;;  %27931 = vmatprep.mubr.f32.mxu1 %v32111_v4  ;;  %v35139_v26 = vld [vmem:[#allocation155_spill] sm:$0xff] }
 0x876   :  { %29201 = vmatprep.subr.bf16.mxu1 %v35136_v59 }
 0x87c   :  { %27932 = vmatmul.mubr.f32.vlgmr.msra.gmra.mrb[48].mxu1 %v32162_v33 }
 0x87d   :  { %29203 = vmatpush3.bf16.msra.mxu1 %v35136_v59  ;;  %27938 = vmatprep.mubr.f32.mxu1 %v32115_v27 }
 0x87e   :  { %29205 = vmatprep.subr.bf16.mxu1 %v35134_v24 }
 0x884   :  { %27939 = vmatmul.mubr.f32.vlgmr.msra.gmra.mrb[48].mxu1 %v32165_v6 }
 0x885   :  { %29207 = vmatpush3.bf16.msra.mxu1 %v35134_v24  ;;  %27945 = vmatprep.mubr.f32.mxu1 %v32119_v45 }
 0x886   :  { %29209 = vmatprep.subr.bf16.mxu1 %v35137_v15 }
 0x88c   :  { %27946 = vmatmul.mubr.f32.vlgmr.msra.gmra.mrb[48].mxu1 %v32168_v39 }
 0x88d   :  { %29211 = vmatpush3.bf16.msra.mxu1 %v35137_v15  ;;  %27952 = vmatprep.mubr.f32.mxu1 %v32111_v4  ;;  %v35138_v15 = vld [vmem:[#allocation110_spill] sm:$0xff] }
 0x88e   :  { %29213 = vmatprep.subr.bf16.mxu1 %v35134_v24 }
 0x893   :  { %v33345_v59 = vpop.f32.mrb[38].mxu1 }
 0x894   :  { %v33349_v25 = vpop.f32.mrb[39].mxu1  ;;  %27953 = vmatmul.mubr.f32.vlgmr.msra.gmra.mrb[48].mxu1 %v32162_v33 }
 0x895   :  { %29215 = vmatpush3.bf16.msra.mxu1 %v35134_v24  ;;  %27959 = vmatprep.mubr.f32.mxu1 %v32111_v4  ;;  %v35141_v24 = vld [vmem:[#allocation140_spill] sm:$0xff] }
 0x896   :  { %29217 = vmatprep.subr.bf16.mxu1 %v35138_v15 }
 0x89c   :  { %27960 = vmatmul.mubr.f32.vlgmr.msra.gmra.mrb[48].mxu1 %v32162_v33 }
 0x89d   :  { %29219 = vmatpush3.bf16.msra.mxu1 %v35138_v15  ;;  %27966 = vmatprep.mubr.f32.mxu1 %v32125_v40 }
 0x89e   :  { %29221 = vmatprep.subr.bf16.mxu1 %v35139_v26 }
 0x8a0   :  { %27967 = vmatmul.mubr.f32.vlgmr.msra.gmra.mrb[50].mxu1 %v32175_v13 }
 0x8a1   :  { %29223 = vmatpush3.bf16.msra.mxu1 %v35139_v26  ;;  %27973 = vmatprep.mubr.f32.mxu1 %v32111_v4  ;;  %v35143_v26 = vld [vmem:[#allocation15_spill] sm:$0xff] }
 0x8a2   :  { %29225 = vmatprep.subr.bf16.mxu1 %v35140_v1 }
 0x8a8   :  { %27974 = vmatmul.mubr.f32.vlgmr.msra.gmra.mrb[50].mxu1 %v32162_v33 }
 0x8a9   :  { %29227 = vmatpush3.bf16.msra.mxu1 %v35140_v1  ;;  %27980 = vmatprep.mubr.f32.mxu1 %v32115_v27 }
 0x8aa   :  { %29229 = vmatprep.subr.bf16.mxu1 %v35138_v15 }
 0x8b0   :  { %27981 = vmatmul.mubr.f32.vlgmr.msra.gmra.mrb[50].mxu1 %v32165_v6 }
 0x8b1   :  { %29231 = vmatpush3.bf16.msra.mxu1 %v35138_v15  ;;  %27987 = vmatprep.mubr.f32.mxu1 %v32119_v45 }
 0x8b2   :  { %29233 = vmatprep.subr.bf16.mxu1 %v35141_v24 }
 0x8b8   :  { %27988 = vmatmul.mubr.f32.vlgmr.msra.gmra.mrb[50].mxu1 %v32168_v39 }
 0x8b9   :  { %29235 = vmatpush3.bf16.msra.mxu1 %v35141_v24  ;;  %27994 = vmatprep.mubr.f32.mxu1 %v32111_v4  ;;  %v35142_v24 = vld [vmem:[#allocation132_spill] sm:$0xff] }
 0x8ba   :  { %29237 = vmatprep.subr.bf16.mxu1 %v35138_v15 }
 0x8bf   :  { %v33377_v1 = vpop.f32.mrb[40].mxu1 }
 0x8c0   :  { %v33381_v49 = vpop.f32.mrb[41].mxu1  ;;  %27995 = vmatmul.mubr.f32.vlgmr.msra.gmra.mrb[50].mxu1 %v32162_v33 }
 0x8c1   :  { %29239 = vmatpush3.bf16.msra.mxu1 %v35138_v15  ;;  %28001 = vmatprep.mubr.f32.mxu1 %v32111_v4  ;;  %v35145_v15 = vld [vmem:[#allocation160_spill] sm:$0xff] }
 0x8c2   :  { %29241 = vmatprep.subr.bf16.mxu1 %v35142_v24 }
 0x8c8   :  { %28002 = vmatmul.mubr.f32.vlgmr.msra.gmra.mrb[50].mxu1 %v32162_v33 }
 0x8c9   :  { %29243 = vmatpush3.bf16.msra.mxu1 %v35142_v24  ;;  %28008 = vmatprep.mubr.f32.mxu1 %v32125_v40 }
 0x8ca   :  { %29245 = vmatprep.subr.bf16.mxu1 %v35143_v26 }
 0x8cc   :  { %28009 = vmatmul.mubr.f32.vlgmr.msra.gmra.mrb[52].mxu1 %v32175_v13 }
 0x8cd   :  { %29247 = vmatpush3.bf16.msra.mxu1 %v35143_v26  ;;  %28015 = vmatprep.mubr.f32.mxu1 %v32111_v4 }
 0x8ce   :  { %29249 = vmatprep.subr.bf16.mxu1 %v35144_v9 }
 0x8d4   :  { %28016 = vmatmul.mubr.f32.vlgmr.msra.gmra.mrb[52].mxu1 %v32162_v33 }
 0x8d5   :  { %29251 = vmatpush3.bf16.msra.mxu1 %v35144_v9  ;;  %28022 = vmatprep.mubr.f32.mxu1 %v32115_v27 }
 0x8d6   :  { %29253 = vmatprep.subr.bf16.mxu1 %v35142_v24 }
 0x8dc   :  { %28023 = vmatmul.mubr.f32.vlgmr.msra.gmra.mrb[52].mxu1 %v32165_v6 }
 0x8dd   :  { %29255 = vmatpush3.bf16.msra.mxu1 %v35142_v24  ;;  %28029 = vmatprep.mubr.f32.mxu1 %v32119_v45 }
 0x8de   :  { %29257 = vmatprep.subr.bf16.mxu1 %v35145_v15 }
 0x8e4   :  { %28030 = vmatmul.mubr.f32.vlgmr.msra.gmra.mrb[52].mxu1 %v32168_v39 }
 0x8e5   :  { %29259 = vmatpush3.bf16.msra.mxu1 %v35145_v15  ;;  %28036 = vmatprep.mubr.f32.mxu1 %v32111_v4  ;;  %v35146_v15 = vld [vmem:[#allocation152_spill] sm:$0xff] }
 0x8e6   :  { %29261 = vmatprep.subr.bf16.mxu1 %v35142_v24 }
 0x8eb   :  { %v33409_v9 = vpop.f32.mrb[42].mxu1 }
 0x8ec   :  { %v33413_v37 = vpop.f32.mrb[43].mxu1  ;;  %28037 = vmatmul.mubr.f32.vlgmr.msra.gmra.mrb[52].mxu1 %v32162_v33 }
 0x8ed   :  { %29263 = vmatpush3.bf16.msra.mxu1 %v35142_v24  ;;  %28043 = vmatprep.mubr.f32.mxu1 %v32111_v4  ;;  %v35148_v24 = vld [vmem:[#allocation17_spill] sm:$0xff] }
 0x8ee   :  { %29265 = vmatprep.subr.bf16.mxu1 %v35146_v15 }
 0x8f4   :  { %28044 = vmatmul.mubr.f32.vlgmr.msra.gmra.mrb[52].mxu1 %v32162_v33 }
 0x8f5   :  { %29267 = vmatpush3.bf16.msra.mxu1 %v35146_v15  ;;  %28050 = vmatprep.mubr.f32.mxu1 %v32125_v40 }
 0x8f6   :  { %29269 = vmatprep.subr.bf16.mxu1 %v32457_v20 }
 0x8f8   :  { %28051 = vmatmul.mubr.f32.vlgmr.msra.gmra.mrb[54].mxu1 %v32175_v13 }
 0x8f9   :  { %29271 = vmatpush3.bf16.msra.mxu1 %v32457_v20  ;;  %28057 = vmatprep.mubr.f32.mxu1 %v32111_v4 }
 0x8fa   :  { %29273 = vmatprep.subr.bf16.mxu1 %v35147_v31 }
 0x900   :  { %28058 = vmatmul.mubr.f32.vlgmr.msra.gmra.mrb[54].mxu1 %v32162_v33 }
 0x901   :  { %29275 = vmatpush3.bf16.msra.mxu1 %v35147_v31  ;;  %28064 = vmatprep.mubr.f32.mxu1 %v32115_v27  ;;  %v35152_v31 = vld [vmem:[#allocation29_spill] sm:$0xff] }
 0x902   :  { %29277 = vmatprep.subr.bf16.mxu1 %v35146_v15 }
 0x908   :  { %28065 = vmatmul.mubr.f32.vlgmr.msra.gmra.mrb[54].mxu1 %v32165_v6 }
 0x909   :  { %29279 = vmatpush3.bf16.msra.mxu1 %v35146_v15  ;;  %28071 = vmatprep.mubr.f32.mxu1 %v32119_v45 }
 0x90a   :  { %29281 = vmatprep.subr.bf16.mxu1 %v35148_v24 }
 0x910   :  { %28072 = vmatmul.mubr.f32.vlgmr.msra.gmra.mrb[54].mxu1 %v32168_v39 }
 0x911   :  { %29283 = vmatpush3.bf16.msra.mxu1 %v35148_v24  ;;  %28078 = vmatprep.mubr.f32.mxu1 %v32111_v4  ;;  %v35151_v24 = vld [vmem:[#allocation164_spill] sm:$0xff] }
 0x912   :  { %29285 = vmatprep.subr.bf16.mxu1 %v35146_v15 }
 0x917   :  { %v33441_v20 = vpop.f32.mrb[44].mxu1 }
 0x918   :  { %35149 = vst [vmem:[#allocation144_spill] sm:$0xff] %v33441_v20  ;;  %v33445_v26 = vpop.f32.mrb[45].mxu1  ;;  %28079 = vmatmul.mubr.f32.vlgmr.msra.gmra.mrb[54].mxu1 %v32162_v33  ;;  %v24532_v20 = vadd.f32 0.0001, %v32877_v11 }
 0x919   :  { %35150 = vst [vmem:[#allocation16_spill] sm:$0xff] %v33445_v26  ;;  %29287 = vmatpush3.bf16.msra.mxu1 %v35146_v15  ;;  %28085 = vmatprep.mubr.f32.mxu1 %v32111_v4  ;;  %v35154_v15 = vld [vmem:[#allocation24_spill] sm:$0xff]  ;;  %v35158_v26 = vld [vmem:[#allocation25_spill] sm:$0xff] }
 0x91a   :  { %29289 = vmatprep.subr.bf16.mxu1 %v35151_v24 }
 0x920   :  { %28086 = vmatmul.mubr.f32.vlgmr.msra.gmra.mrb[54].mxu1 %v32162_v33 }
 0x921   :  { %29291 = vmatpush3.bf16.msra.mxu1 %v35151_v24  ;;  %28092 = vmatprep.mubr.f32.mxu1 %v32125_v40 }
 0x922   :  { %29293 = vmatprep.subr.bf16.mxu1 %v35152_v31 }
 0x924   :  { %28093 = vmatmul.mubr.f32.vlgmr.msra.gmra.mrb[56].mxu1 %v32175_v13 }
 0x925   :  { %29295 = vmatpush3.bf16.msra.mxu1 %v35152_v31  ;;  %28099 = vmatprep.mubr.f32.mxu1 %v32111_v4 }
 0x926   :  { %29297 = vmatprep.subr.bf16.mxu1 %v35153_v52 }
 0x92c   :  { %28100 = vmatmul.mubr.f32.vlgmr.msra.gmra.mrb[56].mxu1 %v32162_v33 }
 0x92d   :  { %29299 = vmatpush3.bf16.msra.mxu1 %v35153_v52  ;;  %28106 = vmatprep.mubr.f32.mxu1 %v32115_v27 }
 0x92e   :  { %29301 = vmatprep.subr.bf16.mxu1 %v35151_v24 }
 0x934   :  { %28107 = vmatmul.mubr.f32.vlgmr.msra.gmra.mrb[56].mxu1 %v32165_v6 }
 0x935   :  { %29303 = vmatpush3.bf16.msra.mxu1 %v35151_v24  ;;  %28113 = vmatprep.mubr.f32.mxu1 %v32119_v45 }
 0x936   :  { %29305 = vmatprep.subr.bf16.mxu1 %v35154_v15 }
 0x93c   :  { %28114 = vmatmul.mubr.f32.vlgmr.msra.gmra.mrb[56].mxu1 %v32168_v39 }
 0x93d   :  { %29307 = vmatpush3.bf16.msra.mxu1 %v35154_v15  ;;  %28120 = vmatprep.mubr.f32.mxu1 %v32111_v4  ;;  %v35157_v15 = vld [vmem:[#allocation20_spill] sm:$0xff] }
 0x93e   :  { %29309 = vmatprep.subr.bf16.mxu1 %v35151_v24 }
 0x943   :  { %v33473_v52 = vpop.f32.mrb[46].mxu1 }
 0x944   :  { %35155 = vst [vmem:[#allocation21_spill] sm:$0xff] %v33473_v52  ;;  %v33477_v0 = vpop.f32.mrb[47].mxu1  ;;  %28121 = vmatmul.mubr.f32.vlgmr.msra.gmra.mrb[56].mxu1 %v32162_v33  ;;  %v35162_v52 = vsub.f32 %v33253_v48, %v32861_v28  ;;  %v35164_v28 = vld [vmem:[#allocation33_spill] sm:$0xff] }
 0x945   :  { %35156 = vst [vmem:[#allocation19_spill] sm:$0xff] %v33477_v0  ;;  %29311 = vmatpush3.bf16.msra.mxu1 %v35151_v24  ;;  %28127 = vmatprep.mubr.f32.mxu1 %v32111_v4  ;;  %v35159_v24 = vld [vmem:[#allocation32_spill] sm:$0xff]  ;;  %v35160_v0 = vsub.f32 %v33249_v58, %v32851_v55 }
 0x946   :  { %29313 = vmatprep.subr.bf16.mxu1 %v35157_v15  ;;  %v35163_v55 = vld [vmem:[#allocation44_spill] sm:$0xff] }
 0x94c   :  { %28128 = vmatmul.mubr.f32.vlgmr.msra.gmra.mrb[56].mxu1 %v32162_v33 }
 0x94d   :  { %29315 = vmatpush3.bf16.msra.mxu1 %v35157_v15  ;;  %28134 = vmatprep.mubr.f32.mxu1 %v32125_v40 }
 0x94e   :  { %29317 = vmatprep.subr.bf16.mxu1 %v32477_v32 }
 0x950   :  { %28135 = vmatmul.mubr.f32.vlgmr.msra.gmra.mrb[58].mxu1 %v32175_v13 }
 0x951   :  { %29319 = vmatpush3.bf16.msra.mxu1 %v32477_v32  ;;  %28141 = vmatprep.mubr.f32.mxu1 %v32111_v4 }
 0x952   :  { %29321 = vmatprep.subr.bf16.mxu1 %v35158_v26 }
 0x958   :  { %28142 = vmatmul.mubr.f32.vlgmr.msra.gmra.mrb[58].mxu1 %v32162_v33 }
 0x959   :  { %29323 = vmatpush3.bf16.msra.mxu1 %v35158_v26  ;;  %28148 = vmatprep.mubr.f32.mxu1 %v32115_v27 }
 0x95a   :  { %29325 = vmatprep.subr.bf16.mxu1 %v35157_v15 }
 0x960   :  { %28149 = vmatmul.mubr.f32.vlgmr.msra.gmra.mrb[58].mxu1 %v32165_v6 }
 0x961   :  { %29327 = vmatpush3.bf16.msra.mxu1 %v35157_v15  ;;  %28155 = vmatprep.mubr.f32.mxu1 %v32119_v45 }
 0x962   :  { %29329 = vmatprep.subr.bf16.mxu1 %v35159_v24 }
 0x968   :  { %28156 = vmatmul.mubr.f32.vlgmr.msra.gmra.mrb[58].mxu1 %v32168_v39 }
 0x969   :  { %29331 = vmatpush3.bf16.msra.mxu1 %v35159_v24  ;;  %28162 = vmatprep.mubr.f32.mxu1 %v32111_v4 }
 0x96a   :  { %29333 = vmatprep.subr.bf16.mxu1 %v35157_v15 }
 0x96f   :  { %v27961_v32 = vpop.f32.mrb[48].mxu1 }
 0x970   :  { %v24405_v26 = vsub.f32 %v27961_v32, %v32853_v35  ;;  %v16800_v31 = vpop.f32.mrb[49].mxu1  ;;  %28163 = vmatmul.mubr.f32.vlgmr.msra.gmra.mrb[58].mxu1 %v32162_v33  ;;  %v24533_v35 = vadd.f32 0.0001, %v32872_v41  ;;  %v35165_v41 = vld [vmem:[#allocation35_spill] sm:$0xff] }
 0x971   :  { %v24404_v19 = vsub.f32 %v16800_v31, %v32863_v47  ;;  %29335 = vmatpush3.bf16.msra.mxu1 %v35157_v15  ;;  %28169 = vmatprep.mubr.f32.mxu1 %v32111_v4 }
 0x972   :  { %v24549_v24 = vadd.f32 %v24405_v26, %v35160_v0  ;;  %29337 = vmatprep.subr.bf16.mxu1 %v35161_v60 }
 0x973   :  { %v24548_v21 = vadd.f32 %v24404_v19, %v35162_v52  ;;  %v35166_v19 = vsub.f32 %v33281_v50, %v32901_v63  ;;  %v35168_v52 = vsub.f32 %v33285_v56, %v32911_v3  ;;  %v35169_v63 = vld [vmem:[#allocation40_spill] sm:$0xff]  ;;  %v35170_v3 = vld [vmem:[#allocation45_spill] sm:$0xff]  ;;  %v35171_v50 = vsub.f32 %v33313_v14, %v32951_v18 }
 0x974   :  { %v24565_v32 = vadd.f32 0.0009, %v24549_v24  ;;  %v35174_v18 = vld [vmem:[#allocation56_spill] sm:$0xff] }
 0x975   :  { %v24564_v47 = vadd.f32 0.0009, %v24548_v21 }
 0x976   :  { %v33519_v31 = vmul.f32 %v24565_v32, %v24533_v35  ;;  %v24534_v35 = vadd.f32 0.0001, %v32927_v57 }
 0x977   :  { %v33521_v15 = vmul.f32 %v24564_v47, %v24532_v20  ;;  %v35167_v20 = vld [vmem:[#allocation34_spill] sm:$0xff] }
 0x978   :  { %28170 = vmatmul.mubr.f32.vlgmr.msra.gmra.mrb[58].mxu1 %v32162_v33  ;;  %30385 = vrcp.f32 %v33519_v31  ;;  %v35229_v31 = vld [vmem:[#allocation84_spill] sm:$0xff] }
 0x979   :  { %29339 = vmatpush3.bf16.msra.mxu1 %v35161_v60  ;;  %28176 = vmatprep.mubr.f32.mxu1 %v32125_v40  ;;  %30387 = vrcp.f32 %v33521_v15 }
 0x97a   :  { %29341 = vmatprep.subr.bf16.mxu1 %v35163_v55 }
 0x97c   :  { %28177 = vmatmul.mubr.f32.vlgmr.msra.gmra.mrb[60].mxu1 %v32175_v13 }
 0x97d   :  { %29343 = vmatpush3.bf16.msra.mxu1 %v35163_v55  ;;  %28183 = vmatprep.mubr.f32.mxu1 %v32111_v4  ;;  %v35172_v55 = vld [vmem:[#allocation41_spill] sm:$0xff] }
 0x97e   :  { %29345 = vmatprep.subr.bf16.mxu1 %v35164_v28 }
 0x984   :  { %28184 = vmatmul.mubr.f32.vlgmr.msra.gmra.mrb[60].mxu1 %v32162_v33 }
 0x985   :  { %29347 = vmatpush3.bf16.msra.mxu1 %v35164_v28  ;;  %28190 = vmatprep.mubr.f32.mxu1 %v32115_v27  ;;  %v35173_v28 = vsub.f32 %v33317_v12, %v32961_v34  ;;  %v35175_v34 = vld [vmem:[#allocation48_spill] sm:$0xff] }
 0x986   :  { %29349 = vmatprep.subr.bf16.mxu1 %v35161_v60 }
 0x98c   :  { %28191 = vmatmul.mubr.f32.vlgmr.msra.gmra.mrb[60].mxu1 %v32165_v6 }
 0x98d   :  { %29351 = vmatpush3.bf16.msra.mxu1 %v35161_v60  ;;  %28197 = vmatprep.mubr.f32.mxu1 %v32119_v45 }
 0x98e   :  { %29353 = vmatprep.subr.bf16.mxu1 %v35165_v41 }
 0x994   :  { %28198 = vmatmul.mubr.f32.vlgmr.msra.gmra.mrb[60].mxu1 %v32168_v39 }
 0x995   :  { %29355 = vmatpush3.bf16.msra.mxu1 %v35165_v41  ;;  %28204 = vmatprep.mubr.f32.mxu1 %v32111_v4 }
 0x996   :  { %29357 = vmatprep.subr.bf16.mxu1 %v35161_v60 }
 0x99b   :  { %v28003_v11 = vpop.f32.mrb[50].mxu1 }
 0x99c   :  { %v24407_v21 = vsub.f32 %v28003_v11, %v32903_v16  ;;  %v17302_v0 = vpop.f32.mrb[51].mxu1  ;;  %28205 = vmatmul.mubr.f32.vlgmr.msra.gmra.mrb[60].mxu1 %v32162_v33  ;;  %v24535_v16 = vadd.f32 0.0001, %v32922_v62 }
 0x99d   :  { %v24406_v48 = vsub.f32 %v17302_v0, %v32913_v42  ;;  %29359 = vmatpush3.bf16.msra.mxu1 %v35161_v60  ;;  %28211 = vmatprep.mubr.f32.mxu1 %v32111_v4 }
 0x99e   :  { %v24551_v58 = vadd.f32 %v24407_v21, %v35166_v19  ;;  %29361 = vmatprep.subr.bf16.mxu1 %v35167_v20  ;;  %v24536_v21 = vadd.f32 0.0001, %v32977_v46 }
 0x99f   :  { %v24550_v26 = vadd.f32 %v24406_v48, %v35168_v52  ;;  %v35178_v52 = vld [vmem:[#allocation49_spill] sm:$0xff] }
 0x9a0   :  { %v24567_v24 = vadd.f32 0.0009, %v24551_v58  ;;  %v35177_v58 = vsub.f32 %v33345_v59, %v33001_v29  ;;  %v35180_v29 = vld [vmem:[#allocation65_spill] sm:$0xff] }
 0x9a1   :  { %v24566_v42 = vadd.f32 0.0009, %v24550_v26  ;;  %v35179_v26 = vsub.f32 %v33349_v25, %v33011_v7  ;;  %v35181_v25 = vld [vmem:[#allocation51_spill] sm:$0xff] }
 0x9a2   :  { %v33557_v32 = vmul.f32 %v24567_v24, %v24535_v16 }
 0x9a3   :  { %v33559_v60 = vmul.f32 %v24566_v42, %v24534_v35  ;;  %v24538_v35 = vadd.f32 0.0001, %v33027_v30  ;;  %v35182_v30 = vld [vmem:[#allocation60_spill] sm:$0xff] }
 0x9a4   :  { %28212 = vmatmul.mubr.f32.vlgmr.msra.gmra.mrb[60].mxu1 %v32162_v33  ;;  %30389 = vrcp.f32 %v33557_v32  ;;  %v35235_v32 = vld [vmem:[#allocation94_spill] sm:$0xff] }
 0x9a5   :  { %29363 = vmatpush3.bf16.msra.mxu1 %v35167_v20  ;;  %28218 = vmatprep.mubr.f32.mxu1 %v32125_v40  ;;  %30391 = vrcp.f32 %v33559_v60 }
 0x9a6   :  { %29365 = vmatprep.subr.bf16.mxu1 %v32497_v44 }
 0x9a8   :  { %28219 = vmatmul.mubr.f32.vlgmr.msra.gmra.mrb[62].mxu1 %v32175_v13 }
 0x9a9   :  { %29367 = vmatpush3.bf16.msra.mxu1 %v32497_v44  ;;  %28225 = vmatprep.mubr.f32.mxu1 %v32111_v4 }
 0x9aa   :  { %29369 = vmatprep.subr.bf16.mxu1 %v35169_v63 }
 0x9b0   :  { %28226 = vmatmul.mubr.f32.vlgmr.msra.gmra.mrb[62].mxu1 %v32162_v33 }
 0x9b1   :  { %29371 = vmatpush3.bf16.msra.mxu1 %v35169_v63  ;;  %28232 = vmatprep.mubr.f32.mxu1 %v32115_v27 }
 0x9b2   :  { %29373 = vmatprep.subr.bf16.mxu1 %v35167_v20 }
 0x9b8   :  { %28233 = vmatmul.mubr.f32.vlgmr.msra.gmra.mrb[62].mxu1 %v32165_v6 }
 0x9b9   :  { %29375 = vmatpush3.bf16.msra.mxu1 %v35167_v20  ;;  %28239 = vmatprep.mubr.f32.mxu1 %v32119_v45 }
 0x9ba   :  { %29377 = vmatprep.subr.bf16.mxu1 %v35170_v3 }
 0x9c0   :  { %28240 = vmatmul.mubr.f32.vlgmr.msra.gmra.mrb[62].mxu1 %v32168_v39 }
 0x9c1   :  { %29379 = vmatpush3.bf16.msra.mxu1 %v35170_v3  ;;  %28246 = vmatprep.mubr.f32.mxu1 %v32111_v4 }
 0x9c2   :  { %29381 = vmatprep.subr.bf16.mxu1 %v35167_v20 }
 0x9c7   :  { %v28045_v44 = vpop.f32.mrb[52].mxu1 }
 0x9c8   :  { %v24409_v62 = vsub.f32 %v28045_v44, %v32953_v2  ;;  %v17804_v57 = vpop.f32.mrb[53].mxu1  ;;  %28247 = vmatmul.mubr.f32.vlgmr.msra.gmra.mrb[62].mxu1 %v32162_v33  ;;  %v24537_v2 = vadd.f32 0.0001, %v32972_v43  ;;  %v35176_v43 = vld [vmem:[#allocation50_spill] sm:$0xff]  ;;  %v35183_v44 = vsub.f32 %v33377_v1, %v33051_v53  ;;  %v35188_v53 = vld [vmem:[#allocation151_spill] sm:$0xff]  ;;  %v35189_v1 = vld [vmem:[#allocation156_spill] sm:$0xff] }
 0x9c9   :  { %v24408_v56 = vsub.f32 %v17804_v57, %v32963_v17  ;;  %29383 = vmatpush3.bf16.msra.mxu1 %v35167_v20  ;;  %28253 = vmatprep.mubr.f32.mxu1 %v32111_v4  ;;  %v35184_v57 = vld [vmem:[#allocation55_spill] sm:$0xff] }
 0x9ca   :  { %v24553_v47 = vadd.f32 %v24409_v62, %v35171_v50  ;;  %29385 = vmatprep.subr.bf16.mxu1 %v35172_v55 }
 0x9cb   :  { %v24552_v41 = vadd.f32 %v24408_v56, %v35173_v28  ;;  %v35185_v56 = vsub.f32 %v33381_v49, %v33061_v8  ;;  %v35187_v49 = vld [vmem:[#allocation66_spill] sm:$0xff] }
 0x9cc   :  { %v24569_v11 = vadd.f32 0.0009, %v24553_v47 }
 0x9cd   :  { %v24568_v17 = vadd.f32 0.0009, %v24552_v41 }
 0x9ce   :  { %v33595_v0 = vmul.f32 %v24569_v11, %v24537_v2  ;;  %v35190_v11 = vsub.f32 %v33409_v9, %v33101_v10  ;;  %v35196_v10 = vld [vmem:[#allocation79_spill] sm:$0xff]  ;;  %v35198_v9 = vld [vmem:[#allocation73_spill] sm:$0xff] }
 0x9cf   :  { %v33597_v48 = vmul.f32 %v24568_v17, %v24536_v21  ;;  %v35191_v17 = vld [vmem:[#allocation64_spill] sm:$0xff] }
 0x9d0   :  { %28254 = vmatmul.mubr.f32.vlgmr.msra.gmra.mrb[62].mxu1 %v32162_v33  ;;  %30393 = vrcp.f32 %v33595_v0 }
 0x9d1   :  { %29387 = vmatpush3.bf16.msra.mxu1 %v35172_v55  ;;  %28260 = vmatprep.mubr.f32.mxu1 %v32125_v40  ;;  %30395 = vrcp.f32 %v33597_v48 }
 0x9d2   :  { %29389 = vmatprep.subr.bf16.mxu1 %v35174_v18 }
 0x9d4   :  { %28261 = vmatmul.mubr.f32.vlgmr.msra.gmra.mrb[64].mxu1 %v32175_v13 }
 0x9d5   :  { %29391 = vmatpush3.bf16.msra.mxu1 %v35174_v18  ;;  %28267 = vmatprep.mubr.f32.mxu1 %v32111_v4  ;;  %v35192_v18 = vld [vmem:[#allocation154_spill] sm:$0xff] }
 0x9d6   :  { %29393 = vmatprep.subr.bf16.mxu1 %v35175_v34 }
 0x9dc   :  { %28268 = vmatmul.mubr.f32.vlgmr.msra.gmra.mrb[64].mxu1 %v32162_v33 }
 0x9dd   :  { %29395 = vmatpush3.bf16.msra.mxu1 %v35175_v34  ;;  %28274 = vmatprep.mubr.f32.mxu1 %v32115_v27  ;;  %v35193_v34 = vsub.f32 %v33413_v37, %v35192_v18  ;;  %v35197_v37 = vld [vmem:[#allocation68_spill] sm:$0xff]  ;;  %v35215_v18 = vld [vmem:[#allocation21_spill] sm:$0xff] }
 0x9de   :  { %29397 = vmatprep.subr.bf16.mxu1 %v35172_v55 }
 0x9e4   :  { %28275 = vmatmul.mubr.f32.vlgmr.msra.gmra.mrb[64].mxu1 %v32165_v6 }
 0x9e5   :  { %29399 = vmatpush3.bf16.msra.mxu1 %v35172_v55  ;;  %28281 = vmatprep.mubr.f32.mxu1 %v32119_v45 }
 0x9e6   :  { %29401 = vmatprep.subr.bf16.mxu1 %v35176_v43 }
 0x9ec   :  { %28282 = vmatmul.mubr.f32.vlgmr.msra.gmra.mrb[64].mxu1 %v32168_v39 }
 0x9ed   :  { %29403 = vmatpush3.bf16.msra.mxu1 %v35176_v43  ;;  %28288 = vmatprep.mubr.f32.mxu1 %v32111_v4 }
 0x9ee   :  { %29405 = vmatprep.subr.bf16.mxu1 %v35172_v55 }
 0x9f3   :  { %v28087_v46 = vpop.f32.mrb[54].mxu1 }
 0x9f4   :  { %v24411_v12 = vsub.f32 %v28087_v46, %v33003_v36  ;;  %v18306_v14 = vpop.f32.mrb[55].mxu1  ;;  %28289 = vmatmul.mubr.f32.vlgmr.msra.gmra.mrb[64].mxu1 %v32162_v33  ;;  %v24539_v36 = vadd.f32 0.0001, %v33022_v38  ;;  %v35194_v46 = vld [vmem:[#allocation159_spill] sm:$0xff] }
 0x9f5   :  { %v24410_v19 = vsub.f32 %v18306_v14, %v33013_v61  ;;  %29407 = vmatpush3.bf16.msra.mxu1 %v35172_v55  ;;  %28295 = vmatprep.mubr.f32.mxu1 %v32111_v4  ;;  %v24540_v55 = vadd.f32 0.0001, %v33077_v23  ;;  %v35186_v23 = vld [vmem:[#allocation61_spill] sm:$0xff] }
 0x9f6   :  { %v24555_v20 = vadd.f32 %v24411_v12, %v35177_v58  ;;  %29409 = vmatprep.subr.bf16.mxu1 %v35178_v52  ;;  %v24543_v12 = vadd.f32 0.0001, %v35194_v46 }
 0x9f7   :  { %v24554_v16 = vadd.f32 %v24410_v19, %v35179_v26  ;;  %v35195_v19 = vld [vmem:[#allocation161_spill] sm:$0xff] }
 0x9f8   :  { %v24571_v24 = vadd.f32 0.0009, %v24555_v20  ;;  %v24542_v58 = vadd.f32 0.0001, %v35195_v19  ;;  %v35220_v19 = vld [vmem:[#allocation137_spill] sm:$0xff] }
 0x9f9   :  { %v24570_v61 = vadd.f32 0.0009, %v24554_v16 }
 0x9fa   :  { %v33633_v42 = vmul.f32 %v24571_v24, %v24539_v36  ;;  %v35199_v36 = vld [vmem:[#allocation121_spill] sm:$0xff] }
 0x9fb   :  { %v33635_v63 = vmul.f32 %v24570_v61, %v24538_v35  ;;  %v35200_v61 = vld [vmem:[#allocation127_spill] sm:$0xff] }
 0x9fc   :  { %28296 = vmatmul.mubr.f32.vlgmr.msra.gmra.mrb[64].mxu1 %v32162_v33  ;;  %30397 = vrcp.f32 %v33633_v42 }
 0x9fd   :  { %29411 = vmatpush3.bf16.msra.mxu1 %v35178_v52  ;;  %28302 = vmatprep.mubr.f32.mxu1 %v32125_v40  ;;  %30399 = vrcp.f32 %v33635_v63 }
 0x9fe   :  { %29413 = vmatprep.subr.bf16.mxu1 %v35180_v29 }
 0xa00   :  { %28303 = vmatmul.mubr.f32.vlgmr.msra.gmra.mrb[66].mxu1 %v32175_v13 }
 0xa01   :  { %29415 = vmatpush3.bf16.msra.mxu1 %v35180_v29  ;;  %28309 = vmatprep.mubr.f32.mxu1 %v32111_v4 }
 0xa02   :  { %29417 = vmatprep.subr.bf16.mxu1 %v35181_v25 }
 0xa08   :  { %28310 = vmatmul.mubr.f32.vlgmr.msra.gmra.mrb[66].mxu1 %v32162_v33 }
 0xa09   :  { %29419 = vmatpush3.bf16.msra.mxu1 %v35181_v25  ;;  %28316 = vmatprep.mubr.f32.mxu1 %v32115_v27  ;;  %v35201_v25 = vld [vmem:[#allocation144_spill] sm:$0xff] }
 0xa0a   :  { %29421 = vmatprep.subr.bf16.mxu1 %v35178_v52 }
 0xa10   :  { %28317 = vmatmul.mubr.f32.vlgmr.msra.gmra.mrb[66].mxu1 %v32165_v6 }
 0xa11   :  { %29423 = vmatpush3.bf16.msra.mxu1 %v35178_v52  ;;  %28323 = vmatprep.mubr.f32.mxu1 %v32119_v45 }
 0xa12   :  { %29425 = vmatprep.subr.bf16.mxu1 %v35182_v30 }
 0xa18   :  { %28324 = vmatmul.mubr.f32.vlgmr.msra.gmra.mrb[66].mxu1 %v32168_v39 }
 0xa19   :  { %29427 = vmatpush3.bf16.msra.mxu1 %v35182_v30  ;;  %28330 = vmatprep.mubr.f32.mxu1 %v32111_v4  ;;  %v35202_v30 = vld [vmem:[#allocation162_spill] sm:$0xff] }
 0xa1a   :  { %29429 = vmatprep.subr.bf16.mxu1 %v35178_v52 }
 0xa1f   :  { %v28129_v7 = vpop.f32.mrb[56].mxu1 }
 0xa20   :  { %v24413_v38 = vsub.f32 %v28129_v7, %v33053_v22  ;;  %v18808_v59 = vpop.f32.mrb[57].mxu1  ;;  %28331 = vmatmul.mubr.f32.vlgmr.msra.gmra.mrb[66].mxu1 %v32162_v33  ;;  %v24541_v22 = vadd.f32 0.0001, %v33072_v54  ;;  %v35203_v7 = vsub.f32 %v35201_v25, %v35202_v30  ;;  %v35225_v25 = vld [vmem:[#allocation82_spill] sm:$0xff]  ;;  %v35226_v30 = vld [vmem:[#allocation89_spill] sm:$0xff] }
 0xa21   :  { %v24412_v3 = vsub.f32 %v18808_v59, %v33063_v51  ;;  %29431 = vmatpush3.bf16.msra.mxu1 %v35178_v52  ;;  %28337 = vmatprep.mubr.f32.mxu1 %v32111_v4  ;;  %v35204_v59 = vld [vmem:[#allocation71_spill] sm:$0xff] }
 0xa22   :  { %v24557_v62 = vadd.f32 %v24413_v38, %v35183_v44  ;;  %29433 = vmatprep.subr.bf16.mxu1 %v35184_v57  ;;  %v35206_v44 = vld [vmem:[#allocation125_spill] sm:$0xff] }
 0xa23   :  { %v24556_v50 = vadd.f32 %v24412_v3, %v35185_v56  ;;  %v35205_v3 = vld [vmem:[#allocation16_spill] sm:$0xff]  ;;  %v35208_v56 = vld [vmem:[#allocation130_spill] sm:$0xff] }
 0xa24   :  { %v24573_v47 = vadd.f32 0.0009, %v24557_v62  ;;  %v35207_v62 = vsub.f32 %v35205_v3, %v35206_v44 }
 0xa25   :  { %v24572_v51 = vadd.f32 0.0009, %v24556_v50  ;;  %v24545_v50 = vadd.f32 0.0001, %v35208_v56 }
 0xa26   :  { %v33671_v28 = vmul.f32 %v24573_v47, %v24541_v22  ;;  %v35209_v47 = vld [vmem:[#allocation131_spill] sm:$0xff] }
 0xa27   :  { %v33673_v41 = vmul.f32 %v24572_v51, %v24540_v55  ;;  %v24544_v55 = vadd.f32 0.0001, %v35209_v47 }
 0xa28   :  { %28338 = vmatmul.mubr.f32.vlgmr.msra.gmra.mrb[66].mxu1 %v32162_v33  ;;  %30401 = vrcp.f32 %v33671_v28 }
 0xa29   :  { %29435 = vmatpush3.bf16.msra.mxu1 %v35184_v57  ;;  %28344 = vmatprep.mubr.f32.mxu1 %v32125_v40  ;;  %30403 = vrcp.f32 %v33673_v41 }
 0xa2a   :  { %29437 = vmatprep.subr.bf16.mxu1 %v32529_v5 }
 0xa2c   :  { %28345 = vmatmul.mubr.f32.vlgmr.msra.gmra.mrb[68].mxu1 %v32175_v13 }
 0xa2d   :  { %29439 = vmatpush3.bf16.msra.mxu1 %v32529_v5  ;;  %28351 = vmatprep.mubr.f32.mxu1 %v32111_v4 }
 0xa2e   :  { %29441 = vmatprep.subr.bf16.mxu1 %v35186_v23 }
 0xa34   :  { %28352 = vmatmul.mubr.f32.vlgmr.msra.gmra.mrb[68].mxu1 %v32162_v33 }
 0xa35   :  { %29443 = vmatpush3.bf16.msra.mxu1 %v35186_v23  ;;  %28358 = vmatprep.mubr.f32.mxu1 %v32115_v27 }
 0xa36   :  { %29445 = vmatprep.subr.bf16.mxu1 %v35184_v57 }
 0xa3c   :  { %28359 = vmatmul.mubr.f32.vlgmr.msra.gmra.mrb[68].mxu1 %v32165_v6 }
 0xa3d   :  { %29447 = vmatpush3.bf16.msra.mxu1 %v35184_v57  ;;  %28365 = vmatprep.mubr.f32.mxu1 %v32119_v45 }
 0xa3e   :  { %29449 = vmatprep.subr.bf16.mxu1 %v35187_v49 }
 0xa44   :  { %28366 = vmatmul.mubr.f32.vlgmr.msra.gmra.mrb[68].mxu1 %v32168_v39 }
 0xa45   :  { %29451 = vmatpush3.bf16.msra.mxu1 %v35187_v49  ;;  %28372 = vmatprep.mubr.f32.mxu1 %v32111_v4 }
 0xa46   :  { %29453 = vmatprep.subr.bf16.mxu1 %v35184_v57 }
 0xa4b   :  { %v28171_v5 = vpop.f32.mrb[58].mxu1 }
 0xa4c   :  { %v24415_v8 = vsub.f32 %v28171_v5, %v35188_v53  ;;  %v19310_v54 = vpop.f32.mrb[59].mxu1  ;;  %28373 = vmatmul.mubr.f32.vlgmr.msra.gmra.mrb[68].mxu1 %v32162_v33  ;;  %v35210_v5 = vld [vmem:[#allocation85_spill] sm:$0xff]  ;;  %v35211_v53 = vld [vmem:[#allocation75_spill] sm:$0xff] }
 0xa4d   :  { %v24414_v2 = vsub.f32 %v19310_v54, %v35189_v1  ;;  %29455 = vmatpush3.bf16.msra.mxu1 %v35184_v57  ;;  %28379 = vmatprep.mubr.f32.mxu1 %v32111_v4  ;;  %v35213_v1 = vld [vmem:[#allocation135_spill] sm:$0xff] }
 0xa4e   :  { %v24559_v21 = vadd.f32 %v24415_v8, %v35190_v11  ;;  %29457 = vmatprep.subr.bf16.mxu1 %v35191_v17  ;;  %v35212_v8 = vld [vmem:[#allocation81_spill] sm:$0xff] }
 0xa4f   :  { %v24558_v43 = vadd.f32 %v24414_v2, %v35193_v34  ;;  %v35216_v34 = vld [vmem:[#allocation133_spill] sm:$0xff] }
 0xa50   :  { %v24575_v14 = vadd.f32 0.0009, %v24559_v21  ;;  %v35214_v21 = vld [vmem:[#allocation139_spill] sm:$0xff] }
 0xa51   :  { %v24574_v20 = vadd.f32 0.0009, %v24558_v43  ;;  %v35217_v43 = vsub.f32 %v35215_v18, %v35216_v34  ;;  %v35231_v34 = vld [vmem:[#allocation91_spill] sm:$0xff] }
 0xa52   :  { %v33709_v52 = vmul.f32 %v24575_v14, %v24543_v12  ;;  %v35218_v12 = vld [vmem:[#allocation77_spill] sm:$0xff]  ;;  %v35219_v14 = vld [vmem:[#allocation19_spill] sm:$0xff] }
 0xa53   :  { %v33711_v26 = vmul.f32 %v24574_v20, %v24542_v58  ;;  %v35221_v58 = vsub.f32 %v35219_v14, %v35220_v19 }
 0xa54   :  { %28380 = vmatmul.mubr.f32.vlgmr.msra.gmra.mrb[68].mxu1 %v32162_v33  ;;  %30405 = vrcp.f32 %v33709_v52 }
 0xa55   :  { %29459 = vmatpush3.bf16.msra.mxu1 %v35191_v17  ;;  %28386 = vmatprep.mubr.f32.mxu1 %v32125_v40  ;;  %30407 = vrcp.f32 %v33711_v26 }
 0xa56   :  { %29461 = vmatprep.subr.bf16.mxu1 %v35196_v10 }
 0xa58   :  { %28387 = vmatmul.mubr.f32.vlgmr.msra.gmra.mrb[70].mxu1 %v32175_v13 }
 0xa59   :  { %29463 = vmatpush3.bf16.msra.mxu1 %v35196_v10  ;;  %28393 = vmatprep.mubr.f32.mxu1 %v32111_v4  ;;  %v35222_v10 = vld [vmem:[#allocation142_spill] sm:$0xff] }
 0xa5a   :  { %29465 = vmatprep.subr.bf16.mxu1 %v35197_v37 }
 0xa60   :  { %28394 = vmatmul.mubr.f32.vlgmr.msra.gmra.mrb[70].mxu1 %v32162_v33 }
 0xa61   :  { %29467 = vmatpush3.bf16.msra.mxu1 %v35197_v37  ;;  %28400 = vmatprep.mubr.f32.mxu1 %v32115_v27  ;;  %v24547_v37 = vadd.f32 0.0001, %v35222_v10 }
 0xa62   :  { %29469 = vmatprep.subr.bf16.mxu1 %v35191_v17 }
 0xa68   :  { %28401 = vmatmul.mubr.f32.vlgmr.msra.gmra.mrb[70].mxu1 %v32165_v6 }
 0xa69   :  { %29471 = vmatpush3.bf16.msra.mxu1 %v35191_v17  ;;  %28407 = vmatprep.mubr.f32.mxu1 %v32119_v45 }
 0xa6a   :  { %29473 = vmatprep.subr.bf16.mxu1 %v35198_v9 }
 0xa70   :  { %28408 = vmatmul.mubr.f32.vlgmr.msra.gmra.mrb[70].mxu1 %v32168_v39 }
 0xa71   :  { %29475 = vmatpush3.bf16.msra.mxu1 %v35198_v9  ;;  %28414 = vmatprep.mubr.f32.mxu1 %v32111_v4 }
 0xa72   :  { %29477 = vmatprep.subr.bf16.mxu1 %v35191_v17 }
 0xa77   :  { %v28213_v16 = vpop.f32.mrb[60].mxu1 }
 0xa78   :  { %v24417_v24 = vsub.f32 %v28213_v16, %v35199_v36  ;;  %v19812_v35 = vpop.f32.mrb[61].mxu1  ;;  %28415 = vmatmul.mubr.f32.vlgmr.msra.gmra.mrb[70].mxu1 %v32162_v33  ;;  %v35223_v16 = vld [vmem:[#allocation143_spill] sm:$0xff] }
 0xa79   :  { %v24416_v29 = vsub.f32 %v19812_v35, %v35200_v61  ;;  %29479 = vmatpush3.bf16.msra.mxu1 %v35191_v17  ;;  %28421 = vmatprep.mubr.f32.mxu1 %v32111_v4  ;;  %v24546_v36 = vadd.f32 0.0001, %v35223_v16 }
 0xa7a   :  { %v24561_v38 = vadd.f32 %v24417_v24, %v35203_v7  ;;  %29481 = vmatprep.subr.bf16.mxu1 %v35204_v59 }
 0xa7b   :  { %v24560_v57 = vadd.f32 %v24416_v29, %v35207_v62  ;;  %v35224_v29 = vld [vmem:[#allocation95_spill] sm:$0xff]  ;;  %v35228_v62 = vld [vmem:[#allocation109_spill] sm:$0xff] }
 0xa7c   :  { %v24577_v22 = vadd.f32 0.0009, %v24561_v38  ;;  %v35227_v38 = vld [vmem:[#allocation106_spill] sm:$0xff] }
 0xa7d   :  { %v24576_v51 = vadd.f32 0.0009, %v24560_v57  ;;  %v24436_v57 = vmul.f32 2.0, %v35228_v62 }
 0xa7e   :  { %v33747_v23 = vmul.f32 %v24577_v22, %v24545_v50 }
 0xa7f   :  { %v33749_v49 = vmul.f32 %v24576_v51, %v24544_v55  ;;  %v24452_v55 = vadd.f32 0.0001, %v24436_v57 }
 0xa80   :  { %28422 = vmatmul.mubr.f32.vlgmr.msra.gmra.mrb[70].mxu1 %v32162_v33  ;;  %30409 = vrcp.f32 %v33747_v23 }
 0xa81   :  { %29483 = vmatpush3.bf16.msra.mxu1 %v35204_v59  ;;  %28428 = vmatprep.mubr.f32.mxu1 %v32125_v40  ;;  %30411 = vrcp.f32 %v33749_v49 }
 0xa82   :  { %29485 = vmatprep.subr.bf16.mxu1 %v35210_v5 }
 0xa84   :  { %28429 = vmatmul.mubr.f32.vlgmr.msra.gmra.mrb[72].mxu1 %v32175_v13 }
 0xa85   :  { %29487 = vmatpush3.bf16.msra.mxu1 %v35210_v5  ;;  %28435 = vmatprep.mubr.f32.mxu1 %v32111_v4 }
 0xa86   :  { %29489 = vmatprep.subr.bf16.mxu1 %v35211_v53 }
 0xa8c   :  { %28436 = vmatmul.mubr.f32.vlgmr.msra.gmra.mrb[72].mxu1 %v32162_v33 }
 0xa8d   :  { %29491 = vmatpush3.bf16.msra.mxu1 %v35211_v53  ;;  %28442 = vmatprep.mubr.f32.mxu1 %v32115_v27  ;;  %v30386_v53 = vpop.eup %30385 }
 0xa8e   :  { %29493 = vmatprep.subr.bf16.mxu1 %v35204_v59 }
 0xa94   :  { %28443 = vmatmul.mubr.f32.vlgmr.msra.gmra.mrb[72].mxu1 %v32165_v6 }
 0xa95   :  { %29495 = vmatpush3.bf16.msra.mxu1 %v35204_v59  ;;  %28449 = vmatprep.mubr.f32.mxu1 %v32119_v45 }
 0xa96   :  { %29497 = vmatprep.subr.bf16.mxu1 %v35212_v8 }
 0xa9c   :  { %28450 = vmatmul.mubr.f32.vlgmr.msra.gmra.mrb[72].mxu1 %v32168_v39 }
 0xa9d   :  { %29499 = vmatpush3.bf16.msra.mxu1 %v35212_v8  ;;  %28456 = vmatprep.mubr.f32.mxu1 %v32111_v4 }
 0xa9e   :  { %29501 = vmatprep.subr.bf16.mxu1 %v35204_v59 }
 0xaa3   :  { %v28255_v54 = vpop.f32.mrb[62].mxu1 }
 0xaa4   :  { %v24419_v2 = vsub.f32 %v28255_v54, %v35213_v1  ;;  %v20314_v11 = vpop.f32.mrb[63].mxu1  ;;  %28457 = vmatmul.mubr.f32.vlgmr.msra.gmra.mrb[72].mxu1 %v32162_v33  ;;  %v30388_v54 = vpop.eup %30387 }
 0xaa5   :  { %v24418_v17 = vsub.f32 %v20314_v11, %v35214_v21  ;;  %29503 = vmatpush3.bf16.msra.mxu1 %v35204_v59  ;;  %28463 = vmatprep.mubr.f32.mxu1 %v32111_v4  ;;  %v24437_v59 = vmul.f32 2.0, %v35227_v38  ;;  %v35230_v21 = vld [vmem:[#allocation100_spill] sm:$0xff] }
 0xaa6   :  { %v24563_v46 = vadd.f32 %v24419_v2, %v35217_v43  ;;  %29505 = vmatprep.subr.bf16.mxu1 %v35218_v12  ;;  %v35232_v43 = vld [vmem:[#allocation97_spill] sm:$0xff] }
 0xaa7   :  { %v24562_v20 = vadd.f32 %v24418_v17, %v35221_v58  ;;  %v24453_v22 = vadd.f32 0.0001, %v24437_v59 }
 0xaa8   :  { %v24579_v9 = vadd.f32 0.0009, %v24563_v46 }
 0xaa9   :  { %v24578_v24 = vadd.f32 0.0009, %v24562_v20  ;;  %v35234_v20 = vld [vmem:[#allocation113_spill] sm:$0xff] }
 0xaaa   :  { %v33785_v35 = vmul.f32 %v24579_v9, %v24547_v37  ;;  %v24438_v10 = vmul.f32 2.0, %v35234_v20 }
 0xaab   :  { %v33787_v61 = vmul.f32 %v24578_v24, %v24546_v36 }
 0xaac   :  { %28464 = vmatmul.mubr.f32.vlgmr.msra.gmra.mrb[72].mxu1 %v32162_v33  ;;  %v24454_v24 = vadd.f32 0.0001, %v24438_v10  ;;  %30413 = vrcp.f32 %v33785_v35 }
 0xaad   :  { %29507 = vmatpush3.bf16.msra.mxu1 %v35218_v12  ;;  %28470 = vmatprep.mubr.f32.mxu1 %v32125_v40  ;;  %30415 = vrcp.f32 %v33787_v61 }
 0xaae   :  { %29509 = vmatprep.subr.bf16.mxu1 %v35224_v29 }
 0xab0   :  { %28471 = vmatmul.mubr.f32.vlgmr.msra.gmra.mrb[74].mxu1 %v32175_v13 }
 0xab1   :  { %29511 = vmatpush3.bf16.msra.mxu1 %v35224_v29  ;;  %28477 = vmatprep.mubr.f32.mxu1 %v32111_v4 }
 0xab2   :  { %29513 = vmatprep.subr.bf16.mxu1 %v35225_v25 }
 0xab8   :  { %28478 = vmatmul.mubr.f32.vlgmr.msra.gmra.mrb[74].mxu1 %v32162_v33 }
 0xab9   :  { %29515 = vmatpush3.bf16.msra.mxu1 %v35225_v25  ;;  %28484 = vmatprep.mubr.f32.mxu1 %v32115_v27 }
 0xaba   :  { %29517 = vmatprep.subr.bf16.mxu1 %v35218_v12 }
 0xac0   :  { %28485 = vmatmul.mubr.f32.vlgmr.msra.gmra.mrb[74].mxu1 %v32165_v6 }
 0xac1   :  { %29519 = vmatpush3.bf16.msra.mxu1 %v35218_v12  ;;  %28491 = vmatprep.mubr.f32.mxu1 %v32119_v45 }
 0xac2   :  { %29521 = vmatprep.subr.bf16.mxu1 %v35226_v30 }
 0xac8   :  { %28492 = vmatmul.mubr.f32.vlgmr.msra.gmra.mrb[74].mxu1 %v32168_v39 }
 0xac9   :  { %29523 = vmatpush3.bf16.msra.mxu1 %v35226_v30  ;;  %28498 = vmatprep.mubr.f32.mxu1 %v32111_v4  ;;  %v30390_v30 = vpop.eup %30389 }
 0xaca   :  { %29525 = vmatprep.subr.bf16.mxu1 %v35218_v12 }
 0xacf   :  { %v28297_v7 = vpop.f32.mrb[64].mxu1 }
 0xad0   :  { %v24421_v3 = vsub.f32 %v28297_v7, %v35227_v38  ;;  %v20816_v44 = vpop.f32.mrb[65].mxu1  ;;  %28499 = vmatmul.mubr.f32.vlgmr.msra.gmra.mrb[74].mxu1 %v32162_v33  ;;  %v30392_v38 = vpop.eup %30391 }
 0xad1   :  { %v24420_v56 = vsub.f32 %v20816_v44, %v35228_v62  ;;  %29527 = vmatpush3.bf16.msra.mxu1 %v35218_v12  ;;  %28505 = vmatprep.mubr.f32.mxu1 %v32111_v4  ;;  %v35233_v12 = vld [vmem:[#allocation111_spill] sm:$0xff]  ;;  %v35236_v44 = vld [vmem:[#allocation105_spill] sm:$0xff] }
 0xad2   :  { %v24469_v50 = vmul.f32 2.0, %v24421_v3  ;;  %29529 = vmatprep.subr.bf16.mxu1 %v35229_v31  ;;  %v24439_v14 = vmul.f32 2.0, %v35233_v12 }
 0xad3   :  { %v24468_v15 = vmul.f32 2.0, %v24420_v56 }
 0xad4   :  { %v24485_v47 = vadd.f32 0.0009, %v24469_v50  ;;  %v24455_v16 = vadd.f32 0.0001, %v24439_v14  ;;  %v35237_v50 = vld [vmem:[#allocation98_spill] sm:$0xff] }
 0xad5   :  { %v24484_v51 = vadd.f32 0.0009, %v24468_v15 }
 0xad6   :  { %v24501_v5 = vmul.f32 %v24485_v47, %v24453_v22  ;;  %v35240_v22 = vld [vmem:[#allocation116_spill] sm:$0xff] }
 0xad7   :  { %v24500_v8 = vmul.f32 %v24484_v51, %v24452_v55 }
 0xad8   :  { %v24613_v1 = vmul.f32 %v30386_v53, %v24501_v5  ;;  %28506 = vmatmul.mubr.f32.vlgmr.msra.gmra.mrb[74].mxu1 %v32162_v33 }
 0xad9   :  { %v24612_v2 = vmul.f32 %v30388_v54, %v24500_v8  ;;  %29531 = vmatpush3.bf16.msra.mxu1 %v35229_v31  ;;  %28512 = vmatprep.mubr.f32.mxu1 %v32125_v40  ;;  %v30394_v54 = vpop.eup %30393 }
 0xada   :  { %v24658_v11 = vsel %vm155_vm0, %v24613_v1, 0.0  ;;  %29533 = vmatprep.subr.bf16.mxu1 %v35230_v21 }
 0xadb   :  { %v24657_v17 = vsel %vm155_vm0, %v24612_v2, 0.0  ;;  %v30396_v2 = vpop.eup %30395 }
 0xadc   :  { %v24659_v18 = vadd.f32 %v24658_v11, %v24657_v17  ;;  %28513 = vmatmul.mubr.f32.vlgmr.msra.gmra.mrb[76].mxu1 %v32175_v13  ;;  %v30398_v42 = vpop.eup %30397 }
 0xadd   :  { %29535 = vmatpush3.bf16.msra.mxu1 %v35230_v21  ;;  %28519 = vmatprep.mubr.f32.mxu1 %v32111_v4  ;;  %v30400_v63 = vpop.eup %30399 }
 0xade   :  { %29537 = vmatprep.subr.bf16.mxu1 %v35231_v34  ;;  %v30402_v28 = vpop.eup %30401 }
 0xadf   :  { %v30404_v41 = vpop.eup %30403 }
 0xae0   :  { %v30406_v52 = vpop.eup %30405 }
 0xae1   :  { %v30408_v26 = vpop.eup %30407 }
 0xae2   :  { %v30410_v23 = vpop.eup %30409 }
 0xae3   :  { %v30412_v49 = vpop.eup %30411 }
 0xae4   :  { %28520 = vmatmul.mubr.f32.vlgmr.msra.gmra.mrb[76].mxu1 %v32162_v33  ;;  %v30414_v35 = vpop.eup %30413 }
 0xae5   :  { %29539 = vmatpush3.bf16.msra.mxu1 %v35231_v34  ;;  %28526 = vmatprep.mubr.f32.mxu1 %v32115_v27  ;;  %v30416_v61 = vpop.eup %30415 }
 0xae6   :  { %29541 = vmatprep.subr.bf16.mxu1 %v35229_v31 }
 0xaec   :  { %28527 = vmatmul.mubr.f32.vlgmr.msra.gmra.mrb[76].mxu1 %v32165_v6 }
 0xaed   :  { %29543 = vmatpush3.bf16.msra.mxu1 %v35229_v31  ;;  %28533 = vmatprep.mubr.f32.mxu1 %v32119_v45 }
 0xaee   :  { %29545 = vmatprep.subr.bf16.mxu1 %v35232_v43 }
 0xaf4   :  { %28534 = vmatmul.mubr.f32.vlgmr.msra.gmra.mrb[76].mxu1 %v32168_v39 }
 0xaf5   :  { %29547 = vmatpush3.bf16.msra.mxu1 %v35232_v43  ;;  %28540 = vmatprep.mubr.f32.mxu1 %v32111_v4 }
 0xaf6   :  { %29549 = vmatprep.subr.bf16.mxu1 %v35229_v31 }
 0xafb   :  { %v28339_v46 = vpop.f32.mrb[66].mxu1 }
 0xafc   :  { %v24423_v19 = vsub.f32 %v28339_v46, %v35233_v12  ;;  %v21318_v58 = vpop.f32.mrb[67].mxu1  ;;  %28541 = vmatmul.mubr.f32.vlgmr.msra.gmra.mrb[76].mxu1 %v32162_v33  ;;  %v35241_v46 = vld [vmem:[#allocation118_spill] sm:$0xff] }
 0xafd   :  { %v24422_v37 = vsub.f32 %v21318_v58, %v35234_v20  ;;  %29551 = vmatpush3.bf16.msra.mxu1 %v35229_v31  ;;  %28547 = vmatprep.mubr.f32.mxu1 %v32111_v4  ;;  %v24443_v12 = vmul.f32 2.0, %v35241_v46  ;;  %v35242_v58 = vld [vmem:[#allocation146_spill] sm:$0xff] }
 0xafe   :  { %v24471_v9 = vmul.f32 2.0, %v24423_v19  ;;  %29553 = vmatprep.subr.bf16.mxu1 %v35235_v32  ;;  %v24442_v20 = vmul.f32 2.0, %v35242_v58 }
 0xaff   :  { %v24470_v60 = vmul.f32 2.0, %v24422_v37 }
 0xb00   :  { %v24487_v36 = vadd.f32 0.0009, %v24471_v9  ;;  %v24459_v9 = vadd.f32 0.0001, %v24443_v12 }
 0xb01   :  { %v24486_v29 = vadd.f32 0.0009, %v24470_v60  ;;  %v24458_v60 = vadd.f32 0.0001, %v24442_v20 }
 0xb02   :  { %v24503_v25 = vmul.f32 %v24487_v36, %v24455_v16 }
 0xb03   :  { %v24502_v7 = vmul.f32 %v24486_v29, %v24454_v24 }
 0xb04   :  { %v24615_v59 = vmul.f32 %v30390_v30, %v24503_v25  ;;  %28548 = vmatmul.mubr.f32.vlgmr.msra.gmra.mrb[76].mxu1 %v32162_v33 }
 0xb05   :  { %v24614_v3 = vmul.f32 %v30392_v38, %v24502_v7  ;;  %29555 = vmatpush3.bf16.msra.mxu1 %v35235_v32  ;;  %28554 = vmatprep.mubr.f32.mxu1 %v32125_v40  ;;  %v35238_v40 = vld [vmem:[#allocation103_spill] sm:$0xff] }
 0xb06   :  { %29557 = vmatprep.subr.bf16.mxu1 %v35236_v44  ;;  %v24662_v56 = vsel %vm155_vm0, %v24615_v59, 0.0 }
 0xb07   :  { %v24660_v62 = vsel %vm155_vm0, %v24614_v3, 0.0 }
 0xb08   :  { %v24661_v57 = vadd.f32 %v24660_v62, %v24659_v18  ;;  %28555 = vmatmul.mubr.f32.vlgmr.msra.gmra.mrb[78].mxu1 %v32175_v13 }
 0xb09   :  { %29559 = vmatpush3.bf16.msra.mxu1 %v35236_v44  ;;  %28561 = vmatprep.mubr.f32.mxu1 %v32111_v4  ;;  %v35243_v44 = vld [vmem:[#allocation147_spill] sm:$0xff] }
 0xb0a   :  { %29561 = vmatprep.subr.bf16.mxu1 %v35237_v50  ;;  %v24663_v31 = vadd.f32 %v24662_v56, %v24661_v57  ;;  %v24445_v62 = vmul.f32 2.0, %v35243_v44 }
 0xb10   :  { %28562 = vmatmul.mubr.f32.vlgmr.msra.gmra.mrb[78].mxu1 %v32162_v33 }
 0xb11   :  { %29563 = vmatpush3.bf16.msra.mxu1 %v35237_v50  ;;  %28568 = vmatprep.mubr.f32.mxu1 %v32115_v27  ;;  %v35244_v50 = vld [vmem:[#allocation150_spill] sm:$0xff] }
 0xb12   :  { %29565 = vmatprep.subr.bf16.mxu1 %v35235_v32 }
 0xb18   :  { %28569 = vmatmul.mubr.f32.vlgmr.msra.gmra.mrb[78].mxu1 %v32165_v6  ;;  %v35239_v6 = vld [vmem:[#allocation115_spill] sm:$0xff] }
 0xb19   :  { %29567 = vmatpush3.bf16.msra.mxu1 %v35235_v32  ;;  %28575 = vmatprep.mubr.f32.mxu1 %v32119_v45  ;;  %v24441_v13 = vmul.f32 2.0, %v35239_v6 }
 0xb1a   :  { %29569 = vmatprep.subr.bf16.mxu1 %v35238_v40 }
 0xb1b   :  { %v24457_v51 = vadd.f32 0.0001, %v24441_v13  ;;  %v24461_v13 = vadd.f32 0.0001, %v24445_v62 }
 0xb20   :  { %28576 = vmatmul.mubr.f32.vlgmr.msra.gmra.mrb[78].mxu1 %v32168_v39  ;;  %v24440_v39 = vmul.f32 2.0, %v35240_v22 }
 0xb21   :  { %29571 = vmatpush3.bf16.msra.mxu1 %v35238_v40  ;;  %28582 = vmatprep.mubr.f32.mxu1 %v32111_v4 }
 0xb22   :  { %29573 = vmatprep.subr.bf16.mxu1 %v35235_v32  ;;  %v24456_v5 = vadd.f32 0.0001, %v24440_v39 }
 0xb27   :  { %v28381_v27 = vpop.f32.mrb[68].mxu1 }
 0xb28   :  { %v24425_v15 = vsub.f32 %v28381_v27, %v35239_v6  ;;  %v21820_v45 = vpop.f32.mrb[69].mxu1  ;;  %28583 = vmatmul.mubr.f32.vlgmr.msra.gmra.mrb[78].mxu1 %v32162_v33 }
 0xb29   :  { %v24424_v47 = vsub.f32 %v21820_v45, %v35240_v22  ;;  %29575 = vmatpush3.bf16.msra.mxu1 %v35235_v32  ;;  %28589 = vmatprep.mubr.f32.mxu1 %v32111_v4 }
 0xb2a   :  { %v24473_v55 = vmul.f32 2.0, %v24425_v15 }
 0xb2b   :  { %v24472_v0 = vmul.f32 2.0, %v24424_v47 }
 0xb2c   :  { %v24489_v48 = vadd.f32 0.0009, %v24473_v55 }
 0xb2d   :  { %v24488_v53 = vadd.f32 0.0009, %v24472_v0 }
 0xb2e   :  { %v24505_v8 = vmul.f32 %v24489_v48, %v24457_v51 }
 0xb2f   :  { %v24504_v1 = vmul.f32 %v24488_v53, %v24456_v5 }
 0xb30   :  { %v24617_v11 = vmul.f32 %v30394_v54, %v24505_v8  ;;  %28590 = vmatmul.mubr.f32.vlgmr.msra.gmra.mrb[78].mxu1 %v32162_v33  ;;  %v35245_v54 = vld [vmem:[#allocation153_spill] sm:$0xff] }
 0xb31   :  { %v24616_v21 = vmul.f32 %v30396_v2, %v24504_v1  ;;  %v24447_v1 = vmul.f32 2.0, %v35245_v54 }
 0xb32   :  { %v24666_v34 = vsel %vm155_vm0, %v24617_v11, 0.0 }
 0xb33   :  { %v24664_v17 = vsel %vm155_vm0, %v24616_v21, 0.0  ;;  %v35246_v21 = vld [vmem:[#allocation157_spill] sm:$0xff] }
 0xb34   :  { %v24665_v18 = vadd.f32 %v24664_v17, %v24663_v31  ;;  %v24444_v31 = vmul.f32 2.0, %v35244_v50  ;;  %v24446_v17 = vmul.f32 2.0, %v35246_v21 }
 0xb36   :  { %v24667_v4 = vadd.f32 %v24666_v34, %v24665_v18  ;;  %v24460_v45 = vadd.f32 0.0001, %v24444_v31  ;;  %v24462_v12 = vadd.f32 0.0001, %v24446_v17 }
 0xb53   :  { %v28423_v43 = vpop.f32.mrb[70].mxu1 }
 0xb54   :  { %v24427_v14 = vsub.f32 %v28423_v43, %v35241_v46  ;;  %v22322_v19 = vpop.f32.mrb[71].mxu1  ;;  %v24463_v43 = vadd.f32 0.0001, %v24447_v1 }
 0xb55   :  { %v24426_v33 = vsub.f32 %v22322_v19, %v35242_v58 }
 0xb56   :  { %v24475_v10 = vmul.f32 2.0, %v24427_v14 }
 0xb57   :  { %v24474_v37 = vmul.f32 2.0, %v24426_v33 }
 0xb58   :  { %v24491_v32 = vadd.f32 0.0009, %v24475_v10 }
 0xb59   :  { %v24490_v16 = vadd.f32 0.0009, %v24474_v37 }
 0xb5a   :  { %v24507_v36 = vmul.f32 %v24491_v32, %v24459_v9 }
 0xb5b   :  { %v24506_v24 = vmul.f32 %v24490_v16, %v24458_v60  ;;  %v35247_v16 = vld [vmem:[#allocation123_spill] sm:$0xff] }
 0xb5c   :  { %v24619_v29 = vmul.f32 %v30398_v42, %v24507_v36  ;;  %v24449_v36 = vmul.f32 2.0, %v35247_v16 }
 0xb5d   :  { %v24618_v25 = vmul.f32 %v30400_v63, %v24506_v24  ;;  %v35248_v63 = vld [vmem:[#allocation128_spill] sm:$0xff] }
 0xb5e   :  { %v24670_v38 = vsel %vm155_vm0, %v24619_v29, 0.0  ;;  %v24448_v29 = vmul.f32 2.0, %v35248_v63 }
 0xb5f   :  { %v24668_v30 = vsel %vm155_vm0, %v24618_v25, 0.0 }
 0xb60   :  { %v24669_v7 = vadd.f32 %v24668_v30, %v24667_v4 }
 0xb62   :  { %v24671_v59 = vadd.f32 %v24670_v38, %v24669_v7  ;;  %v24465_v38 = vadd.f32 0.0001, %v24449_v36 }
 0xb7f   :  { %v28465_v3 = vpop.f32.mrb[72].mxu1 }
 0xb80   :  { %v24429_v57 = vsub.f32 %v28465_v3, %v35243_v44  ;;  %v22824_v56 = vpop.f32.mrb[73].mxu1  ;;  %v24464_v3 = vadd.f32 0.0001, %v24448_v29 }
 0xb81   :  { %v24428_v40 = vsub.f32 %v22824_v56, %v35244_v50 }
 0xb82   :  { %v24477_v27 = vmul.f32 2.0, %v24429_v57 }
 0xb83   :  { %v24476_v6 = vmul.f32 2.0, %v24428_v40 }
 0xb84   :  { %v24493_v15 = vadd.f32 0.0009, %v24477_v27 }
 0xb85   :  { %v24492_v22 = vadd.f32 0.0009, %v24476_v6 }
 0xb86   :  { %v24509_v39 = vmul.f32 %v24493_v15, %v24461_v13  ;;  %v35249_v15 = vld [vmem:[#allocation136_spill] sm:$0xff] }
 0xb87   :  { %v24508_v47 = vmul.f32 %v24492_v22, %v24460_v45  ;;  %v24451_v45 = vmul.f32 2.0, %v35249_v15 }
 0xb88   :  { %v24621_v55 = vmul.f32 %v30402_v28, %v24509_v39  ;;  %v35250_v28 = vld [vmem:[#allocation141_spill] sm:$0xff] }
 0xb89   :  { %v24620_v0 = vmul.f32 %v30404_v41, %v24508_v47  ;;  %v24450_v47 = vmul.f32 2.0, %v35250_v28 }
 0xb8a   :  { %v24674_v5 = vsel %vm155_vm0, %v24621_v55, 0.0 }
 0xb8b   :  { %v24672_v51 = vsel %vm155_vm0, %v24620_v0, 0.0 }
 0xb8c   :  { %v24673_v48 = vadd.f32 %v24672_v51, %v24671_v59  ;;  %v24467_v51 = vadd.f32 0.0001, %v24451_v45 }
 0xb8e   :  { %v24675_v53 = vadd.f32 %v24674_v5, %v24673_v48  ;;  %v24466_v5 = vadd.f32 0.0001, %v24450_v47 }
 0xbab   :  { %v28507_v8 = vpop.f32.mrb[74].mxu1 }
 0xbac   :  { %v24431_v2 = vsub.f32 %v28507_v8, %v35245_v54  ;;  %v23326_v11 = vpop.f32.mrb[75].mxu1 }
 0xbad   :  { %v24430_v18 = vsub.f32 %v23326_v11, %v35246_v21 }
 0xbae   :  { %v24479_v34 = vmul.f32 2.0, %v24431_v2 }
 0xbaf   :  { %v24478_v4 = vmul.f32 2.0, %v24430_v18 }
 0xbb0   :  { %v24495_v46 = vadd.f32 0.0009, %v24479_v34 }
 0xbb1   :  { %v24494_v14 = vadd.f32 0.0009, %v24478_v4 }
 0xbb2   :  { %v24511_v19 = vmul.f32 %v24495_v46, %v24463_v43 }
 0xbb3   :  { %v24510_v58 = vmul.f32 %v24494_v14, %v24462_v12 }
 0xbb4   :  { %v24623_v20 = vmul.f32 %v30406_v52, %v24511_v19 }
 0xbb5   :  { %v24622_v33 = vmul.f32 %v30408_v26, %v24510_v58 }
 0xbb6   :  { %v24678_v9 = vsel %vm155_vm0, %v24623_v20, 0.0 }
 0xbb7   :  { %v24676_v10 = vsel %vm155_vm0, %v24622_v33, 0.0 }
 0xbb8   :  { %v24677_v37 = vadd.f32 %v24676_v10, %v24675_v53 }
 0xbba   :  { %v24679_v32 = vadd.f32 %v24678_v9, %v24677_v37 }
 0xbd7   :  { %v28549_v60 = vpop.f32.mrb[76].mxu1 }
 0xbd8   :  { %v24433_v42 = vsub.f32 %v28549_v60, %v35247_v16  ;;  %v23828_v24 = vpop.f32.mrb[77].mxu1 }
 0xbd9   :  { %v24432_v25 = vsub.f32 %v23828_v24, %v35248_v63 }
 0xbda   :  { %v24481_v30 = vmul.f32 2.0, %v24433_v42 }
 0xbdb   :  { %v24480_v7 = vmul.f32 2.0, %v24432_v25 }
 0xbdc   :  { %v24497_v59 = vadd.f32 0.0009, %v24481_v30 }
 0xbdd   :  { %v24496_v44 = vadd.f32 0.0009, %v24480_v7 }
 0xbde   :  { %v24513_v62 = vmul.f32 %v24497_v59, %v24465_v38 }
 0xbdf   :  { %v24512_v57 = vmul.f32 %v24496_v44, %v24464_v3 }
 0xbe0   :  { %v24625_v56 = vmul.f32 %v30410_v23, %v24513_v62 }
 0xbe1   :  { %v24624_v50 = vmul.f32 %v30412_v49, %v24512_v57 }
 0xbe2   :  { %v24682_v27 = vsel %vm155_vm0, %v24625_v56, 0.0 }
 0xbe3   :  { %v24680_v31 = vsel %vm155_vm0, %v24624_v50, 0.0 }
 0xbe4   :  { %v24681_v40 = vadd.f32 %v24680_v31, %v24679_v32 }
 0xbe6   :  { %v24683_v6 = vadd.f32 %v24682_v27, %v24681_v40 }
 0xc03   :  { %v28591_v13 = vpop.f32.mrb[78].mxu1 }
 0xc04   :  { %v24435_v22 = vsub.f32 %v28591_v13, %v35249_v15  ;;  %v24330_v39 = vpop.f32.mrb[79].mxu1 }
 0xc05   :  { %v24434_v41 = vsub.f32 %v24330_v39, %v35250_v28 }
 0xc06   :  { %v24483_v55 = vmul.f32 2.0, %v24435_v22 }
 0xc07   :  { %v24482_v0 = vmul.f32 2.0, %v24434_v41 }
 0xc08   :  { %v24499_v48 = vadd.f32 0.0009, %v24483_v55 }
 0xc09   :  { %v24498_v53 = vadd.f32 0.0009, %v24482_v0 }
 0xc0a   :  { %v24515_v8 = vmul.f32 %v24499_v48, %v24467_v51 }
 0xc0b   :  { %v24514_v54 = vmul.f32 %v24498_v53, %v24466_v5 }
 0xc0c   :  { %v24627_v1 = vmul.f32 %v30414_v35, %v24515_v8 }
 0xc0d   :  { %v24626_v2 = vmul.f32 %v30416_v61, %v24514_v54 }
 0xc0e   :  { %v24686_v17 = vsel %vm155_vm0, %v24627_v1, 0.0 }
 0xc0f   :  { %v24684_v11 = vsel %vm155_vm0, %v24626_v2, 0.0 }
 0xc10   :  { %v24685_v21 = vadd.f32 %v24684_v11, %v24683_v6 }
 0xc12   :  { %v24687_v18 = vadd.f32 %v24686_v17, %v24685_v21 }
 0xc14   :  { %24688 = vadd.xlane.f32.xlu0 %v24687_v18 }
 0xca1   :  { %v24689_v34 = vpop.xlane.xlu0 %24688 }
 0xca2   :  { %v24690_v4 = vrot.slane %v24689_v34, 4 }
 0xca4   :  { %v24691_v43 = vadd.f32 %v24690_v4, %v24689_v34 }
 0xca6   :  { %v24692_v46 = vrot.slane %v24691_v43, 2 }
 0xca8   :  { %v24693_v12 = vadd.f32 %v24692_v46, %v24691_v43 }
 0xcaa   :  { %v24694_v14 = vrot.slane %v24693_v12, 1 }
 0xcac   :  { %v24695_v19 = vadd.f32 %v24694_v14, %v24693_v12 }
 0xcae   :  { %30376 = vpush %v24695_v19 }
 0xcdf   :  { %s30377_s28 = spop %30376 }
 0xce0   :  { %v24697_v52 = vstv %s30377_s28 }
 0xce1   :  { %24698 = vst [vmem:[#allocation10] sm:$0x1] %v24697_v52 }
 0xce2   :  { %30518 = shalt.err (!%p30515_p8)
}
 0xce3   :  { %s30519_s15 = scalar_lea.hbm %s33941_s4, 16 }
 0xce4   :  { %p30520_p9 = scmp.ne.s32.totalorder %s33941_s4, %s30519_s15  ;;  %p30523_p10 = scmp.lt.u32.totalorder %s30519_s15, %s33941_s4 }
 0xce6   :  { %p30525_p11 = pnand %p30523_p10, %p30520_p9 }
 0xce8   :  { %30528 = shalt.err (!%p30525_p11)
}
 0xce9   :  { %24708 = dma.vmem_to_hbm [thread:$0]  %s24706_s27, 16, %s33941_s4, [#allocation4]  }
 0xcea   :  { %30535 = dma.done.wait [#allocation4], 16  }
 0xceb   :  { %30536 = vsyncadd [#allocation4], 4294967280 }
 0xcec   :  { %24712 = vsyncpa [#allocation3], 1 }
 0xced   :  { %24713 = vsyncpa [#allocation6], 1 }
 0xcee   :  { %24714 = vsyncpa [#allocation9], 1 }
 0xcef   :  { %24715 = vsyncpa [#allocation4], 1 }

</bundles_post_ra>
